<compile_context>
chip_gen: v7x
topology: tpu7x:2x2x1
jax: 0.10.0
libtpu: 0.0.40
codegen_flags: <defaults>
</compile_context>

<pallas_src>
import jax
import jax.numpy as jnp
from jax.experimental import pallas as pl
from jax.experimental.pallas import tpu as pltpu


LANE = 128          # TPU lane width
SUBLANE_BF16 = 16   # bf16 sublane packing (rows per vreg)
N_CLASSES = 3       # out_fc output features in the PyTorch module


def _round_up(x, m):
    return ((x + m - 1) // m) * m


# ---------------------------------------------------------------------------
# Pallas kernel: fused 5-layer MLP (Linear+ReLU x4, Linear)
# ---------------------------------------------------------------------------
def _mlp_kernel(x_ref,
                w1_ref, b1_ref, w2_ref, b2_ref, w3_ref, b3_ref,
                w4_ref, b4_ref, w5_ref, b5_ref,
                o_ref):
    """bf16 MXU matmuls with f32 accumulation; activations never leave VMEM.

    The f32 -> bf16 cast of the input tile is done here (hidden under the MXU)
    instead of as a separate XLA fusion in the wrapper.
    """
    x = x_ref[...].astype(jnp.bfloat16)

    h = jnp.dot(x, w1_ref[...], preferred_element_type=jnp.float32)
    h = jnp.maximum(h + b1_ref[...], 0.0).astype(jnp.bfloat16)

    h = jnp.dot(h, w2_ref[...], preferred_element_type=jnp.float32)
    h = jnp.maximum(h + b2_ref[...], 0.0).astype(jnp.bfloat16)

    h = jnp.dot(h, w3_ref[...], preferred_element_type=jnp.float32)
    h = jnp.maximum(h + b3_ref[...], 0.0).astype(jnp.bfloat16)

    h = jnp.dot(h, w4_ref[...], preferred_element_type=jnp.float32)
    h = jnp.maximum(h + b4_ref[...], 0.0).astype(jnp.bfloat16)

    o_ref[...] = (jnp.dot(h, w5_ref[...], preferred_element_type=jnp.float32)
                  + b5_ref[...])


def fused_mlp(x_flat, weights, biases, *, tile_m_cap=512):
    """x_flat: (B, D) f32.  weights[i]: (K_pad, N_pad) bf16.  biases[i]: (1, N_pad) f32.

    Returns (B, N_out_pad) f32 logits (lane-padded last dim).
    """
    B, D = x_flat.shape
    K0 = weights[0].shape[0]      # first-layer input dim, padded to 128
    N_out = weights[-1].shape[1]  # last-layer output dim, padded to 128

    # Only pad the feature axis if it is not already lane-aligned (768 for
    # size=16 already is).  The batch axis stays ragged: Pallas masks the
    # partial last block, so there is no wrapper-side pad/cast/slice pass.
    if D != K0:
        x_flat = jnp.pad(x_flat, ((0, 0), (0, K0 - D)))

    # Tile the batch so that (a) tiles stay bf16-sublane aligned, (b) batches
    # large enough to matter get >= 2 grid steps so the "parallel" axis can
    # shard across v7x's two TensorCores, (c) at most tile_m_cap rows/step.
    tile_m = min(tile_m_cap, _round_up(pl.cdiv(max(B, 1), 2), SUBLANE_BF16))
    grid_m = pl.cdiv(B, tile_m)

    in_specs = [pl.BlockSpec((tile_m, K0), lambda i: (i, 0))]
    operands = [x_flat]
    for w, b in zip(weights, biases):
        # Constant index_map (0, 0): the weight/bias blocks are DMA'd once and
        # stay resident in VMEM across all M tiles (Pallas only re-issues the
        # copy when the block index changes).
        in_specs.append(pl.BlockSpec(w.shape, lambda i: (0, 0)))
        in_specs.append(pl.BlockSpec(b.shape, lambda i: (0, 0)))
        operands.append(w)
        operands.append(b)

    return pl.pallas_call(
        _mlp_kernel,
        out_shape=jax.ShapeDtypeStruct((B, N_out), jnp.float32),
        grid=(grid_m,),
        in_specs=in_specs,
        out_specs=pl.BlockSpec((tile_m, N_out), lambda i: (i, 0)),
        compiler_params=pltpu.CompilerParams(
            # Each M tile writes a distinct output block -> safe to shard
            # across TensorCores (helps v7x, neutral on v5e/v6e).
            dimension_semantics=("parallel",),
            # Actual need is ~6-16 MiB even at tile_m=512; keep the request at
            # the 32 MiB scoped default (v7x only has 64 MiB physical VMEM).
            vmem_limit_bytes=32 * 1024 * 1024,
        ),
    )(*operands)


# ---------------------------------------------------------------------------
# Parameter init (torch nn.Linear layout) and one-time Pallas preparation
# ---------------------------------------------------------------------------
def init_baseline(key, size):
    """Deterministic params matching BaseLine(size); torch layout (out, in)."""
    d_in = size * size * 3
    layer_dims = [
        (1024, d_in),   # in_fc
        (512, 1024),    # hidden_fc[0]
        (256, 512),     # hidden_fc[2]
        (128, 256),     # hidden_fc[4]
        (3, 256),       # out_fc (as declared in the module)
    ]
    keys = jax.random.split(key, len(layer_dims))
    params = []
    for (nout, nin), lk in zip(layer_dims, keys):
        kw, kb = jax.random.split(lk)
        bound = (1.0 / nin) ** 0.5
        w = jax.random.uniform(kw, (nout, nin), jnp.float32, -bound, bound)
        b = jax.random.uniform(kb, (nout,), jnp.float32, -bound, bound)
        params.append((w, b))
    return params


def prepare_params(params):
    """Transpose to (in, out), zero-pad to 128-lane multiples, cast weights to
    bf16 once (outside the per-call path), keep biases in f32 for the epilogue."""
    prev_out = None
    weights, biases = [], []
    for idx, (w, b) in enumerate(params):
        nout, nin = w.shape
        if idx == len(params) - 1 and prev_out is not None and nin != prev_out:
            # TODO(synk): the original module declares out_fc = nn.Linear(256, 3)
            # even though hidden_fc outputs 128 features, so its forward() would
            # raise a shape error in PyTorch; we use the first 128 input columns
            # of the declared weight so the network is runnable.
            w = w[:, :prev_out]
            nin = prev_out
        K_pad = _round_up(nin, LANE)
        N_pad = _round_up(nout, LANE)
        w_t = jnp.zeros((K_pad, N_pad), jnp.float32).at[:nin, :nout].set(w.T)
        weights.append(w_t.astype(jnp.bfloat16))
        biases.append(jnp.zeros((1, N_pad), jnp.float32).at[0, :nout].set(b))
        prev_out = nout
    return weights, biases


# ---------------------------------------------------------------------------
# Full forward pass (matches BaseLine.forward)
# ---------------------------------------------------------------------------
def baseline_forward(weights, biases, x_nchw):
    B = x_nchw.shape[0]
    x_flat = x_nchw.reshape(B, -1)          # torch.flatten(x, start_dim=1)
    out = fused_mlp(x_flat, weights, biases)
    return out[:, :N_CLASSES]               # drop lane padding of the 3 logits


if __name__ == "__main__":
    SIZE = 16                               # BaseLine(size=16) -> d_in = 768
    key = jax.random.PRNGKey(0)
    pkey, xkey = jax.random.split(key)

    params = init_baseline(pkey, SIZE)
    weights, biases = prepare_params(params)

    # small input consistent with the module: batch=2, 3 channels, 16x16 (NCHW)
    x = jax.random.normal(xkey, (2, 3, SIZE, SIZE), jnp.float32)

    fwd = jax.jit(baseline_forward)
    out = fwd(weights, biases, x)
    jax.block_until_ready(out)

    assert out.shape == (2, N_CLASSES) and out.dtype == jnp.float32
    assert bool(jnp.all(jnp.isfinite(out)))
    print("KERNEL_OK")
</pallas_src>

<mosaic_0001>
module attributes {stable_mosaic.version = 11 : i64} {
  func.func @_mlp_kernel(%arg0: i32, %arg1: memref<16x768xf32, #tpu.memory_space<vmem>>, %arg2: memref<768x1024xbf16, #tpu.memory_space<vmem>>, %arg3: memref<1x1024xf32, #tpu.memory_space<vmem>>, %arg4: memref<1024x512xbf16, #tpu.memory_space<vmem>>, %arg5: memref<1x512xf32, #tpu.memory_space<vmem>>, %arg6: memref<512x256xbf16, #tpu.memory_space<vmem>>, %arg7: memref<1x256xf32, #tpu.memory_space<vmem>>, %arg8: memref<256x128xbf16, #tpu.memory_space<vmem>>, %arg9: memref<1x128xf32, #tpu.memory_space<vmem>>, %arg10: memref<128x128xbf16, #tpu.memory_space<vmem>>, %arg11: memref<1x128xf32, #tpu.memory_space<vmem>>, %arg12: memref<16x128xf32, #tpu.memory_space<vmem>>) attributes {dimension_semantics = [#tpu.dimension_semantics<parallel>], iteration_bounds = array<i64: 1>, scalar_prefetch = 0 : i64, scratch_operands = 0 : i64, tpu.core_type = #tpu.core_type<tc>, window_params = [{transform_indices = @transform_0, window_bounds = array<i64: 16, 768>}, {pipeline_mode = #tpu.pipeline_mode<synchronous>, transform_indices = @transform_1, window_bounds = array<i64: 768, 1024>}, {pipeline_mode = #tpu.pipeline_mode<synchronous>, transform_indices = @transform_2, window_bounds = array<i64: 1, 1024>}, {pipeline_mode = #tpu.pipeline_mode<synchronous>, transform_indices = @transform_3, window_bounds = array<i64: 1024, 512>}, {pipeline_mode = #tpu.pipeline_mode<synchronous>, transform_indices = @transform_4, window_bounds = array<i64: 1, 512>}, {pipeline_mode = #tpu.pipeline_mode<synchronous>, transform_indices = @transform_5, window_bounds = array<i64: 512, 256>}, {pipeline_mode = #tpu.pipeline_mode<synchronous>, transform_indices = @transform_6, window_bounds = array<i64: 1, 256>}, {pipeline_mode = #tpu.pipeline_mode<synchronous>, transform_indices = @transform_7, window_bounds = array<i64: 256, 128>}, {pipeline_mode = #tpu.pipeline_mode<synchronous>, transform_indices = @transform_8, window_bounds = array<i64: 1, 128>}, {pipeline_mode = #tpu.pipeline_mode<synchronous>, transform_indices = @transform_9, window_bounds = array<i64: 128, 128>}, {pipeline_mode = #tpu.pipeline_mode<synchronous>, transform_indices = @transform_10, window_bounds = array<i64: 1, 128>}, {transform_indices = @transform_11, window_bounds = array<i64: 16, 128>}]} {
    %c0 = arith.constant 0 : index
    %c0_0 = arith.constant 0 : index
    %0 = vector.load %arg1[%c0, %c0_0] : memref<16x768xf32, #tpu.memory_space<vmem>>, vector<16x768xf32>
    %1 = arith.truncf %0 : vector<16x768xf32> to vector<16x768xbf16>
    %c0_1 = arith.constant 0 : index
    %c0_2 = arith.constant 0 : index
    %2 = vector.load %arg2[%c0_1, %c0_2] : memref<768x1024xbf16, #tpu.memory_space<vmem>>, vector<768x1024xbf16>
    %cst = arith.constant dense<0.000000e+00> : vector<16x1024xf32>
    %3 = tpu.matmul %1, %2, %cst {dimension_numbers = #tpu.dot_dimension_numbers<[1], [0], [0], [1], [0, 0, 1, 1], [], []>} : vector<16x768xbf16>, vector<768x1024xbf16>, vector<16x1024xf32> -> vector<16x1024xf32>
    %c0_3 = arith.constant 0 : index
    %c0_4 = arith.constant 0 : index
    %4 = vector.load %arg3[%c0_3, %c0_4] : memref<1x1024xf32, #tpu.memory_space<vmem>>, vector<1x1024xf32>
    %5 = vector.broadcast %4 : vector<1x1024xf32> to vector<16x1024xf32>
    %6 = arith.addf %3, %5 : vector<16x1024xf32>
    %cst_5 = arith.constant 0.000000e+00 : f32
    %7 = vector.broadcast %cst_5 : f32 to vector<16x1024xf32>
    %8 = arith.maximumf %6, %7 : vector<16x1024xf32>
    %9 = arith.truncf %8 : vector<16x1024xf32> to vector<16x1024xbf16>
    %c0_6 = arith.constant 0 : index
    %c0_7 = arith.constant 0 : index
    %10 = vector.load %arg4[%c0_6, %c0_7] : memref<1024x512xbf16, #tpu.memory_space<vmem>>, vector<1024x512xbf16>
    %cst_8 = arith.constant dense<0.000000e+00> : vector<16x512xf32>
    %11 = tpu.matmul %9, %10, %cst_8 {dimension_numbers = #tpu.dot_dimension_numbers<[1], [0], [0], [1], [0, 0, 1, 1], [], []>} : vector<16x1024xbf16>, vector<1024x512xbf16>, vector<16x512xf32> -> vector<16x512xf32>
    %c0_9 = arith.constant 0 : index
    %c0_10 = arith.constant 0 : index
    %12 = vector.load %arg5[%c0_9, %c0_10] : memref<1x512xf32, #tpu.memory_space<vmem>>, vector<1x512xf32>
    %13 = vector.broadcast %12 : vector<1x512xf32> to vector<16x512xf32>
    %14 = arith.addf %11, %13 : vector<16x512xf32>
    %cst_11 = arith.constant 0.000000e+00 : f32
    %15 = vector.broadcast %cst_11 : f32 to vector<16x512xf32>
    %16 = arith.maximumf %14, %15 : vector<16x512xf32>
    %17 = arith.truncf %16 : vector<16x512xf32> to vector<16x512xbf16>
    %c0_12 = arith.constant 0 : index
    %c0_13 = arith.constant 0 : index
    %18 = vector.load %arg6[%c0_12, %c0_13] : memref<512x256xbf16, #tpu.memory_space<vmem>>, vector<512x256xbf16>
    %cst_14 = arith.constant dense<0.000000e+00> : vector<16x256xf32>
    %19 = tpu.matmul %17, %18, %cst_14 {dimension_numbers = #tpu.dot_dimension_numbers<[1], [0], [0], [1], [0, 0, 1, 1], [], []>} : vector<16x512xbf16>, vector<512x256xbf16>, vector<16x256xf32> -> vector<16x256xf32>
    %c0_15 = arith.constant 0 : index
    %c0_16 = arith.constant 0 : index
    %20 = vector.load %arg7[%c0_15, %c0_16] : memref<1x256xf32, #tpu.memory_space<vmem>>, vector<1x256xf32>
    %21 = vector.broadcast %20 : vector<1x256xf32> to vector<16x256xf32>
    %22 = arith.addf %19, %21 : vector<16x256xf32>
    %cst_17 = arith.constant 0.000000e+00 : f32
    %23 = vector.broadcast %cst_17 : f32 to vector<16x256xf32>
    %24 = arith.maximumf %22, %23 : vector<16x256xf32>
    %25 = arith.truncf %24 : vector<16x256xf32> to vector<16x256xbf16>
    %c0_18 = arith.constant 0 : index
    %c0_19 = arith.constant 0 : index
    %26 = vector.load %arg8[%c0_18, %c0_19] : memref<256x128xbf16, #tpu.memory_space<vmem>>, vector<256x128xbf16>
    %cst_20 = arith.constant dense<0.000000e+00> : vector<16x128xf32>
    %27 = tpu.matmul %25, %26, %cst_20 {dimension_numbers = #tpu.dot_dimension_numbers<[1], [0], [0], [1], [0, 0, 1, 1], [], []>} : vector<16x256xbf16>, vector<256x128xbf16>, vector<16x128xf32> -> vector<16x128xf32>
    %c0_21 = arith.constant 0 : index
    %c0_22 = arith.constant 0 : index
    %28 = vector.load %arg9[%c0_21, %c0_22] : memref<1x128xf32, #tpu.memory_space<vmem>>, vector<1x128xf32>
    %29 = vector.broadcast %28 : vector<1x128xf32> to vector<16x128xf32>
    %30 = arith.addf %27, %29 : vector<16x128xf32>
    %cst_23 = arith.constant 0.000000e+00 : f32
    %31 = vector.broadcast %cst_23 : f32 to vector<16x128xf32>
    %32 = arith.maximumf %30, %31 : vector<16x128xf32>
    %33 = arith.truncf %32 : vector<16x128xf32> to vector<16x128xbf16>
    %c0_24 = arith.constant 0 : index
    %c0_25 = arith.constant 0 : index
    %34 = vector.load %arg10[%c0_24, %c0_25] : memref<128x128xbf16, #tpu.memory_space<vmem>>, vector<128x128xbf16>
    %cst_26 = arith.constant dense<0.000000e+00> : vector<16x128xf32>
    %35 = tpu.matmul %33, %34, %cst_26 {dimension_numbers = #tpu.dot_dimension_numbers<[1], [0], [0], [1], [0, 0, 1, 1], [], []>} : vector<16x128xbf16>, vector<128x128xbf16>, vector<16x128xf32> -> vector<16x128xf32>
    %c0_27 = arith.constant 0 : index
    %c0_28 = arith.constant 0 : index
    %36 = vector.load %arg11[%c0_27, %c0_28] : memref<1x128xf32, #tpu.memory_space<vmem>>, vector<1x128xf32>
    %37 = vector.broadcast %36 : vector<1x128xf32> to vector<16x128xf32>
    %38 = arith.addf %35, %37 : vector<16x128xf32>
    %c0_29 = arith.constant 0 : index
    %c0_30 = arith.constant 0 : index
    %39 = vector.load %arg12[%c0_29, %c0_30] : memref<16x128xf32, #tpu.memory_space<vmem>>, vector<16x128xf32>
    tpu.vector_store %arg12[%c0_29, %c0_30], %38 {strides = array<i32>} : memref<16x128xf32, #tpu.memory_space<vmem>>, vector<16x128xf32>,
    return
  }
  func.func @transform_0(%arg0: i32) -> (i32, i32) {
    %c0_i32 = arith.constant 0 : i32
    %c0_i32_0 = arith.constant 0 : i32
    return %arg0, %c0_i32 : i32, i32
  }
  func.func @transform_1(%arg0: i32) -> (i32, i32) {
    %c0_i32 = arith.constant 0 : i32
    %c0_i32_0 = arith.constant 0 : i32
    %c0_i32_1 = arith.constant 0 : i32
    return %c0_i32, %c0_i32_0 : i32, i32
  }
  func.func @transform_2(%arg0: i32) -> (i32, i32) {
    %c0_i32 = arith.constant 0 : i32
    %c0_i32_0 = arith.constant 0 : i32
    %c0_i32_1 = arith.constant 0 : i32
    return %c0_i32, %c0_i32_0 : i32, i32
  }
  func.func @transform_3(%arg0: i32) -> (i32, i32) {
    %c0_i32 = arith.constant 0 : i32
    %c0_i32_0 = arith.constant 0 : i32
    %c0_i32_1 = arith.constant 0 : i32
    return %c0_i32, %c0_i32_0 : i32, i32
  }
  func.func @transform_4(%arg0: i32) -> (i32, i32) {
    %c0_i32 = arith.constant 0 : i32
    %c0_i32_0 = arith.constant 0 : i32
    %c0_i32_1 = arith.constant 0 : i32
    return %c0_i32, %c0_i32_0 : i32, i32
  }
  func.func @transform_5(%arg0: i32) -> (i32, i32) {
    %c0_i32 = arith.constant 0 : i32
    %c0_i32_0 = arith.constant 0 : i32
    %c0_i32_1 = arith.constant 0 : i32
    return %c0_i32, %c0_i32_0 : i32, i32
  }
  func.func @transform_6(%arg0: i32) -> (i32, i32) {
    %c0_i32 = arith.constant 0 : i32
    %c0_i32_0 = arith.constant 0 : i32
    %c0_i32_1 = arith.constant 0 : i32
    return %c0_i32, %c0_i32_0 : i32, i32
  }
  func.func @transform_7(%arg0: i32) -> (i32, i32) {
    %c0_i32 = arith.constant 0 : i32
    %c0_i32_0 = arith.constant 0 : i32
    %c0_i32_1 = arith.constant 0 : i32
    return %c0_i32, %c0_i32_0 : i32, i32
  }
  func.func @transform_8(%arg0: i32) -> (i32, i32) {
    %c0_i32 = arith.constant 0 : i32
    %c0_i32_0 = arith.constant 0 : i32
    %c0_i32_1 = arith.constant 0 : i32
    return %c0_i32, %c0_i32_0 : i32, i32
  }
  func.func @transform_9(%arg0: i32) -> (i32, i32) {
    %c0_i32 = arith.constant 0 : i32
    %c0_i32_0 = arith.constant 0 : i32
    %c0_i32_1 = arith.constant 0 : i32
    return %c0_i32, %c0_i32_0 : i32, i32
  }
  func.func @transform_10(%arg0: i32) -> (i32, i32) {
    %c0_i32 = arith.constant 0 : i32
    %c0_i32_0 = arith.constant 0 : i32
    %c0_i32_1 = arith.constant 0 : i32
    return %c0_i32, %c0_i32_0 : i32, i32
  }
  func.func @transform_11(%arg0: i32) -> (i32, i32) {
    %c0_i32 = arith.constant 0 : i32
    %c0_i32_0 = arith.constant 0 : i32
    return %arg0, %c0_i32 : i32, i32
  }
}

</mosaic_0001>

<bundles_post_ra>
// kernel: baseline_forward.1
= control target key start
LH: loop header
LB: loop body
LE: loop exit
PB: predicated region body
PF: predicated region fallthrough
CT: control target
= control target key end

     0   :  { %16 = vsyncpa [#allocation3], 0  ;;  %s8005_s0 = inlined_call_operand.vmem [shape: f32[2,768], index: 0, kind: input, shape index: {}]   ;;  %s8006_s1 = inlined_call_operand.hbm [shape: bf16[768,1024], index: 1, kind: input, shape index: {}]   ;;  %s8007_s2 = inlined_call_operand.hbm [shape: f32[1,1024], index: 2, kind: input, shape index: {}]   ;;  %s8008_s3 = inlined_call_operand.hbm [shape: bf16[1024,512], index: 3, kind: input, shape index: {}]   ;;  %s8009_s4 = inlined_call_operand.hbm [shape: f32[1,512], index: 4, kind: input, shape index: {}]   ;;  %s8010_s5 = inlined_call_operand.hbm [shape: bf16[512,256], index: 5, kind: input, shape index: {}]   ;;  %s8011_s6 = inlined_call_operand.hbm [shape: f32[1,256], index: 6, kind: input, shape index: {}]   ;;  %s8012_s7 = inlined_call_operand.hbm [shape: bf16[256,128], index: 7, kind: input, shape index: {}]   ;;  %s8013_s8 = inlined_call_operand.hbm [shape: f32[1,128], index: 8, kind: input, shape index: {}]   ;;  %s8014_s9 = inlined_call_operand.hbm [shape: bf16[128,128], index: 9, kind: input, shape index: {}]   ;;  %s8015_s10 = inlined_call_operand.hbm [shape: f32[1,128], index: 10, kind: input, shape index: {}]   ;;  %s8016_s11 = inlined_call_operand.hbm [shape: f32[2,128], index: 11, kind: output, shape index: {}]  }
   0x1   :  { %17 = vsyncpa [#allocation6], 0 }
   0x2   :  { %18 = vsyncpa [#allocation9], 0 }
   0x3   :  { %19 = vsyncpa [#allocation12], 0 }
   0x4   :  { %20 = vsyncpa [#allocation15], 0 }
   0x5   :  { %21 = vsyncpa [#allocation18], 0 }
   0x6   :  { %22 = vsyncpa [#allocation4], 0  ;;  %s7595_s17 = smov [#allocation5]   ;;  %s7596_s19 = smov [#allocation8]  }
   0x7   :  { %s43_s18 = sshll.u32 %s7595_s17, 4  ;;  %s65_s20 = sshll.u32 %s7596_s19, 4  ;;  %s44_s18 = int_to_ptr.vmem [resolvable:$true] %s43_s18  ;;  %s66_s20 = int_to_ptr.vmem [resolvable:$true] %s65_s20 }
   0x8   :  { %s7339_s23 = scalar_lea.hbm %s8007_s2, 128 }
   0x9   :  { %p7340_p0 = scmp.ne.s32.totalorder %s8007_s2, %s7339_s23  ;;  %p7343_p1 = scmp.lt.u32.totalorder %s7339_s23, %s8007_s2 }
   0xb   :  { %p7345_p2 = pnand %p7343_p1, %p7340_p0 }
   0xd   :  { %7348 = shalt.err (!%p7345_p2)
}
   0xe   :  { %s7349_s28 = scalar_lea.vmem %s44_s18, 128  ;;  %p7354_p4 = scmp.lt.s32.totalorder %s44_s18, %s44_s18 }
   0xf   :  { %p7350_p3 = scmp.ne.s32.totalorder %s44_s18, %s7349_s28  ;;  %p7355_p5 = scmp.lt.s32.totalorder %s7349_s28, %s7349_s28 }
  0x11   :  { %p7356_p6 = por %p7355_p5, %p7354_p4 }
  0x13   :  { %p7357_p7 = pnand %p7356_p6, %p7350_p3 }
  0x15   :  { %7360 = shalt.err (!%p7357_p7)
}
  0x16   :  { %46 = dma.hbm_to_vmem [thread:$0]  %s8007_s2, 128, %s44_s18, [#allocation6]  }
  0x17   :  { %s7361_s14 = scalar_lea.hbm %s8009_s4, 64 }
  0x18   :  { %p7362_p8 = scmp.ne.s32.totalorder %s8009_s4, %s7361_s14  ;;  %p7365_p9 = scmp.lt.u32.totalorder %s7361_s14, %s8009_s4 }
  0x1a   :  { %p7367_p10 = pnand %p7365_p9, %p7362_p8 }
  0x1c   :  { %7370 = shalt.err (!%p7367_p10)
}
  0x1d   :  { %s7371_s21 = scalar_lea.vmem %s66_s20, 64  ;;  %p7376_p12 = scmp.lt.s32.totalorder %s66_s20, %s66_s20 }
  0x1e   :  { %p7372_p11 = scmp.ne.s32.totalorder %s66_s20, %s7371_s21  ;;  %p7377_p13 = scmp.lt.s32.totalorder %s7371_s21, %s7371_s21 }
  0x20   :  { %p7378_p0 = por %p7377_p13, %p7376_p12 }
  0x22   :  { %p7379_p1 = pnand %p7378_p0, %p7372_p11 }
  0x24   :  { %7382 = shalt.err (!%p7379_p1)
}
  0x25   :  { %68 = dma.hbm_to_vmem [thread:$0]  %s8009_s4, 64, %s66_s20, [#allocation9]  }
  0x26   :  { %s7597_s22 = smov [#allocation11]   ;;  %s7598_s24 = smov [#allocation14]  }
  0x27   :  { %s87_s23 = sshll.u32 %s7597_s22, 4  ;;  %s109_s25 = sshll.u32 %s7598_s24, 4  ;;  %s88_s23 = int_to_ptr.vmem [resolvable:$true] %s87_s23  ;;  %s110_s25 = int_to_ptr.vmem [resolvable:$true] %s109_s25 }
  0x28   :  { %s7383_s28 = scalar_lea.hbm %s8011_s6, 32 }
  0x29   :  { %p7384_p2 = scmp.ne.s32.totalorder %s8011_s6, %s7383_s28  ;;  %p7387_p3 = scmp.lt.u32.totalorder %s7383_s28, %s8011_s6 }
  0x2b   :  { %p7389_p4 = pnand %p7387_p3, %p7384_p2 }
  0x2d   :  { %7392 = shalt.err (!%p7389_p4)
}
  0x2e   :  { %s7393_s4 = scalar_lea.vmem %s88_s23, 32  ;;  %p7398_p6 = scmp.lt.s32.totalorder %s88_s23, %s88_s23 }
  0x2f   :  { %p7394_p5 = scmp.ne.s32.totalorder %s88_s23, %s7393_s4  ;;  %p7399_p7 = scmp.lt.s32.totalorder %s7393_s4, %s7393_s4 }
  0x31   :  { %p7400_p8 = por %p7399_p7, %p7398_p6 }
  0x33   :  { %p7401_p9 = pnand %p7400_p8, %p7394_p5 }
  0x35   :  { %7404 = shalt.err (!%p7401_p9)
}
  0x36   :  { %90 = dma.hbm_to_vmem [thread:$0]  %s8011_s6, 32, %s88_s23, [#allocation12]  }
  0x37   :  { %s7405_s17 = scalar_lea.hbm %s8013_s8, 16 }
  0x38   :  { %p7406_p10 = scmp.ne.s32.totalorder %s8013_s8, %s7405_s17  ;;  %p7409_p11 = scmp.lt.u32.totalorder %s7405_s17, %s8013_s8 }
  0x3a   :  { %p7411_p12 = pnand %p7409_p11, %p7406_p10 }
  0x3c   :  { %7414 = shalt.err (!%p7411_p12)
}
  0x3d   :  { %s7415_s22 = scalar_lea.vmem %s110_s25, 16  ;;  %s7419_s24 = scalar_lea.vmem %s110_s25, 32 }
  0x3e   :  { %p7416_p13 = scmp.ne.s32.totalorder %s110_s25, %s7415_s22  ;;  %p7420_p0 = scmp.lt.s32.totalorder %s110_s25, %s110_s25 }
  0x3f   :  { %p7421_p1 = scmp.lt.s32.totalorder %s7419_s24, %s7415_s22 }
  0x41   :  { %p7422_p2 = por %p7421_p1, %p7420_p0 }
  0x43   :  { %p7423_p3 = pnand %p7422_p2, %p7416_p13 }
  0x45   :  { %7426 = shalt.err (!%p7423_p3)
}
  0x46   :  { %112 = dma.hbm_to_vmem [thread:$0]  %s8013_s8, 16, %s110_s25, [#allocation15]  }
  0x47   :  { %s7599_s26 = smov [#allocation2]   ;;  %s7427_s30 = scalar_lea.hbm %s8006_s1, 49152 }
  0x48   :  { %s30_s27 = sshll.u32 %s7599_s26, 4  ;;  %p7428_p4 = scmp.ne.s32.totalorder %s8006_s1, %s7427_s30  ;;  %s31_s27 = int_to_ptr.vmem [resolvable:$true] %s30_s27 }
  0x49   :  { %p7431_p5 = scmp.lt.u32.totalorder %s7427_s30, %s8006_s1 }
  0x4b   :  { %p7433_p6 = pnand %p7431_p5, %p7428_p4 }
  0x4d   :  { %7436 = shalt.err (!%p7433_p6)
}
  0x4e   :  { %s7437_s14 = scalar_lea.vmem %s31_s27, 49152  ;;  %p7442_p8 = scmp.lt.s32.totalorder %s31_s27, %s31_s27 }
  0x4f   :  { %p7438_p7 = scmp.ne.s32.totalorder %s31_s27, %s7437_s14  ;;  %p7443_p9 = scmp.lt.s32.totalorder %s7437_s14, %s7437_s14 }
  0x51   :  { %p7444_p10 = por %p7443_p9, %p7442_p8 }
  0x53   :  { %p7445_p11 = pnand %p7444_p10, %p7438_p7 }
  0x55   :  { %7448 = shalt.err (!%p7445_p11)
}
  0x56   :  { %s7600_s8 = smov 512   ;;  %s7601_s25 = smov 32  }
  0x57   :  { %36 = dma.hbm_to_vmem [thread:$0]  %s8006_s1, 49152, %s31_s27, [#allocation3], %s7600_s8, %s7600_s8, %s7601_s25  }
  0x58   :  { %s7602_s17 = smov [#allocation7]   ;;  %s7449_s18 = scalar_lea.hbm %s8008_s3, 32768 }
  0x59   :  { %s52_s19 = sshll.u32 %s7602_s17, 4  ;;  %p7450_p12 = scmp.ne.s32.totalorder %s8008_s3, %s7449_s18  ;;  %s53_s19 = int_to_ptr.vmem [resolvable:$true] %s52_s19 }
  0x5a   :  { %p7453_p13 = scmp.lt.u32.totalorder %s7449_s18, %s8008_s3 }
  0x5c   :  { %p7455_p0 = pnand %p7453_p13, %p7450_p12 }
  0x5e   :  { %7458 = shalt.err (!%p7455_p0)
}
  0x5f   :  { %s7459_s26 = scalar_lea.vmem %s53_s19, 32768  ;;  %p7464_p2 = scmp.lt.s32.totalorder %s53_s19, %s53_s19 }
  0x60   :  { %p7460_p1 = scmp.ne.s32.totalorder %s53_s19, %s7459_s26  ;;  %p7465_p3 = scmp.lt.s32.totalorder %s7459_s26, %s7459_s26 }
  0x62   :  { %p7466_p4 = por %p7465_p3, %p7464_p2 }
  0x64   :  { %p7467_p5 = pnand %p7466_p4, %p7460_p1 }
  0x66   :  { %7470 = shalt.err (!%p7467_p5)
}
  0x67   :  { %s7603_s1 = smov 256   ;;  %s7604_s27 = smov 16  }
  0x68   :  { %58 = dma.hbm_to_vmem [thread:$0]  %s8008_s3, 32768, %s53_s19, [#allocation6], %s7603_s1, %s7603_s1, %s7604_s27  }
  0x69   :  { %s7605_s30 = smov [#allocation10]   ;;  %s7471_s20 = scalar_lea.hbm %s8010_s5, 8192 }
  0x6a   :  { %s74_s12 = sshll.u32 %s7605_s30, 4  ;;  %p7472_p6 = scmp.ne.s32.totalorder %s8010_s5, %s7471_s20  ;;  %s75_s12 = int_to_ptr.vmem [resolvable:$true] %s74_s12 }
  0x6b   :  { %p7475_p7 = scmp.lt.u32.totalorder %s7471_s20, %s8010_s5 }
  0x6d   :  { %p7477_p8 = pnand %p7475_p7, %p7472_p6 }
  0x6f   :  { %7480 = shalt.err (!%p7477_p8)
}
  0x70   :  { %s7481_s17 = scalar_lea.vmem %s75_s12, 8192  ;;  %p7486_p10 = scmp.lt.s32.totalorder %s75_s12, %s75_s12 }
  0x71   :  { %p7482_p9 = scmp.ne.s32.totalorder %s75_s12, %s7481_s17  ;;  %p7487_p11 = scmp.lt.s32.totalorder %s7481_s17, %s7481_s17 }
  0x73   :  { %p7488_p12 = por %p7487_p11, %p7486_p10 }
  0x75   :  { %p7489_p13 = pnand %p7488_p12, %p7482_p9 }
  0x77   :  { %7492 = shalt.err (!%p7489_p13)
}
  0x78   :  { %s7606_s3 = smov 128   ;;  %s7607_s19 = smov 8  }
  0x79   :  { %80 = dma.hbm_to_vmem [thread:$0]  %s8010_s5, 8192, %s75_s12, [#allocation9], %s7606_s3, %s7606_s3, %s7607_s19  }
  0x7a   :  { %s7608_s18 = smov [#allocation13]   ;;  %s7493_s23 = scalar_lea.hbm %s8012_s7, 2048 }
  0x7b   :  { %s96_s22 = sshll.u32 %s7608_s18, 4  ;;  %p7494_p0 = scmp.ne.s32.totalorder %s8012_s7, %s7493_s23  ;;  %s97_s22 = int_to_ptr.vmem [resolvable:$true] %s96_s22 }
  0x7c   :  { %p7497_p1 = scmp.lt.u32.totalorder %s7493_s23, %s8012_s7 }
  0x7e   :  { %p7499_p2 = pnand %p7497_p1, %p7494_p0 }
  0x80   :  { %7502 = shalt.err (!%p7499_p2)
}
  0x81   :  { %s7503_s29 = scalar_lea.vmem %s97_s22, 2048  ;;  %p7508_p4 = scmp.lt.s32.totalorder %s97_s22, %s97_s22 }
  0x82   :  { %p7504_p3 = scmp.ne.s32.totalorder %s97_s22, %s7503_s29  ;;  %p7509_p5 = scmp.lt.s32.totalorder %s7503_s29, %s7503_s29 }
  0x84   :  { %p7510_p6 = por %p7509_p5, %p7508_p4 }
  0x86   :  { %p7511_p7 = pnand %p7510_p6, %p7504_p3 }
  0x88   :  { %7514 = shalt.err (!%p7511_p7)
}
  0x89   :  { %s7609_s5 = smov 64   ;;  %s7610_s30 = smov 4  }
  0x8a   :  { %102 = dma.hbm_to_vmem [thread:$0]  %s8012_s7, 2048, %s97_s22, [#allocation12], %s7609_s5, %s7609_s5, %s7610_s30  }
  0x8b   :  { %s7611_s4 = smov [#allocation16]   ;;  %s7612_s14 = smov [#allocation17]  }
  0x8c   :  { %s118_s20 = sshll.u32 %s7611_s4, 4  ;;  %s131_s8 = sshll.u32 %s7612_s14, 4  ;;  %s119_s20 = int_to_ptr.vmem [resolvable:$true] %s118_s20  ;;  %s132_s8 = int_to_ptr.vmem [resolvable:$true] %s131_s8 }
  0x8d   :  { %s7515_s17 = scalar_lea.hbm %s8014_s9, 1024 }
  0x8e   :  { %p7516_p8 = scmp.ne.s32.totalorder %s8014_s9, %s7515_s17  ;;  %p7519_p9 = scmp.lt.u32.totalorder %s7515_s17, %s8014_s9 }
  0x90   :  { %p7521_p10 = pnand %p7519_p9, %p7516_p8 }
  0x92   :  { %7524 = shalt.err (!%p7521_p10)
}
  0x93   :  { %s7525_s7 = scalar_lea.vmem %s119_s20, 1024  ;;  %p7530_p12 = scmp.lt.s32.totalorder %s119_s20, %s119_s20 }
  0x94   :  { %p7526_p11 = scmp.ne.s32.totalorder %s119_s20, %s7525_s7  ;;  %p7531_p13 = scmp.lt.s32.totalorder %s7525_s7, %s7525_s7 }
  0x96   :  { %p7532_p0 = por %p7531_p13, %p7530_p12 }
  0x98   :  { %p7533_p1 = pnand %p7532_p0, %p7526_p11 }
  0x9a   :  { %7536 = shalt.err (!%p7533_p1)
}
  0x9b   :  { %124 = dma.hbm_to_vmem [thread:$0]  %s8014_s9, 1024, %s119_s20, [#allocation15], %s7609_s5, %s7609_s5, %s7610_s30  }
  0x9c   :  { %s7537_s23 = scalar_lea.hbm %s8015_s10, 16 }
  0x9d   :  { %p7538_p2 = scmp.ne.s32.totalorder %s8015_s10, %s7537_s23  ;;  %p7541_p3 = scmp.lt.u32.totalorder %s7537_s23, %s8015_s10 }
  0x9f   :  { %p7543_p4 = pnand %p7541_p3, %p7538_p2 }
  0xa1   :  { %7546 = shalt.err (!%p7543_p4)
}
  0xa2   :  { %s7547_s29 = scalar_lea.vmem %s132_s8, 16  ;;  %s7551_s12 = scalar_lea.vmem %s132_s8, 32 }
  0xa3   :  { %p7548_p5 = scmp.ne.s32.totalorder %s132_s8, %s7547_s29  ;;  %p7552_p6 = scmp.lt.s32.totalorder %s132_s8, %s132_s8 }
  0xa4   :  { %p7553_p7 = scmp.lt.s32.totalorder %s7551_s12, %s7547_s29 }
  0xa6   :  { %p7554_p8 = por %p7553_p7, %p7552_p6 }
  0xa8   :  { %p7555_p9 = pnand %p7554_p8, %p7548_p5 }
  0xaa   :  { %7558 = shalt.err (!%p7555_p9)
}
  0xab   :  { %134 = dma.hbm_to_vmem [thread:$0]  %s8015_s10, 16, %s132_s8, [#allocation18]  }
  0xac   :  { %7581 = dma.done.wait [#allocation3], 49152  }
  0xad   :  { %7582 = vsyncadd [#allocation3], 4294918144 }
  0xae   :  { %7583 = dma.done.wait [#allocation6], 32896  }
  0xaf   :  { %7584 = vsyncadd [#allocation6], 4294934400 }
  0xb0   :  { %7585 = dma.done.wait [#allocation9], 8256  }
  0xb1   :  { %7586 = vsyncadd [#allocation9], 4294959040 }
  0xb2   :  { %7587 = dma.done.wait [#allocation12], 2080  }
  0xb3   :  { %7588 = vsyncadd [#allocation12], 4294965216 }
  0xb4   :  { %7589 = dma.done.wait [#allocation15], 1040  }
  0xb5   :  { %7590 = vsyncadd [#allocation15], 4294966256 }
  0xb6   :  { %7591 = dma.done.wait [#allocation18], 16  }
  0xb7   :  { %7592 = vsyncadd [#allocation18], 4294967280  ;;  %v324_v0 = vld [vmem:[#allocation2] sm:$0xff]  ;;  %v325_v2 = vld [vmem:[#allocation2 + $0x8] sm:$0xff]  ;;  %v7613_v40 = vmov 1983009808   ;;  %v205_v42 = vlaneseq }
  0xb8   :  { %v328_v1 = vld [vmem:[#allocation2 + $0x20] sm:$0xff]  ;;  %v329_v4 = vld [vmem:[#allocation2 + $0x28] sm:$0xff]  ;;  %v203_v41 = vunpack.c.l.s4 %v7613_v40  ;;  %vm7615_vm0 = vmmov 0  }
  0xb9   :  { %v5928_v3 = vcombine.high %v324_v0, %v328_v1  ;;  %v5927_v5 = vcombine.low %v324_v0, %v328_v1  ;;  %v332_v6 = vld [vmem:[#allocation2 + $0x40] sm:$0xff]  ;;  %v5930_v8 = vcombine.high %v325_v2, %v329_v4  ;;  %v5929_v9 = vcombine.low %v325_v2, %v329_v4  ;;  %v333_v11 = vld [vmem:[#allocation2 + $0x48] sm:$0xff] }
  0xba   :  { %v336_v7 = vld [vmem:[#allocation2 + $0x60] sm:$0xff]  ;;  %v337_v12 = vld [vmem:[#allocation2 + $0x68] sm:$0xff]  ;;  %v204_v51 = vunpack.c.0.s8 %v203_v41  ;;  %v7799_v52 = vshrl.u32 %v205_v42, 7 }
  0xbb   :  { %v5936_v10 = vcombine.high %v332_v6, %v336_v7  ;;  %v340_v13 = vld [vmem:[#allocation2 + $0x80] sm:$0xff]  ;;  %2670 = vmatprep.subr.bf16.mxu0 %v5928_v3  ;;  %v5938_v14 = vcombine.high %v333_v11, %v337_v12  ;;  %v341_v16 = vld [vmem:[#allocation2 + $0x88] sm:$0xff]  ;;  %2799 = vmatprep.subr.bf16.mxu1 %v5930_v8  ;;  %v5935_v18 = vcombine.low %v332_v6, %v336_v7  ;;  %v6823_v3 = vld [vmem:[%s8005_s0 + $0x30] ss:$12 sps:$4 sm:$0xff]  }
  0xbc   :  { %v344_v15 = vld [vmem:[#allocation2 + $0xa0] sm:$0xff]  ;;  %v345_v17 = vld [vmem:[#allocation2 + $0xa8] sm:$0xff]  ;;  %2671 = vmatpush1.bf16.msra.mxu0 %v5927_v5  ;;  %2800 = vmatpush1.bf16.msra.mxu1 %v5929_v9  ;;  %v5937_v19 = vcombine.low %v333_v11, %v337_v12  ;;  %v7802_v63 = vsub.s32 %v204_v51, %v7799_v52 }
  0xbd   :  { %2672 = vmatprep.subr.bf16.mxu0 %v5936_v10  ;;  %v5944_v20 = vcombine.high %v340_v13, %v344_v15  ;;  %2801 = vmatprep.subr.bf16.mxu1 %v5938_v14  ;;  %v5946_v21 = vcombine.high %v341_v16, %v345_v17  ;;  %v348_v22 = vld [vmem:[#allocation2 + $0xc0] sm:$0xff]  ;;  %v349_v24 = vld [vmem:[#allocation2 + $0xc8] sm:$0xff]  ;;  %v5943_v26 = vcombine.low %v340_v13, %v344_v15 }
  0xbe   :  { %v352_v23 = vld [vmem:[#allocation2 + $0xe0] sm:$0xff]  ;;  %v353_v25 = vld [vmem:[#allocation2 + $0xe8] sm:$0xff]  ;;  %v5945_v27 = vcombine.low %v341_v16, %v345_v17  ;;  %v7823_v12 = vrot.slane %v6823_v3, %v7802_v63 }
  0xbf   :  { %v5952_v28 = vcombine.high %v348_v22, %v352_v23  ;;  %v5954_v29 = vcombine.high %v349_v24, %v353_v25  ;;  %v356_v30 = vld [vmem:[#allocation2 + $0x100] sm:$0xff]  ;;  %v357_v32 = vld [vmem:[#allocation2 + $0x108] sm:$0xff]  ;;  %v5951_v34 = vcombine.low %v348_v22, %v352_v23  ;;  %v5953_v35 = vcombine.low %v349_v24, %v353_v25 }
  0xc0   :  { %2673 = vmatpush1.bf16.msra.mxu0 %v5935_v18  ;;  %2802 = vmatpush1.bf16.msra.mxu1 %v5937_v19  ;;  %v360_v31 = vld [vmem:[#allocation2 + $0x120] sm:$0xff]  ;;  %v361_v33 = vld [vmem:[#allocation2 + $0x128] sm:$0xff] }
  0xc1   :  { %2674 = vmatprep.subr.bf16.mxu0 %v5944_v20  ;;  %2803 = vmatprep.subr.bf16.mxu1 %v5946_v21  ;;  %v5960_v36 = vcombine.high %v356_v30, %v360_v31  ;;  %v5962_v37 = vcombine.high %v357_v32, %v361_v33  ;;  %v364_v38 = vld [vmem:[#allocation2 + $0x140] sm:$0xff]  ;;  %v365_v43 = vld [vmem:[#allocation2 + $0x148] sm:$0xff]  ;;  %v5959_v45 = vcombine.low %v356_v30, %v360_v31 }
  0xc2   :  { %v368_v39 = vld [vmem:[#allocation2 + $0x160] sm:$0xff]  ;;  %v369_v44 = vld [vmem:[#allocation2 + $0x168] sm:$0xff]  ;;  %v5961_v46 = vcombine.low %v357_v32, %v361_v33 }
  0xc3   :  { %v5968_v47 = vcombine.high %v364_v38, %v368_v39  ;;  %v5970_v48 = vcombine.high %v365_v43, %v369_v44  ;;  %v372_v49 = vld [vmem:[#allocation2 + $0x180] sm:$0xff]  ;;  %v373_v53 = vld [vmem:[#allocation2 + $0x188] sm:$0xff]  ;;  %v5967_v55 = vcombine.low %v364_v38, %v368_v39  ;;  %v5969_v58 = vcombine.low %v365_v43, %v369_v44 }
  0xc4   :  { %2675 = vmatpush1.bf16.msra.mxu0 %v5943_v26  ;;  %2804 = vmatpush1.bf16.msra.mxu1 %v5945_v27  ;;  %v376_v50 = vld [vmem:[#allocation2 + $0x1a0] sm:$0xff]  ;;  %v377_v54 = vld [vmem:[#allocation2 + $0x1a8] sm:$0xff] }
  0xc5   :  { %2676 = vmatprep.subr.bf16.mxu0 %v5952_v28  ;;  %2805 = vmatprep.subr.bf16.mxu1 %v5954_v29  ;;  %v380_v56 = vld [vmem:[#allocation2 + $0x1c0] sm:$0xff]  ;;  %v5976_v59 = vcombine.high %v372_v49, %v376_v50  ;;  %v381_v60 = vld [vmem:[#allocation2 + $0x1c8] sm:$0xff]  ;;  %v5978_v62 = vcombine.high %v373_v53, %v377_v54  ;;  %v5975_v0 = vcombine.low %v372_v49, %v376_v50 }
  0xc6   :  { %v384_v57 = vld [vmem:[#allocation2 + $0x1e0] sm:$0xff]  ;;  %v385_v61 = vld [vmem:[#allocation2 + $0x1e8] sm:$0xff]  ;;  %v5977_v4 = vcombine.low %v373_v53, %v377_v54 }
  0xc7   :  { %v6819_v1 = vld [vmem:[%s8005_s0] ss:$12 sps:$4 sm:$0xff]   ;;  %v6821_v2 = vld [vmem:[%s8005_s0 + $0x18] ss:$12 sps:$4 sm:$0xff]   ;;  %v5984_v5 = vcombine.high %v380_v56, %v384_v57  ;;  %v6825_v6 = vld [vmem:[%s8005_s0 + $0x48] ss:$12 sps:$4 sm:$0xff]   ;;  %v5986_v7 = vcombine.high %v381_v60, %v385_v61  ;;  %v5983_v16 = vcombine.low %v380_v56, %v384_v57  ;;  %v5985_v18 = vcombine.low %v381_v60, %v385_v61 }
  0xc8   :  { %2677 = vmatpush1.bf16.msra.mxu0 %v5951_v34  ;;  %2806 = vmatpush1.bf16.msra.mxu1 %v5953_v35  ;;  %v388_v8 = vld [vmem:[#allocation2 + $0x200] sm:$0xff]  ;;  %v7817_v10 = vrot.slane %v6819_v1, %v7802_v63  ;;  %v7820_v11 = vrot.slane %v6821_v2, %v7802_v63  ;;  %v389_v13 = vld [vmem:[#allocation2 + $0x208] sm:$0xff]  ;;  %v7826_v15 = vrot.slane %v6825_v6, %v7802_v63 }
  0xc9   :  { %2678 = vmatprep.subr.bf16.mxu0 %v5960_v36  ;;  %2807 = vmatprep.subr.bf16.mxu1 %v5962_v37  ;;  %v392_v9 = vld [vmem:[#allocation2 + $0x220] sm:$0xff]  ;;  %v393_v14 = vld [vmem:[#allocation2 + $0x228] sm:$0xff] }
  0xca   :  { %v231_v17 = vcombine.high %v7817_v10, %v7820_v11  ;;  %v5992_v19 = vcombine.high %v388_v8, %v392_v9  ;;  %v285_v20 = vcombine.high %v7823_v12, %v7826_v15  ;;  %v5994_v21 = vcombine.high %v389_v13, %v393_v14  ;;  %v396_v22 = vld [vmem:[#allocation2 + $0x240] sm:$0xff]  ;;  %v397_v24 = vld [vmem:[#allocation2 + $0x248] sm:$0xff] }
  0xcb   :  { %v400_v23 = vld [vmem:[#allocation2 + $0x260] sm:$0xff]  ;;  %v401_v25 = vld [vmem:[#allocation2 + $0x268] sm:$0xff]  ;;  %v5991_v27 = vcombine.low %v388_v8, %v392_v9  ;;  %v5993_v28 = vcombine.low %v389_v13, %v393_v14 }
  0xcc   :  { %2679 = vmatpush1.bf16.msra.mxu0 %v5959_v45  ;;  %2808 = vmatpush1.bf16.msra.mxu1 %v5961_v46  ;;  %v7832_v26 = vpack.c.bf16 %v285_v20, %v231_v17  ;;  %v6000_v29 = vcombine.high %v396_v22, %v400_v23  ;;  %v6002_v30 = vcombine.high %v397_v24, %v401_v25  ;;  %v404_v31 = vld [vmem:[#allocation2 + $0x280] sm:$0xff]  ;;  %v405_v33 = vld [vmem:[#allocation2 + $0x288] sm:$0xff] }
  0xcd   :  { %2680 = vmatprep.subr.bf16.mxu0 %v5968_v47  ;;  %2809 = vmatprep.subr.bf16.mxu1 %v5970_v48  ;;  %v408_v32 = vld [vmem:[#allocation2 + $0x2a0] sm:$0xff]  ;;  %v409_v34 = vld [vmem:[#allocation2 + $0x2a8] sm:$0xff]  ;;  %v5999_v35 = vcombine.low %v396_v22, %v400_v23  ;;  %v6001_v36 = vcombine.low %v397_v24, %v401_v25 }
  0xce   :  { %2702 = vmatprep.mubr.bf16.mxu0 %v7832_v26  ;;  %2831 = vmatprep.mubr.bf16.mxu1 %v7832_v26  ;;  %v6008_v37 = vcombine.high %v404_v31, %v408_v32  ;;  %v6010_v38 = vcombine.high %v405_v33, %v409_v34  ;;  %v412_v39 = vld [vmem:[#allocation2 + $0x2c0] sm:$0xff]  ;;  %v413_v41 = vld [vmem:[#allocation2 + $0x2c8] sm:$0xff]  ;;  %v6007_v43 = vcombine.low %v404_v31, %v408_v32 }
  0xcf   :  { %v416_v40 = vld [vmem:[#allocation2 + $0x2e0] sm:$0xff]  ;;  %v417_v42 = vld [vmem:[#allocation2 + $0x2e8] sm:$0xff]  ;;  %v6009_v44 = vcombine.low %v405_v33, %v409_v34  ;;  %v230_v34 = vcombine.low %v7817_v10, %v7820_v11 }
  0xd0   :  { %2681 = vmatpush1.bf16.msra.mxu0 %v5967_v55  ;;  %2810 = vmatpush1.bf16.msra.mxu1 %v5969_v58  ;;  %v6016_v45 = vcombine.high %v412_v39, %v416_v40  ;;  %v6018_v46 = vcombine.high %v413_v41, %v417_v42  ;;  %v420_v47 = vld [vmem:[#allocation2 + $0x300] sm:$0xff]  ;;  %v421_v49 = vld [vmem:[#allocation2 + $0x308] sm:$0xff]  ;;  %v6015_v51 = vcombine.low %v412_v39, %v416_v40 }
  0xd1   :  { %2682 = vmatprep.subr.bf16.mxu0 %v5976_v59  ;;  %2811 = vmatprep.subr.bf16.mxu1 %v5978_v62  ;;  %v424_v48 = vld [vmem:[#allocation2 + $0x320] sm:$0xff]  ;;  %v425_v50 = vld [vmem:[#allocation2 + $0x328] sm:$0xff]  ;;  %v6017_v53 = vcombine.low %v413_v41, %v417_v42 }
  0xd2   :  { %v6024_v54 = vcombine.high %v420_v47, %v424_v48  ;;  %v6026_v55 = vcombine.high %v421_v49, %v425_v50  ;;  %v428_v56 = vld [vmem:[#allocation2 + $0x340] sm:$0xff]  ;;  %v429_v58 = vld [vmem:[#allocation2 + $0x348] sm:$0xff]  ;;  %v6023_v60 = vcombine.low %v420_v47, %v424_v48  ;;  %v6025_v61 = vcombine.low %v421_v49, %v425_v50 }
  0xd3   :  { %v432_v57 = vld [vmem:[#allocation2 + $0x360] sm:$0xff]  ;;  %v433_v59 = vld [vmem:[#allocation2 + $0x368] sm:$0xff] }
  0xd4   :  { %2683 = vmatpush1.bf16.msra.mxu0 %v5975_v0  ;;  %2812 = vmatpush1.bf16.msra.mxu1 %v5977_v4  ;;  %v6032_v62 = vcombine.high %v428_v56, %v432_v57  ;;  %v6034_v0 = vcombine.high %v429_v58, %v433_v59  ;;  %v436_v1 = vld [vmem:[#allocation2 + $0x380] sm:$0xff]  ;;  %v437_v3 = vld [vmem:[#allocation2 + $0x388] sm:$0xff]  ;;  %v6033_v8 = vcombine.low %v429_v58, %v433_v59 }
  0xd5   :  { %2684 = vmatprep.subr.bf16.mxu0 %v5984_v5  ;;  %2813 = vmatprep.subr.bf16.mxu1 %v5986_v7  ;;  %v440_v2 = vld [vmem:[#allocation2 + $0x3a0] sm:$0xff]  ;;  %v441_v4 = vld [vmem:[#allocation2 + $0x3a8] sm:$0xff]  ;;  %v6031_v5 = vcombine.low %v428_v56, %v432_v57 }
  0xd6   :  { %v444_v6 = vld [vmem:[#allocation2 + $0x3c0] sm:$0xff]  ;;  %v6040_v9 = vcombine.high %v436_v1, %v440_v2  ;;  %v445_v13 = vld [vmem:[#allocation2 + $0x3c8] sm:$0xff]  ;;  %v6042_v17 = vcombine.high %v437_v3, %v441_v4  ;;  %v6041_v22 = vcombine.low %v437_v3, %v441_v4 }
  0xd7   :  { %v448_v7 = vld [vmem:[#allocation2 + $0x3e0] sm:$0xff]  ;;  %v449_v14 = vld [vmem:[#allocation2 + $0x3e8] sm:$0xff] }
  0xd8   :  { %2685 = vmatpush1.bf16.msra.mxu0 %v5983_v16  ;;  %2814 = vmatpush1.bf16.msra.mxu1 %v5985_v18  ;;  %v6827_v16 = vld [vmem:[%s8005_s0 + $0x4] ss:$12 sps:$4 sm:$0xff]   ;;  %v6828_v18 = vld [vmem:[%s8005_s0 + $0x1c] ss:$12 sps:$4 sm:$0xff]   ;;  %v6830_v20 = vld [vmem:[%s8005_s0 + $0x4c] ss:$12 sps:$4 sm:$0xff]   ;;  %v6048_v23 = vcombine.high %v444_v6, %v448_v7  ;;  %v6050_v24 = vcombine.high %v445_v13, %v449_v14 }
  0xd9   :  { %2686 = vmatprep.subr.bf16.mxu0 %v5992_v19  ;;  %2815 = vmatprep.subr.bf16.mxu1 %v5994_v21  ;;  %v6829_v19 = vld [vmem:[%s8005_s0 + $0x34] ss:$12 sps:$4 sm:$0xff]   ;;  %v6039_v21 = vcombine.low %v436_v1, %v440_v2  ;;  %v7858_v31 = vrot.slane %v6830_v20, %v7802_v63  ;;  %v453_v32 = vld [vmem:[#allocation2 + $0x408] sm:$0xff] }
  0xda   :  { %v452_v25 = vld [vmem:[#allocation2 + $0x400] sm:$0xff]  ;;  %v457_v33 = vld [vmem:[#allocation2 + $0x428] sm:$0xff] }
  0xdb   :  { %v6058_v39 = vcombine.high %v453_v32, %v457_v33  ;;  %v460_v40 = vld [vmem:[#allocation2 + $0x440] sm:$0xff]  ;;  %v461_v11 = vld [vmem:[#allocation2 + $0x448] sm:$0xff] }
  0xdc   :  { %2687 = vmatpush1.bf16.msra.mxu0 %v5991_v27  ;;  %2816 = vmatpush1.bf16.msra.mxu1 %v5993_v28  ;;  %v456_v27 = vld [vmem:[#allocation2 + $0x420] sm:$0xff]  ;;  %v7849_v28 = vrot.slane %v6827_v16, %v7802_v63  ;;  %v469_v50 = vld [vmem:[#allocation2 + $0x488] sm:$0xff] }
  0xdd   :  { %2688 = vmatprep.subr.bf16.mxu0 %v6000_v29  ;;  %2817 = vmatprep.subr.bf16.mxu1 %v6002_v30  ;;  %v7852_v29 = vrot.slane %v6828_v18, %v7802_v63  ;;  %v7855_v30 = vrot.slane %v6829_v19, %v7802_v63  ;;  %v464_v41 = vld [vmem:[#allocation2 + $0x460] sm:$0xff]  ;;  %v477_v58 = vld [vmem:[#allocation2 + $0x4c8] sm:$0xff] }
  0xde   :  { %v468_v47 = vld [vmem:[#allocation2 + $0x480] sm:$0xff]  ;;  %v481_v59 = vld [vmem:[#allocation2 + $0x4e8] sm:$0xff] }
  0xdf   :  { %v233_v42 = vcombine.high %v7849_v28, %v7852_v29  ;;  %v472_v48 = vld [vmem:[#allocation2 + $0x4a0] sm:$0xff]  ;;  %v6082_v1 = vcombine.high %v477_v58, %v481_v59  ;;  %v485_v4 = vld [vmem:[#allocation2 + $0x508] sm:$0xff] }
  0xe0   :  { %2689 = vmatpush1.bf16.msra.mxu0 %v5999_v35  ;;  %2818 = vmatpush1.bf16.msra.mxu1 %v6001_v36  ;;  %v284_v35 = vcombine.low %v7823_v12, %v7826_v15  ;;  %v6047_v36 = vcombine.low %v444_v6, %v448_v7  ;;  %v465_v12 = vld [vmem:[#allocation2 + $0x468] sm:$0xff]  ;;  %v6055_v15 = vcombine.low %v452_v25, %v456_v27  ;;  %v484_v2 = vld [vmem:[#allocation2 + $0x500] sm:$0xff] }
  0xe1   :  { %2690 = vmatprep.subr.bf16.mxu0 %v6008_v37  ;;  %2819 = vmatprep.subr.bf16.mxu1 %v6010_v38  ;;  %v6049_v37 = vcombine.low %v445_v13, %v449_v14  ;;  %v6056_v38 = vcombine.high %v452_v25, %v456_v27  ;;  %v6065_v56 = vcombine.low %v461_v11, %v465_v12  ;;  %v488_v3 = vld [vmem:[#allocation2 + $0x520] sm:$0xff]  ;;  %v493_v16 = vld [vmem:[#allocation2 + $0x548] sm:$0xff] }
  0xe2   :  { %v7868_v10 = vpack.c.bf16 %v284_v35, %v230_v34  ;;  %v6072_v57 = vcombine.high %v468_v47, %v472_v48  ;;  %v6081_v7 = vcombine.low %v477_v58, %v481_v59  ;;  %v496_v13 = vld [vmem:[#allocation2 + $0x560] sm:$0xff]  ;;  %v6087_v18 = vcombine.low %v484_v2, %v488_v3  ;;  %v505_v25 = vld [vmem:[#allocation2 + $0x5a8] sm:$0xff] }
  0xe3   :  { %v508_v34 = vld [vmem:[#allocation2 + $0x5c0] sm:$0xff]  ;;  %v533_v59 = vld [vmem:[#allocation2 + $0x688] sm:$0xff] }
  0xe4   :  { %2691 = vmatpush1.bf16.msra.mxu0 %v6007_v43  ;;  %2820 = vmatpush1.bf16.msra.mxu1 %v6009_v44  ;;  %v287_v43 = vcombine.high %v7855_v30, %v7858_v31  ;;  %v6057_v44 = vcombine.low %v453_v32, %v457_v33  ;;  %v512_v35 = vld [vmem:[#allocation2 + $0x5e0] sm:$0xff] }
  0xe5   :  { %2692 = vmatprep.subr.bf16.mxu0 %v6016_v45  ;;  %2821 = vmatprep.subr.bf16.mxu1 %v6018_v46  ;;  %v6064_v45 = vcombine.high %v460_v40, %v464_v41  ;;  %v6066_v46 = vcombine.high %v461_v11, %v465_v12  ;;  %v517_v11 = vld [vmem:[#allocation2 + $0x608] sm:$0xff]  ;;  %v536_v58 = vld [vmem:[#allocation2 + $0x6a0] sm:$0xff] }
  0xe6   :  { %v7870_v49 = vpack.c.bf16 %v287_v43, %v233_v42  ;;  %v516_v42 = vld [vmem:[#allocation2 + $0x600] sm:$0xff] }
  0xe7   :  { %v520_v43 = vld [vmem:[#allocation2 + $0x620] sm:$0xff] }
  0xe8   :  { %2693 = vmatpush1.bf16.msra.mxu0 %v6015_v51  ;;  %2822 = vmatpush1.bf16.msra.mxu1 %v6017_v53  ;;  %v473_v51 = vld [vmem:[#allocation2 + $0x4a8] sm:$0xff]  ;;  %v6063_v53 = vcombine.low %v460_v40, %v464_v41  ;;  %v6112_v41 = vcombine.high %v508_v34, %v512_v35 }
  0xe9   :  { %2694 = vmatprep.subr.bf16.mxu0 %v6024_v54  ;;  %2823 = vmatprep.subr.bf16.mxu1 %v6026_v55  ;;  %v476_v54 = vld [vmem:[#allocation2 + $0x4c0] sm:$0xff] }
  0xea   :  { %v480_v55 = vld [vmem:[#allocation2 + $0x4e0] sm:$0xff] }
  0xeb   :  { %v6079_v6 = vcombine.low %v476_v54, %v480_v55 }
  0xec   :  { %2695 = vmatpush1.bf16.msra.mxu0 %v6023_v60  ;;  %2824 = vmatpush1.bf16.msra.mxu1 %v6025_v61  ;;  %v6074_v60 = vcombine.high %v469_v50, %v473_v51  ;;  %v6071_v61 = vcombine.low %v468_v47, %v472_v48  ;;  %v524_v47 = vld [vmem:[#allocation2 + $0x640] sm:$0xff] }
  0xed   :  { %2696 = vmatprep.subr.bf16.mxu0 %v6032_v62  ;;  %2825 = vmatprep.subr.bf16.mxu1 %v6034_v0  ;;  %v6073_v62 = vcombine.low %v469_v50, %v473_v51  ;;  %v6080_v0 = vcombine.high %v476_v54, %v480_v55  ;;  %v528_v48 = vld [vmem:[#allocation2 + $0x660] sm:$0xff]  ;;  %v525_v50 = vld [vmem:[#allocation2 + $0x648] sm:$0xff]  ;;  %v6119_v54 = vcombine.low %v516_v42, %v520_v43 }
  0xf0   :  { %2697 = vmatpush1.bf16.msra.mxu0 %v6031_v5  ;;  %2826 = vmatpush1.bf16.msra.mxu1 %v6033_v8  ;;  %v489_v5 = vld [vmem:[#allocation2 + $0x528] sm:$0xff]  ;;  %v6088_v8 = vcombine.high %v484_v2, %v488_v3  ;;  %v540_v2 = vld [vmem:[#allocation2 + $0x6c0] sm:$0xff] }
  0xf1   :  { %2698 = vmatprep.subr.bf16.mxu0 %v6040_v9  ;;  %2827 = vmatprep.subr.bf16.mxu1 %v6042_v17  ;;  %v492_v9 = vld [vmem:[#allocation2 + $0x540] sm:$0xff]  ;;  %v6090_v14 = vcombine.high %v485_v4, %v489_v5  ;;  %v497_v17 = vld [vmem:[#allocation2 + $0x568] sm:$0xff]  ;;  %v6089_v19 = vcombine.low %v485_v4, %v489_v5 }
  0xf2   :  { %v6096_v20 = vcombine.high %v492_v9, %v496_v13  ;;  %v6095_v27 = vcombine.low %v492_v9, %v496_v13  ;;  %v6097_v32 = vcombine.low %v493_v16, %v497_v17  ;;  %v544_v3 = vld [vmem:[#allocation2 + $0x6e0] sm:$0xff]  ;;  %v541_v4 = vld [vmem:[#allocation2 + $0x6c8] sm:$0xff] }
  0xf3   :  { %v6144_v9 = vcombine.high %v540_v2, %v544_v3  ;;  %v548_v13 = vld [vmem:[#allocation2 + $0x700] sm:$0xff] }
  0xf4   :  { %2699 = vmatpush1.bf16.msra.mxu0 %v6039_v21  ;;  %2828 = vmatpush1.bf16.msra.mxu1 %v6041_v22  ;;  %v500_v21 = vld [vmem:[#allocation2 + $0x580] sm:$0xff] }
  0xf5   :  { %2700 = vmatprep.subr.bf16.mxu0 %v6048_v23  ;;  %2829 = vmatprep.subr.bf16.mxu1 %v6050_v24  ;;  %v504_v22 = vld [vmem:[#allocation2 + $0x5a0] sm:$0xff]  ;;  %v501_v23 = vld [vmem:[#allocation2 + $0x588] sm:$0xff]  ;;  %v6098_v24 = vcombine.high %v493_v16, %v497_v17 }
  0xf6   :  { %v6104_v33 = vcombine.high %v500_v21, %v504_v22  ;;  %v6105_v40 = vcombine.low %v501_v23, %v505_v25  ;;  %v549_v16 = vld [vmem:[#allocation2 + $0x708] sm:$0xff] }
  0xf8   :  { %2701 = vmatpush1.bf16.msra.mxu0 %v6047_v36  ;;  %2830 = vmatpush1.bf16.msra.mxu1 %v6049_v37  ;;  %v509_v36 = vld [vmem:[#allocation2 + $0x5c8] sm:$0xff]  ;;  %v6106_v37 = vcombine.high %v501_v23, %v505_v25  ;;  %v560_v23 = vld [vmem:[#allocation2 + $0x760] sm:$0xff] }
  0xf9   :  { %2713 = vmatprep.subr.bf16.mxu0 %v6056_v38  ;;  %2842 = vmatprep.subr.bf16.mxu1 %v6058_v39  ;;  %v513_v38 = vld [vmem:[#allocation2 + $0x5e8] sm:$0xff]  ;;  %v6103_v39 = vcombine.low %v500_v21, %v504_v22  ;;  %v556_v22 = vld [vmem:[#allocation2 + $0x740] sm:$0xff] }
  0xfa   :  { %v6114_v12 = vcombine.high %v509_v36, %v513_v38 }
  0xfb   :  { %2703 = vmatmul.mubr.bf16.vlgmr.msra.gmra.mrb[0].mxu0 %v7868_v10  ;;  %2832 = vmatmul.mubr.bf16.vlgmr.msra.gmra.mrb[0].mxu1 %v7868_v10 }
  0xfc   :  { %2714 = vmatpush1.bf16.msra.mxu0 %v6055_v15  ;;  %2843 = vmatpush1.bf16.msra.mxu1 %v6057_v44  ;;  %v521_v15 = vld [vmem:[#allocation2 + $0x628] sm:$0xff]  ;;  %v6111_v44 = vcombine.low %v508_v34, %v512_v35  ;;  %v6160_v34 = vcombine.high %v556_v22, %v560_v23  ;;  %v564_v35 = vld [vmem:[#allocation2 + $0x780] sm:$0xff] }
  0xfd   :  { %2715 = vmatprep.subr.bf16.mxu0 %v6064_v45  ;;  %2844 = vmatprep.subr.bf16.mxu1 %v6066_v46  ;;  %v6113_v45 = vcombine.low %v509_v36, %v513_v38  ;;  %v6120_v46 = vcombine.high %v516_v42, %v520_v43  ;;  %v6122_v51 = vcombine.high %v517_v11, %v521_v15  ;;  %v568_v36 = vld [vmem:[#allocation2 + $0x7a0] sm:$0xff]  ;;  %v573_v43 = vld [vmem:[#allocation2 + $0x7c8] sm:$0xff] }
  0xfe   :  { %2745 = vmatprep.mubr.bf16.mxu0 %v7870_v49  ;;  %2874 = vmatprep.mubr.bf16.mxu1 %v7870_v49  ;;  %v6121_v55 = vcombine.low %v517_v11, %v521_v15  ;;  %v576_v42 = vld [vmem:[#allocation2 + $0x7e0] sm:$0xff]  ;;  %v577_v11 = vld [vmem:[#allocation2 + $0x7e8] sm:$0xff]  ;;  %v6168_v15 = vcombine.high %v564_v35, %v568_v36 }
 0x100   :  { %2716 = vmatpush1.bf16.msra.mxu0 %v6063_v53  ;;  %2845 = vmatpush1.bf16.msra.mxu1 %v6065_v56  ;;  %v529_v53 = vld [vmem:[#allocation2 + $0x668] sm:$0xff]  ;;  %v6128_v56 = vcombine.high %v524_v47, %v528_v48 }
 0x101   :  { %2717 = vmatprep.subr.bf16.mxu0 %v6072_v57  ;;  %2846 = vmatprep.subr.bf16.mxu1 %v6074_v60  ;;  %v532_v57 = vld [vmem:[#allocation2 + $0x680] sm:$0xff]  ;;  %v6130_v60 = vcombine.high %v525_v50, %v529_v53 }
 0x104   :  { %2718 = vmatpush1.bf16.msra.mxu0 %v6071_v61  ;;  %2847 = vmatpush1.bf16.msra.mxu1 %v6073_v62  ;;  %v537_v61 = vld [vmem:[#allocation2 + $0x6a8] sm:$0xff]  ;;  %v6127_v62 = vcombine.low %v524_v47, %v528_v48  ;;  %v6834_v48 = vld [vmem:[%s8005_s0 + $0x50] ss:$12 sps:$4 sm:$0xff]  }
 0x105   :  { %2719 = vmatprep.subr.bf16.mxu0 %v6080_v0  ;;  %2848 = vmatprep.subr.bf16.mxu1 %v6082_v1  ;;  %v6129_v0 = vcombine.low %v525_v50, %v529_v53  ;;  %v6136_v1 = vcombine.high %v532_v57, %v536_v58  ;;  %v6138_v5 = vcombine.high %v533_v59, %v537_v61 }
 0x106   :  { %v6167_v50 = vcombine.low %v564_v35, %v568_v36 }
 0x108   :  { %2720 = vmatpush1.bf16.msra.mxu0 %v6079_v6  ;;  %2849 = vmatpush1.bf16.msra.mxu1 %v6081_v7  ;;  %v545_v6 = vld [vmem:[#allocation2 + $0x6e8] sm:$0xff]  ;;  %v6135_v7 = vcombine.low %v532_v57, %v536_v58 }
 0x109   :  { %2721 = vmatprep.subr.bf16.mxu0 %v6088_v8  ;;  %2850 = vmatprep.subr.bf16.mxu1 %v6090_v14  ;;  %v6137_v8 = vcombine.low %v533_v59, %v537_v61  ;;  %v552_v14 = vld [vmem:[#allocation2 + $0x720] sm:$0xff]  ;;  %v6146_v17 = vcombine.high %v541_v4, %v545_v6  ;;  %v581_v57 = vld [vmem:[#allocation2 + $0x808] sm:$0xff] }
 0x10a   :  { %v6152_v21 = vcombine.high %v548_v13, %v552_v14  ;;  %v585_v58 = vld [vmem:[#allocation2 + $0x828] sm:$0xff] }
 0x10c   :  { %2722 = vmatpush1.bf16.msra.mxu0 %v6087_v18  ;;  %2851 = vmatpush1.bf16.msra.mxu1 %v6089_v19  ;;  %v553_v18 = vld [vmem:[#allocation2 + $0x728] sm:$0xff]  ;;  %v6143_v19 = vcombine.low %v540_v2, %v544_v3  ;;  %v6177_v3 = vcombine.low %v573_v43, %v577_v11 }
 0x10d   :  { %2723 = vmatprep.subr.bf16.mxu0 %v6096_v20  ;;  %2852 = vmatprep.subr.bf16.mxu1 %v6098_v24  ;;  %v6145_v20 = vcombine.low %v541_v4, %v545_v6  ;;  %v557_v24 = vld [vmem:[#allocation2 + $0x748] sm:$0xff]  ;;  %v6154_v25 = vcombine.high %v549_v16, %v553_v18  ;;  %v592_v6 = vld [vmem:[#allocation2 + $0x860] sm:$0xff] }
 0x110   :  { %2724 = vmatpush1.bf16.msra.mxu0 %v6095_v27  ;;  %2853 = vmatpush1.bf16.msra.mxu1 %v6097_v32  ;;  %v561_v27 = vld [vmem:[#allocation2 + $0x768] sm:$0xff]  ;;  %v6151_v32 = vcombine.low %v548_v13, %v552_v14  ;;  %v596_v14 = vld [vmem:[#allocation2 + $0x880] sm:$0xff] }
 0x111   :  { %2725 = vmatprep.subr.bf16.mxu0 %v6104_v33  ;;  %2854 = vmatprep.subr.bf16.mxu1 %v6106_v37  ;;  %v6153_v33 = vcombine.low %v549_v16, %v553_v18  ;;  %v565_v37 = vld [vmem:[#allocation2 + $0x788] sm:$0xff]  ;;  %v6162_v38 = vcombine.high %v557_v24, %v561_v27  ;;  %v600_v16 = vld [vmem:[#allocation2 + $0x8a0] sm:$0xff] }
 0x114   :  { %2726 = vmatpush1.bf16.msra.mxu0 %v6103_v39  ;;  %2855 = vmatpush1.bf16.msra.mxu1 %v6105_v40  ;;  %v569_v39 = vld [vmem:[#allocation2 + $0x7a8] sm:$0xff]  ;;  %v6159_v40 = vcombine.low %v556_v22, %v560_v23  ;;  %v6200_v23 = vcombine.high %v596_v14, %v600_v16 }
 0x115   :  { %2727 = vmatprep.subr.bf16.mxu0 %v6112_v41  ;;  %2856 = vmatprep.subr.bf16.mxu1 %v6114_v12  ;;  %v572_v41 = vld [vmem:[#allocation2 + $0x7c0] sm:$0xff]  ;;  %v6161_v12 = vcombine.low %v557_v24, %v561_v27  ;;  %v6170_v47 = vcombine.high %v565_v37, %v569_v39  ;;  %v605_v27 = vld [vmem:[#allocation2 + $0x8c8] sm:$0xff] }
 0x116   :  { %v6176_v53 = vcombine.high %v572_v41, %v576_v42  ;;  %v6175_v2 = vcombine.low %v572_v41, %v576_v42  ;;  %v604_v24 = vld [vmem:[#allocation2 + $0x8c0] sm:$0xff]  ;;  %v617_v41 = vld [vmem:[#allocation2 + $0x928] sm:$0xff] }
 0x118   :  { %2728 = vmatpush1.bf16.msra.mxu0 %v6111_v44  ;;  %2857 = vmatpush1.bf16.msra.mxu1 %v6113_v45  ;;  %v6831_v44 = vld [vmem:[%s8005_s0 + $0x8] ss:$12 sps:$4 sm:$0xff]   ;;  %v6832_v45 = vld [vmem:[%s8005_s0 + $0x20] ss:$12 sps:$4 sm:$0xff]  }
 0x119   :  { %2729 = vmatprep.subr.bf16.mxu0 %v6120_v46  ;;  %2858 = vmatprep.subr.bf16.mxu1 %v6122_v51  ;;  %v6833_v46 = vld [vmem:[%s8005_s0 + $0x38] ss:$12 sps:$4 sm:$0xff]   ;;  %v6169_v51 = vcombine.low %v565_v37, %v569_v39  ;;  %v7889_v59 = vrot.slane %v6831_v44, %v7802_v63  ;;  %v613_v39 = vld [vmem:[#allocation2 + $0x908] sm:$0xff] }
 0x11a   :  { %v7895_v61 = vrot.slane %v6833_v46, %v7802_v63  ;;  %v612_v37 = vld [vmem:[#allocation2 + $0x900] sm:$0xff]  ;;  %v621_v44 = vld [vmem:[#allocation2 + $0x948] sm:$0xff] }
 0x11b   :  { %v625_v46 = vld [vmem:[#allocation2 + $0x968] sm:$0xff] }
 0x11c   :  { %2730 = vmatpush1.bf16.msra.mxu0 %v6119_v54  ;;  %2859 = vmatpush1.bf16.msra.mxu1 %v6121_v55  ;;  %v6178_v54 = vcombine.high %v573_v43, %v577_v11  ;;  %v580_v55 = vld [vmem:[#allocation2 + $0x800] sm:$0xff] }
 0x11d   :  { %2731 = vmatprep.subr.bf16.mxu0 %v6128_v56  ;;  %2860 = vmatprep.subr.bf16.mxu1 %v6130_v60  ;;  %v584_v56 = vld [vmem:[#allocation2 + $0x820] sm:$0xff]  ;;  %v7892_v60 = vrot.slane %v6832_v45, %v7802_v63  ;;  %v6218_v45 = vcombine.high %v613_v39, %v617_v41 }
 0x11e   :  { %v6184_v4 = vcombine.high %v580_v55, %v584_v56 }
 0x120   :  { %2732 = vmatpush1.bf16.msra.mxu0 %v6127_v62  ;;  %2861 = vmatpush1.bf16.msra.mxu1 %v6129_v0  ;;  %v7898_v62 = vrot.slane %v6834_v48, %v7802_v63  ;;  %v232_v0 = vcombine.low %v7849_v28, %v7852_v29  ;;  %v251_v63 = vcombine.high %v7889_v59, %v7892_v60 }
 0x121   :  { %2733 = vmatprep.subr.bf16.mxu0 %v6136_v1  ;;  %2862 = vmatprep.subr.bf16.mxu1 %v6138_v5  ;;  %v286_v1 = vcombine.low %v7855_v30, %v7858_v31  ;;  %v588_v5 = vld [vmem:[#allocation2 + $0x840] sm:$0xff]  ;;  %v6183_v30 = vcombine.low %v580_v55, %v584_v56  ;;  %v6185_v31 = vcombine.low %v581_v57, %v585_v58  ;;  %v633_v56 = vld [vmem:[#allocation2 + $0x9a8] sm:$0xff] }
 0x122   :  { %v305_v28 = vcombine.high %v7895_v61, %v7898_v62  ;;  %v6192_v13 = vcombine.high %v588_v5, %v592_v6  ;;  %v6217_v48 = vcombine.low %v613_v39, %v617_v41  ;;  %v6226_v55 = vcombine.high %v621_v44, %v625_v46  ;;  %v668_v39 = vld [vmem:[#allocation2 + $0xac0] sm:$0xff]  ;;  %v669_v41 = vld [vmem:[#allocation2 + $0xac8] sm:$0xff] }
 0x123   :  { %v7908_v29 = vpack.c.bf16 %v286_v1, %v232_v0  ;;  %v636_v1 = vld [vmem:[#allocation2 + $0x9c0] sm:$0xff] }
 0x124   :  { %2734 = vmatpush1.bf16.msra.mxu0 %v6135_v7  ;;  %2863 = vmatpush1.bf16.msra.mxu1 %v6137_v8  ;;  %v589_v7 = vld [vmem:[#allocation2 + $0x848] sm:$0xff]  ;;  %v6186_v8 = vcombine.high %v581_v57, %v585_v58  ;;  %v6225_v58 = vcombine.low %v621_v44, %v625_v46  ;;  %v676_v44 = vld [vmem:[#allocation2 + $0xb00] sm:$0xff] }
 0x125   :  { %2735 = vmatprep.subr.bf16.mxu0 %v6144_v9  ;;  %2864 = vmatprep.subr.bf16.mxu1 %v6146_v17  ;;  %v593_v9 = vld [vmem:[#allocation2 + $0x868] sm:$0xff] }
 0x126   :  { %v597_v17 = vld [vmem:[#allocation2 + $0x888] sm:$0xff]  ;;  %v6194_v18 = vcombine.high %v589_v7, %v593_v9  ;;  %v6193_v22 = vcombine.low %v589_v7, %v593_v9  ;;  %v644_v9 = vld [vmem:[#allocation2 + $0xa00] sm:$0xff] }
 0x127   :  { %v677_v46 = vld [vmem:[#allocation2 + $0xb08] sm:$0xff] }
 0x128   :  { %2736 = vmatpush1.bf16.msra.mxu0 %v6143_v19  ;;  %2865 = vmatpush1.bf16.msra.mxu1 %v6145_v20  ;;  %v601_v19 = vld [vmem:[#allocation2 + $0x8a8] sm:$0xff]  ;;  %v7910_v20 = vpack.c.bf16 %v305_v28, %v251_v63  ;;  %v648_v63 = vld [vmem:[#allocation2 + $0xa20] sm:$0xff] }
 0x129   :  { %2737 = vmatprep.subr.bf16.mxu0 %v6152_v21  ;;  %2866 = vmatprep.subr.bf16.mxu1 %v6154_v25  ;;  %v6191_v21 = vcombine.low %v588_v5, %v592_v6  ;;  %v608_v25 = vld [vmem:[#allocation2 + $0x8e0] sm:$0xff]  ;;  %v6201_v35 = vcombine.low %v597_v17, %v601_v19  ;;  %v641_v5 = vld [vmem:[#allocation2 + $0x9e8] sm:$0xff] }
 0x12a   :  { %v6208_v36 = vcombine.high %v604_v24, %v608_v25  ;;  %v6207_v42 = vcombine.low %v604_v24, %v608_v25  ;;  %v645_v28 = vld [vmem:[#allocation2 + $0xa08] sm:$0xff] }
 0x12c   :  { %2738 = vmatpush1.bf16.msra.mxu0 %v6151_v32  ;;  %2867 = vmatpush1.bf16.msra.mxu1 %v6153_v33  ;;  %v6202_v32 = vcombine.high %v597_v17, %v601_v19  ;;  %v609_v33 = vld [vmem:[#allocation2 + $0x8e8] sm:$0xff]  ;;  %v652_v17 = vld [vmem:[#allocation2 + $0xa40] sm:$0xff] }
 0x12d   :  { %2739 = vmatprep.subr.bf16.mxu0 %v6160_v34  ;;  %2868 = vmatprep.subr.bf16.mxu1 %v6162_v38  ;;  %v6199_v34 = vcombine.low %v596_v14, %v600_v16  ;;  %v616_v38 = vld [vmem:[#allocation2 + $0x920] sm:$0xff]  ;;  %v6209_v43 = vcombine.low %v605_v27, %v609_v33  ;;  %v6248_v16 = vcombine.high %v644_v9, %v648_v63  ;;  %v653_v19 = vld [vmem:[#allocation2 + $0xa48] sm:$0xff] }
 0x12e   :  { %v6216_v11 = vcombine.high %v612_v37, %v616_v38 }
 0x130   :  { %2740 = vmatpush1.bf16.msra.mxu0 %v6159_v40  ;;  %2869 = vmatpush1.bf16.msra.mxu1 %v6161_v12  ;;  %v6210_v40 = vcombine.high %v605_v27, %v609_v33  ;;  %v620_v12 = vld [vmem:[#allocation2 + $0x940] sm:$0xff]  ;;  %v661_v33 = vld [vmem:[#allocation2 + $0xa88] sm:$0xff] }
 0x131   :  { %2741 = vmatprep.subr.bf16.mxu0 %v6168_v15  ;;  %2870 = vmatprep.subr.bf16.mxu1 %v6170_v47  ;;  %v624_v15 = vld [vmem:[#allocation2 + $0x960] sm:$0xff]  ;;  %v6215_v47 = vcombine.low %v612_v37, %v616_v38 }
 0x132   :  { %v6223_v57 = vcombine.low %v620_v12, %v624_v15  ;;  %v660_v27 = vld [vmem:[#allocation2 + $0xa80] sm:$0xff] }
 0x134   :  { %2742 = vmatpush1.bf16.msra.mxu0 %v6167_v50  ;;  %2871 = vmatpush1.bf16.msra.mxu1 %v6169_v51  ;;  %v6224_v50 = vcombine.high %v620_v12, %v624_v15  ;;  %v628_v51 = vld [vmem:[#allocation2 + $0x980] sm:$0xff] }
 0x135   :  { %2743 = vmatprep.subr.bf16.mxu0 %v6176_v53  ;;  %2872 = vmatprep.subr.bf16.mxu1 %v6178_v54  ;;  %v632_v53 = vld [vmem:[#allocation2 + $0x9a0] sm:$0xff]  ;;  %v629_v54 = vld [vmem:[#allocation2 + $0x988] sm:$0xff] }
 0x136   :  { %v6232_v0 = vcombine.high %v628_v51, %v632_v53  ;;  %v6231_v6 = vcombine.low %v628_v51, %v632_v53  ;;  %v6233_v7 = vcombine.low %v629_v54, %v633_v56 }
 0x138   :  { %2744 = vmatpush1.bf16.msra.mxu0 %v6175_v2  ;;  %2873 = vmatpush1.bf16.msra.mxu1 %v6177_v3  ;;  %v640_v2 = vld [vmem:[#allocation2 + $0x9e0] sm:$0xff]  ;;  %v637_v3 = vld [vmem:[#allocation2 + $0x9c8] sm:$0xff] }
 0x139   :  { %2756 = vmatprep.subr.bf16.mxu0 %v6184_v4  ;;  %2885 = vmatprep.subr.bf16.mxu1 %v6186_v8  ;;  %v6234_v4 = vcombine.high %v629_v54, %v633_v56  ;;  %v6240_v8 = vcombine.high %v636_v1, %v640_v2  ;;  %v6241_v14 = vcombine.low %v637_v3, %v641_v5  ;;  %v684_v54 = vld [vmem:[#allocation2 + $0xb40] sm:$0xff]  ;;  %v685_v56 = vld [vmem:[#allocation2 + $0xb48] sm:$0xff] }
 0x13b   :  { %2746 = vmatmul.mubr.bf16.vlgmr.msra.gmra.mrb[0].mxu0 %v7908_v29  ;;  %2875 = vmatmul.mubr.bf16.vlgmr.msra.gmra.mrb[0].mxu1 %v7908_v29 }
 0x13c   :  { %2757 = vmatpush1.bf16.msra.mxu0 %v6183_v30  ;;  %2886 = vmatpush1.bf16.msra.mxu1 %v6185_v31  ;;  %v6242_v30 = vcombine.high %v637_v3, %v641_v5  ;;  %v649_v31 = vld [vmem:[#allocation2 + $0xa28] sm:$0xff]  ;;  %v692_v3 = vld [vmem:[#allocation2 + $0xb80] sm:$0xff] }
 0x13d   :  { %2758 = vmatprep.subr.bf16.mxu0 %v6192_v13  ;;  %2887 = vmatprep.subr.bf16.mxu1 %v6194_v18  ;;  %v6239_v13 = vcombine.low %v636_v1, %v640_v2  ;;  %v656_v18 = vld [vmem:[#allocation2 + $0xa60] sm:$0xff]  ;;  %v6249_v24 = vcombine.low %v645_v28, %v649_v31  ;;  %v693_v5 = vld [vmem:[#allocation2 + $0xb88] sm:$0xff] }
 0x13e   :  { %2788 = vmatprep.mubr.bf16.mxu0 %v7910_v20  ;;  %2917 = vmatprep.mubr.bf16.mxu1 %v7910_v20  ;;  %v6256_v25 = vcombine.high %v652_v17, %v656_v18 }
 0x140   :  { %2759 = vmatpush1.bf16.msra.mxu0 %v6191_v21  ;;  %2888 = vmatpush1.bf16.msra.mxu1 %v6193_v22  ;;  %v6250_v21 = vcombine.high %v645_v28, %v649_v31  ;;  %v657_v22 = vld [vmem:[#allocation2 + $0xa68] sm:$0xff]  ;;  %v700_v28 = vld [vmem:[#allocation2 + $0xbc0] sm:$0xff] }
 0x141   :  { %2760 = vmatprep.subr.bf16.mxu0 %v6200_v23  ;;  %2889 = vmatprep.subr.bf16.mxu1 %v6202_v32  ;;  %v6247_v23 = vcombine.low %v644_v9, %v648_v63  ;;  %v664_v32 = vld [vmem:[#allocation2 + $0xaa0] sm:$0xff]  ;;  %v6257_v37 = vcombine.low %v653_v19, %v657_v22  ;;  %v701_v31 = vld [vmem:[#allocation2 + $0xbc8] sm:$0xff] }
 0x142   :  { %v6264_v38 = vcombine.high %v660_v27, %v664_v32 }
 0x144   :  { %2761 = vmatpush1.bf16.msra.mxu0 %v6199_v34  ;;  %2890 = vmatpush1.bf16.msra.mxu1 %v6201_v35  ;;  %v6258_v34 = vcombine.high %v653_v19, %v657_v22  ;;  %v665_v35 = vld [vmem:[#allocation2 + $0xaa8] sm:$0xff]  ;;  %v326_v19 = vld [vmem:[#allocation2 + $0x10] sm:$0xff]  ;;  %v327_v22 = vld [vmem:[#allocation2 + $0x18] sm:$0xff] }
 0x145   :  { %2762 = vmatprep.subr.bf16.mxu0 %v6208_v36  ;;  %2891 = vmatprep.subr.bf16.mxu1 %v6210_v40  ;;  %v6255_v36 = vcombine.low %v652_v17, %v656_v18  ;;  %v672_v40 = vld [vmem:[#allocation2 + $0xae0] sm:$0xff]  ;;  %v6265_v12 = vcombine.low %v661_v33, %v665_v35 }
 0x146   :  { %v6272_v15 = vcombine.high %v668_v39, %v672_v40 }
 0x148   :  { %2763 = vmatpush1.bf16.msra.mxu0 %v6207_v42  ;;  %2892 = vmatpush1.bf16.msra.mxu1 %v6209_v43  ;;  %v6266_v42 = vcombine.high %v661_v33, %v665_v35  ;;  %v673_v43 = vld [vmem:[#allocation2 + $0xae8] sm:$0xff]  ;;  %v334_v35 = vld [vmem:[#allocation2 + $0x50] sm:$0xff] }
 0x149   :  { %2764 = vmatprep.subr.bf16.mxu0 %v6216_v11  ;;  %2893 = vmatprep.subr.bf16.mxu1 %v6218_v45  ;;  %v6263_v11 = vcombine.low %v660_v27, %v664_v32  ;;  %v680_v45 = vld [vmem:[#allocation2 + $0xb20] sm:$0xff]  ;;  %v6273_v51 = vcombine.low %v669_v41, %v673_v43  ;;  %v304_v27 = vcombine.low %v7895_v61, %v7898_v62  ;;  %v342_v61 = vld [vmem:[#allocation2 + $0x90] sm:$0xff] }
 0x14a   :  { %v6280_v53 = vcombine.high %v676_v44, %v680_v45  ;;  %v346_v62 = vld [vmem:[#allocation2 + $0xb0] sm:$0xff] }
 0x14c   :  { %2765 = vmatpush1.bf16.msra.mxu0 %v6215_v47  ;;  %2894 = vmatpush1.bf16.msra.mxu1 %v6217_v48  ;;  %v6274_v47 = vcombine.high %v669_v41, %v673_v43  ;;  %v681_v48 = vld [vmem:[#allocation2 + $0xb28] sm:$0xff] }
 0x14d   :  { %2766 = vmatprep.subr.bf16.mxu0 %v6224_v50  ;;  %2895 = vmatprep.subr.bf16.mxu1 %v6226_v55  ;;  %v6271_v50 = vcombine.low %v668_v39, %v672_v40  ;;  %v688_v55 = vld [vmem:[#allocation2 + $0xb60] sm:$0xff]  ;;  %v6281_v1 = vcombine.low %v677_v46, %v681_v48  ;;  %v339_v39 = vld [vmem:[#allocation2 + $0x78] sm:$0xff] }
 0x14e   :  { %v6288_v2 = vcombine.high %v684_v54, %v688_v55 }
 0x150   :  { %2767 = vmatpush1.bf16.msra.mxu0 %v6223_v57  ;;  %2896 = vmatpush1.bf16.msra.mxu1 %v6225_v58  ;;  %v6282_v57 = vcombine.high %v677_v46, %v681_v48  ;;  %v689_v58 = vld [vmem:[#allocation2 + $0xb68] sm:$0xff]  ;;  %v354_v46 = vld [vmem:[#allocation2 + $0xf0] sm:$0xff] }
 0x151   :  { %2768 = vmatprep.subr.bf16.mxu0 %v6232_v0  ;;  %2897 = vmatprep.subr.bf16.mxu1 %v6234_v4  ;;  %v6279_v0 = vcombine.low %v676_v44, %v680_v45  ;;  %v696_v4 = vld [vmem:[#allocation2 + $0xba0] sm:$0xff]  ;;  %v6289_v9 = vcombine.low %v685_v56, %v689_v58  ;;  %v5948_v44 = vcombine.high %v342_v61, %v346_v62  ;;  %v350_v45 = vld [vmem:[#allocation2 + $0xd0] sm:$0xff] }
 0x152   :  { %v6296_v63 = vcombine.high %v692_v3, %v696_v4 }
 0x154   :  { %2769 = vmatpush1.bf16.msra.mxu0 %v6231_v6  ;;  %2898 = vmatpush1.bf16.msra.mxu1 %v6233_v7  ;;  %v6290_v6 = vcombine.high %v685_v56, %v689_v58  ;;  %v697_v7 = vld [vmem:[#allocation2 + $0xba8] sm:$0xff]  ;;  %v362_v56 = vld [vmem:[#allocation2 + $0x130] sm:$0xff] }
 0x155   :  { %2770 = vmatprep.subr.bf16.mxu0 %v6240_v8  ;;  %2899 = vmatprep.subr.bf16.mxu1 %v6242_v30  ;;  %v6287_v8 = vcombine.low %v684_v54, %v688_v55  ;;  %v704_v30 = vld [vmem:[#allocation2 + $0xbe0] sm:$0xff]  ;;  %v6297_v17 = vcombine.low %v693_v5, %v697_v7  ;;  %v5956_v54 = vcombine.high %v350_v45, %v354_v46  ;;  %v358_v55 = vld [vmem:[#allocation2 + $0x110] sm:$0xff] }
 0x156   :  { %v6304_v18 = vcombine.high %v700_v28, %v704_v30  ;;  %v6303_v32 = vcombine.low %v700_v28, %v704_v30  ;;  %v374_v28 = vld [vmem:[#allocation2 + $0x190] sm:$0xff] }
 0x157   :  { %v378_v30 = vld [vmem:[#allocation2 + $0x1b0] sm:$0xff] }
 0x158   :  { %2771 = vmatpush1.bf16.msra.mxu0 %v6239_v13  ;;  %2900 = vmatpush1.bf16.msra.mxu1 %v6241_v14  ;;  %v6298_v13 = vcombine.high %v693_v5, %v697_v7  ;;  %v705_v14 = vld [vmem:[#allocation2 + $0xbe8] sm:$0xff]  ;;  %v367_v5 = vld [vmem:[#allocation2 + $0x158] sm:$0xff] }
 0x159   :  { %2772 = vmatprep.subr.bf16.mxu0 %v6248_v16  ;;  %2901 = vmatprep.subr.bf16.mxu1 %v6250_v21  ;;  %v6295_v16 = vcombine.low %v692_v3, %v696_v4  ;;  %v330_v21 = vld [vmem:[#allocation2 + $0x30] sm:$0xff]  ;;  %v6305_v33 = vcombine.low %v701_v31, %v705_v14  ;;  %v5964_v3 = vcombine.high %v358_v55, %v362_v56  ;;  %v371_v7 = vld [vmem:[#allocation2 + $0x178] sm:$0xff] }
 0x15a   :  { %v5931_v41 = vcombine.low %v326_v19, %v330_v21  ;;  %v366_v4 = vld [vmem:[#allocation2 + $0x150] sm:$0xff] }
 0x15c   :  { %2773 = vmatpush1.bf16.msra.mxu0 %v6247_v23  ;;  %2902 = vmatpush1.bf16.msra.mxu1 %v6249_v24  ;;  %v6306_v23 = vcombine.high %v701_v31, %v705_v14  ;;  %v331_v24 = vld [vmem:[#allocation2 + $0x38] sm:$0xff] }
 0x15d   :  { %2774 = vmatprep.subr.bf16.mxu0 %v6256_v25  ;;  %2903 = vmatprep.subr.bf16.mxu1 %v6258_v34  ;;  %v250_v25 = vcombine.low %v7889_v59, %v7892_v60  ;;  %v5932_v34 = vcombine.high %v326_v19, %v330_v21  ;;  %v5933_v59 = vcombine.low %v327_v22, %v331_v24  ;;  %v375_v31 = vld [vmem:[#allocation2 + $0x198] sm:$0xff]  ;;  %v382_v19 = vld [vmem:[#allocation2 + $0x1d0] sm:$0xff] }
 0x15e   :  { %v379_v14 = vld [vmem:[#allocation2 + $0x1b8] sm:$0xff]  ;;  %v386_v21 = vld [vmem:[#allocation2 + $0x1f0] sm:$0xff] }
 0x15f   :  { %v7920_v40 = vpack.c.bf16 %v304_v27, %v250_v25  ;;  %v5979_v25 = vcombine.low %v374_v28, %v378_v30  ;;  %v5981_v27 = vcombine.low %v375_v31, %v379_v14 }
 0x160   :  { %2775 = vmatpush1.bf16.msra.mxu0 %v6255_v36  ;;  %2904 = vmatpush1.bf16.msra.mxu1 %v6257_v37  ;;  %v338_v36 = vld [vmem:[#allocation2 + $0x70] sm:$0xff]  ;;  %v335_v37 = vld [vmem:[#allocation2 + $0x58] sm:$0xff] }
 0x161   :  { %2776 = vmatprep.subr.bf16.mxu0 %v6264_v38  ;;  %2905 = vmatprep.subr.bf16.mxu1 %v6266_v42  ;;  %v5934_v38 = vcombine.high %v327_v22, %v331_v24  ;;  %v5940_v60 = vcombine.high %v334_v35, %v338_v36  ;;  %v343_v42 = vld [vmem:[#allocation2 + $0x98] sm:$0xff]  ;;  %v5942_v43 = vcombine.high %v335_v37, %v339_v39 }
 0x162   :  { %v383_v22 = vld [vmem:[#allocation2 + $0x1d8] sm:$0xff] }
 0x163   :  { %v387_v24 = vld [vmem:[#allocation2 + $0x1f8] sm:$0xff] }
 0x164   :  { %2777 = vmatpush1.bf16.msra.mxu0 %v6263_v11  ;;  %2906 = vmatpush1.bf16.msra.mxu1 %v6265_v12  ;;  %v347_v11 = vld [vmem:[#allocation2 + $0xb8] sm:$0xff]  ;;  %v5939_v12 = vcombine.low %v334_v35, %v338_v36  ;;  %v5990_v36 = vcombine.high %v383_v22, %v387_v24 }
 0x165   :  { %2778 = vmatprep.subr.bf16.mxu0 %v6272_v15  ;;  %2907 = vmatprep.subr.bf16.mxu1 %v6274_v47  ;;  %v5941_v15 = vcombine.low %v335_v37, %v339_v39  ;;  %v351_v47 = vld [vmem:[#allocation2 + $0xd8] sm:$0xff]  ;;  %v5950_v48 = vcombine.high %v343_v42, %v347_v11  ;;  %v5989_v39 = vcombine.low %v383_v22, %v387_v24 }
 0x166   :  { %v391_v35 = vld [vmem:[#allocation2 + $0x218] sm:$0xff] }
 0x167   :  { %v395_v37 = vld [vmem:[#allocation2 + $0x238] sm:$0xff] }
 0x168   :  { %2779 = vmatpush1.bf16.msra.mxu0 %v6271_v50  ;;  %2908 = vmatpush1.bf16.msra.mxu1 %v6273_v51  ;;  %v355_v50 = vld [vmem:[#allocation2 + $0xf8] sm:$0xff]  ;;  %v5947_v51 = vcombine.low %v342_v61, %v346_v62  ;;  %v5998_v62 = vcombine.high %v391_v35, %v395_v37 }
 0x169   :  { %2780 = vmatprep.subr.bf16.mxu0 %v6280_v53  ;;  %2909 = vmatprep.subr.bf16.mxu1 %v6282_v57  ;;  %v5949_v53 = vcombine.low %v343_v42, %v347_v11  ;;  %v359_v57 = vld [vmem:[#allocation2 + $0x118] sm:$0xff]  ;;  %v5958_v58 = vcombine.high %v351_v47, %v355_v50  ;;  %v5997_v11 = vcombine.low %v391_v35, %v395_v37 }
 0x16a   :  { %v399_v61 = vld [vmem:[#allocation2 + $0x258] sm:$0xff] }
 0x16b   :  { %v403_v42 = vld [vmem:[#allocation2 + $0x278] sm:$0xff] }
 0x16c   :  { %2781 = vmatpush1.bf16.msra.mxu0 %v6279_v0  ;;  %2910 = vmatpush1.bf16.msra.mxu1 %v6281_v1  ;;  %v363_v0 = vld [vmem:[#allocation2 + $0x138] sm:$0xff]  ;;  %v5955_v1 = vcombine.low %v350_v45, %v354_v46  ;;  %v6006_v46 = vcombine.high %v399_v61, %v403_v42 }
 0x16d   :  { %2782 = vmatprep.subr.bf16.mxu0 %v6288_v2  ;;  %2911 = vmatprep.subr.bf16.mxu1 %v6290_v6  ;;  %v5957_v2 = vcombine.low %v351_v47, %v355_v50  ;;  %v5966_v6 = vcombine.high %v359_v57, %v363_v0  ;;  %v407_v45 = vld [vmem:[#allocation2 + $0x298] sm:$0xff]  ;;  %v6005_v50 = vcombine.low %v399_v61, %v403_v42 }
 0x16e   :  { %v411_v47 = vld [vmem:[#allocation2 + $0x2b8] sm:$0xff] }
 0x16f   :  { %v443_v22 = vld [vmem:[#allocation2 + $0x3b8] sm:$0xff] }
 0x170   :  { %2783 = vmatpush1.bf16.msra.mxu0 %v6287_v8  ;;  %2912 = vmatpush1.bf16.msra.mxu1 %v6289_v9  ;;  %v5963_v8 = vcombine.low %v358_v55, %v362_v56  ;;  %v5965_v9 = vcombine.low %v359_v57, %v363_v0  ;;  %v415_v55 = vld [vmem:[#allocation2 + $0x2d8] sm:$0xff]  ;;  %v6014_v56 = vcombine.high %v407_v45, %v411_v47 }
 0x171   :  { %2784 = vmatprep.subr.bf16.mxu0 %v6296_v63  ;;  %2913 = vmatprep.subr.bf16.mxu1 %v6298_v13  ;;  %v5974_v13 = vcombine.high %v367_v5, %v371_v7  ;;  %v419_v57 = vld [vmem:[#allocation2 + $0x2f8] sm:$0xff]  ;;  %v6013_v0 = vcombine.low %v407_v45, %v411_v47 }
 0x172   :  { %v451_v35 = vld [vmem:[#allocation2 + $0x3f8] sm:$0xff] }
 0x173   :  { %v459_v61 = vld [vmem:[#allocation2 + $0x438] sm:$0xff] }
 0x174   :  { %2785 = vmatpush1.bf16.msra.mxu0 %v6295_v16  ;;  %2914 = vmatpush1.bf16.msra.mxu1 %v6297_v17  ;;  %v5973_v17 = vcombine.low %v367_v5, %v371_v7  ;;  %v427_v5 = vld [vmem:[#allocation2 + $0x338] sm:$0xff]  ;;  %v6021_v7 = vcombine.low %v415_v55, %v419_v57 }
 0x175   :  { %2786 = vmatprep.subr.bf16.mxu0 %v6304_v18  ;;  %2915 = vmatprep.subr.bf16.mxu1 %v6306_v23  ;;  %v5980_v18 = vcombine.high %v374_v28, %v378_v30  ;;  %v5982_v23 = vcombine.high %v375_v31, %v379_v14  ;;  %v431_v28 = vld [vmem:[#allocation2 + $0x358] sm:$0xff] }
 0x176   :  { %v435_v31 = vld [vmem:[#allocation2 + $0x378] sm:$0xff] }
 0x177   :  { %v6037_v24 = vcombine.low %v431_v28, %v435_v31  ;;  %v467_v45 = vld [vmem:[#allocation2 + $0x478] sm:$0xff] }
 0x178   :  { %2787 = vmatpush1.bf16.msra.mxu0 %v6303_v32  ;;  %2916 = vmatpush1.bf16.msra.mxu1 %v6305_v33  ;;  %v5988_v32 = vcombine.high %v382_v19, %v386_v21  ;;  %v390_v33 = vld [vmem:[#allocation2 + $0x210] sm:$0xff] }
 0x179   :  { %2928 = vmatprep.subr.bf16.mxu0 %v5932_v34  ;;  %3057 = vmatprep.subr.bf16.mxu1 %v5934_v38  ;;  %v394_v34 = vld [vmem:[#allocation2 + $0x230] sm:$0xff]  ;;  %v5987_v38 = vcombine.low %v382_v19, %v386_v21  ;;  %v439_v19 = vld [vmem:[#allocation2 + $0x398] sm:$0xff]  ;;  %v6038_v21 = vcombine.high %v431_v28, %v435_v31 }
 0x17a   :  { %v6045_v37 = vcombine.low %v439_v19, %v443_v22 }
 0x17b   :  { %2789 = vmatmul.mubr.bf16.vlgmr.msra.gmra.mrb[0].mxu0 %v7920_v40  ;;  %2918 = vmatmul.mubr.bf16.vlgmr.msra.gmra.mrb[0].mxu1 %v7920_v40 }
 0x17c   :  { %2929 = vmatpush1.bf16.msra.mxu0 %v5931_v41  ;;  %3058 = vmatpush1.bf16.msra.mxu1 %v5933_v59  ;;  %v5996_v41 = vcombine.high %v390_v33, %v394_v34  ;;  %v398_v59 = vld [vmem:[#allocation2 + $0x250] sm:$0xff] }
 0x17d   :  { %2930 = vmatprep.subr.bf16.mxu0 %v5940_v60  ;;  %3059 = vmatprep.subr.bf16.mxu1 %v5942_v43  ;;  %v402_v60 = vld [vmem:[#allocation2 + $0x270] sm:$0xff]  ;;  %v5995_v43 = vcombine.low %v390_v33, %v394_v34  ;;  %v447_v33 = vld [vmem:[#allocation2 + $0x3d8] sm:$0xff]  ;;  %v6046_v34 = vcombine.high %v439_v19, %v443_v22 }
 0x17e   :  { %2960 = vmatprep.mubr.bf16.mxu0 %v7832_v26  ;;  %3089 = vmatprep.mubr.bf16.mxu1 %v7832_v26  ;;  %v370_v26 = vld [vmem:[#allocation2 + $0x170] sm:$0xff]  ;;  %v6053_v42 = vcombine.low %v447_v33, %v451_v35 }
 0x17f   :  { %v5972_v63 = vcombine.high %v366_v4, %v370_v26  ;;  %v5971_v16 = vcombine.low %v366_v4, %v370_v26  ;;  %v423_v4 = vld [vmem:[#allocation2 + $0x318] sm:$0xff]  ;;  %v6022_v26 = vcombine.high %v415_v55, %v419_v57 }
 0x180   :  { %2931 = vmatpush1.bf16.msra.mxu0 %v5939_v12  ;;  %3060 = vmatpush1.bf16.msra.mxu1 %v5941_v15  ;;  %v6004_v12 = vcombine.high %v398_v59, %v402_v60  ;;  %v406_v15 = vld [vmem:[#allocation2 + $0x290] sm:$0xff]  ;;  %v6030_v30 = vcombine.high %v423_v4, %v427_v5  ;;  %v6029_v14 = vcombine.low %v423_v4, %v427_v5  ;;  %v475_v55 = vld [vmem:[#allocation2 + $0x4b8] sm:$0xff] }
 0x181   :  { %2932 = vmatprep.subr.bf16.mxu0 %v5948_v44  ;;  %3061 = vmatprep.subr.bf16.mxu1 %v5950_v48  ;;  %v410_v44 = vld [vmem:[#allocation2 + $0x2b0] sm:$0xff]  ;;  %v6003_v48 = vcombine.low %v398_v59, %v402_v60  ;;  %v455_v59 = vld [vmem:[#allocation2 + $0x418] sm:$0xff]  ;;  %v6054_v60 = vcombine.high %v447_v33, %v451_v35 }
 0x182   :  { %v6061_v47 = vcombine.low %v455_v59, %v459_v61  ;;  %v483_v4 = vld [vmem:[#allocation2 + $0x4f8] sm:$0xff] }
 0x184   :  { %2933 = vmatpush1.bf16.msra.mxu0 %v5947_v51  ;;  %3062 = vmatpush1.bf16.msra.mxu1 %v5949_v53  ;;  %v6012_v51 = vcombine.high %v406_v15, %v410_v44  ;;  %v414_v53 = vld [vmem:[#allocation2 + $0x2d0] sm:$0xff] }
 0x185   :  { %2934 = vmatprep.subr.bf16.mxu0 %v5956_v54  ;;  %3063 = vmatprep.subr.bf16.mxu1 %v5958_v58  ;;  %v418_v54 = vld [vmem:[#allocation2 + $0x2f0] sm:$0xff]  ;;  %v6011_v58 = vcombine.low %v406_v15, %v410_v44  ;;  %v463_v15 = vld [vmem:[#allocation2 + $0x458] sm:$0xff]  ;;  %v6062_v44 = vcombine.high %v455_v59, %v459_v61 }
 0x186   :  { %v6069_v57 = vcombine.low %v463_v15, %v467_v45 }
 0x188   :  { %2935 = vmatpush1.bf16.msra.mxu0 %v5955_v1  ;;  %3064 = vmatpush1.bf16.msra.mxu1 %v5957_v2  ;;  %v6020_v1 = vcombine.high %v414_v53, %v418_v54  ;;  %v422_v2 = vld [vmem:[#allocation2 + $0x310] sm:$0xff] }
 0x189   :  { %2936 = vmatprep.subr.bf16.mxu0 %v5964_v3  ;;  %3065 = vmatprep.subr.bf16.mxu1 %v5966_v6  ;;  %v426_v3 = vld [vmem:[#allocation2 + $0x330] sm:$0xff]  ;;  %v6019_v6 = vcombine.low %v414_v53, %v418_v54  ;;  %v471_v54 = vld [vmem:[#allocation2 + $0x498] sm:$0xff] }
 0x18a   :  { %v474_v53 = vld [vmem:[#allocation2 + $0x4b0] sm:$0xff] }
 0x18c   :  { %2937 = vmatpush1.bf16.msra.mxu0 %v5963_v8  ;;  %3066 = vmatpush1.bf16.msra.mxu1 %v5965_v9  ;;  %v6028_v8 = vcombine.high %v422_v2, %v426_v3  ;;  %v430_v9 = vld [vmem:[#allocation2 + $0x350] sm:$0xff] }
 0x18d   :  { %2938 = vmatprep.subr.bf16.mxu0 %v5972_v63  ;;  %3067 = vmatprep.subr.bf16.mxu1 %v5974_v13  ;;  %v434_v63 = vld [vmem:[#allocation2 + $0x370] sm:$0xff]  ;;  %v6027_v13 = vcombine.low %v422_v2, %v426_v3  ;;  %v479_v3 = vld [vmem:[#allocation2 + $0x4d8] sm:$0xff] }
 0x18e   :  { %v482_v2 = vld [vmem:[#allocation2 + $0x4f0] sm:$0xff] }
 0x190   :  { %2939 = vmatpush1.bf16.msra.mxu0 %v5971_v16  ;;  %3068 = vmatpush1.bf16.msra.mxu1 %v5973_v17  ;;  %v6036_v16 = vcombine.high %v430_v9, %v434_v63  ;;  %v438_v17 = vld [vmem:[#allocation2 + $0x390] sm:$0xff] }
 0x191   :  { %2940 = vmatprep.subr.bf16.mxu0 %v5980_v18  ;;  %3069 = vmatprep.subr.bf16.mxu1 %v5982_v23  ;;  %v442_v18 = vld [vmem:[#allocation2 + $0x3b0] sm:$0xff]  ;;  %v6035_v23 = vcombine.low %v430_v9, %v434_v63  ;;  %v487_v9 = vld [vmem:[#allocation2 + $0x518] sm:$0xff] }
 0x192   :  { %v491_v63 = vld [vmem:[#allocation2 + $0x538] sm:$0xff] }
 0x193   :  { %v6093_v19 = vcombine.low %v487_v9, %v491_v63 }
 0x194   :  { %2941 = vmatpush1.bf16.msra.mxu0 %v5979_v25  ;;  %3070 = vmatpush1.bf16.msra.mxu1 %v5981_v27  ;;  %v6044_v25 = vcombine.high %v438_v17, %v442_v18  ;;  %v446_v27 = vld [vmem:[#allocation2 + $0x3d0] sm:$0xff] }
 0x195   :  { %2942 = vmatprep.subr.bf16.mxu0 %v5988_v32  ;;  %3071 = vmatprep.subr.bf16.mxu1 %v5990_v36  ;;  %v450_v32 = vld [vmem:[#allocation2 + $0x3f0] sm:$0xff]  ;;  %v6043_v36 = vcombine.low %v438_v17, %v442_v18  ;;  %v499_v17 = vld [vmem:[#allocation2 + $0x578] sm:$0xff] }
 0x198   :  { %2943 = vmatpush1.bf16.msra.mxu0 %v5987_v38  ;;  %3072 = vmatpush1.bf16.msra.mxu1 %v5989_v39  ;;  %v6052_v38 = vcombine.high %v446_v27, %v450_v32  ;;  %v454_v39 = vld [vmem:[#allocation2 + $0x410] sm:$0xff] }
 0x199   :  { %2944 = vmatprep.subr.bf16.mxu0 %v5996_v41  ;;  %3073 = vmatprep.subr.bf16.mxu1 %v5998_v62  ;;  %v458_v41 = vld [vmem:[#allocation2 + $0x430] sm:$0xff]  ;;  %v6051_v62 = vcombine.low %v446_v27, %v450_v32  ;;  %v507_v27 = vld [vmem:[#allocation2 + $0x5b8] sm:$0xff] }
 0x19c   :  { %2945 = vmatpush1.bf16.msra.mxu0 %v5995_v43  ;;  %3074 = vmatpush1.bf16.msra.mxu1 %v5997_v11  ;;  %v6060_v43 = vcombine.high %v454_v39, %v458_v41  ;;  %v462_v11 = vld [vmem:[#allocation2 + $0x450] sm:$0xff] }
 0x19d   :  { %2946 = vmatprep.subr.bf16.mxu0 %v6004_v12  ;;  %3075 = vmatprep.subr.bf16.mxu1 %v6006_v46  ;;  %v466_v12 = vld [vmem:[#allocation2 + $0x470] sm:$0xff]  ;;  %v6059_v46 = vcombine.low %v454_v39, %v458_v41  ;;  %v515_v39 = vld [vmem:[#allocation2 + $0x5f8] sm:$0xff] }
 0x1a0   :  { %2947 = vmatpush1.bf16.msra.mxu0 %v6003_v48  ;;  %3076 = vmatpush1.bf16.msra.mxu1 %v6005_v50  ;;  %v6068_v48 = vcombine.high %v462_v11, %v466_v12  ;;  %v6070_v50 = vcombine.high %v463_v15, %v467_v45 }
 0x1a1   :  { %2948 = vmatprep.subr.bf16.mxu0 %v6012_v51  ;;  %3077 = vmatprep.subr.bf16.mxu1 %v6014_v56  ;;  %v470_v51 = vld [vmem:[#allocation2 + $0x490] sm:$0xff]  ;;  %v6067_v56 = vcombine.low %v462_v11, %v466_v12  ;;  %v523_v11 = vld [vmem:[#allocation2 + $0x638] sm:$0xff] }
 0x1a4   :  { %2949 = vmatpush1.bf16.msra.mxu0 %v6011_v58  ;;  %3078 = vmatpush1.bf16.msra.mxu1 %v6013_v0  ;;  %v6076_v58 = vcombine.high %v470_v51, %v474_v53  ;;  %v6078_v0 = vcombine.high %v471_v54, %v475_v55 }
 0x1a5   :  { %2950 = vmatprep.subr.bf16.mxu0 %v6020_v1  ;;  %3079 = vmatprep.subr.bf16.mxu1 %v6022_v26  ;;  %v478_v1 = vld [vmem:[#allocation2 + $0x4d0] sm:$0xff]  ;;  %v6075_v26 = vcombine.low %v470_v51, %v474_v53 }
 0x1a6   :  { %v6084_v5 = vcombine.high %v478_v1, %v482_v2  ;;  %v6083_v28 = vcombine.low %v478_v1, %v482_v2 }
 0x1a8   :  { %2951 = vmatpush1.bf16.msra.mxu0 %v6019_v6  ;;  %3080 = vmatpush1.bf16.msra.mxu1 %v6021_v7  ;;  %v6086_v6 = vcombine.high %v479_v3, %v483_v4  ;;  %v486_v7 = vld [vmem:[#allocation2 + $0x510] sm:$0xff] }
 0x1a9   :  { %2952 = vmatprep.subr.bf16.mxu0 %v6028_v8  ;;  %3081 = vmatprep.subr.bf16.mxu1 %v6030_v30  ;;  %v490_v8 = vld [vmem:[#allocation2 + $0x530] sm:$0xff]  ;;  %v6085_v30 = vcombine.low %v479_v3, %v483_v4 }
 0x1aa   :  { %v6092_v31 = vcombine.high %v486_v7, %v490_v8  ;;  %v6091_v18 = vcombine.low %v486_v7, %v490_v8 }
 0x1ac   :  { %2953 = vmatpush1.bf16.msra.mxu0 %v6027_v13  ;;  %3082 = vmatpush1.bf16.msra.mxu1 %v6029_v14  ;;  %v494_v13 = vld [vmem:[#allocation2 + $0x550] sm:$0xff] }
 0x1ad   :  { %2954 = vmatprep.subr.bf16.mxu0 %v6036_v16  ;;  %3083 = vmatprep.subr.bf16.mxu1 %v6038_v21  ;;  %v498_v14 = vld [vmem:[#allocation2 + $0x570] sm:$0xff]  ;;  %v495_v16 = vld [vmem:[#allocation2 + $0x558] sm:$0xff] }
 0x1ae   :  { %v6100_v21 = vcombine.high %v494_v13, %v498_v14  ;;  %v6102_v22 = vcombine.high %v495_v16, %v499_v17  ;;  %v6099_v32 = vcombine.low %v494_v13, %v498_v14  ;;  %v6101_v33 = vcombine.low %v495_v16, %v499_v17 }
 0x1b0   :  { %2955 = vmatpush1.bf16.msra.mxu0 %v6035_v23  ;;  %3084 = vmatpush1.bf16.msra.mxu1 %v6037_v24  ;;  %v502_v23 = vld [vmem:[#allocation2 + $0x590] sm:$0xff] }
 0x1b1   :  { %2956 = vmatprep.subr.bf16.mxu0 %v6044_v25  ;;  %3085 = vmatprep.subr.bf16.mxu1 %v6046_v34  ;;  %v506_v24 = vld [vmem:[#allocation2 + $0x5b0] sm:$0xff]  ;;  %v503_v25 = vld [vmem:[#allocation2 + $0x598] sm:$0xff] }
 0x1b2   :  { %v6108_v34 = vcombine.high %v502_v23, %v506_v24  ;;  %v6110_v35 = vcombine.high %v503_v25, %v507_v27  ;;  %v6107_v41 = vcombine.low %v502_v23, %v506_v24  ;;  %v6109_v59 = vcombine.low %v503_v25, %v507_v27 }
 0x1b4   :  { %2957 = vmatpush1.bf16.msra.mxu0 %v6043_v36  ;;  %3086 = vmatpush1.bf16.msra.mxu1 %v6045_v37  ;;  %v510_v36 = vld [vmem:[#allocation2 + $0x5d0] sm:$0xff] }
 0x1b5   :  { %2958 = vmatprep.subr.bf16.mxu0 %v6052_v38  ;;  %3087 = vmatprep.subr.bf16.mxu1 %v6054_v60  ;;  %v514_v37 = vld [vmem:[#allocation2 + $0x5f0] sm:$0xff]  ;;  %v511_v38 = vld [vmem:[#allocation2 + $0x5d8] sm:$0xff] }
 0x1b6   :  { %v6116_v60 = vcombine.high %v510_v36, %v514_v37  ;;  %v6118_v61 = vcombine.high %v511_v38, %v515_v39  ;;  %v6115_v12 = vcombine.low %v510_v36, %v514_v37  ;;  %v6117_v15 = vcombine.low %v511_v38, %v515_v39 }
 0x1b8   :  { %2959 = vmatpush1.bf16.msra.mxu0 %v6051_v62  ;;  %3088 = vmatpush1.bf16.msra.mxu1 %v6053_v42  ;;  %v518_v62 = vld [vmem:[#allocation2 + $0x610] sm:$0xff] }
 0x1b9   :  { %2971 = vmatprep.subr.bf16.mxu0 %v6060_v43  ;;  %3100 = vmatprep.subr.bf16.mxu1 %v6062_v44  ;;  %v522_v42 = vld [vmem:[#allocation2 + $0x630] sm:$0xff]  ;;  %v519_v43 = vld [vmem:[#allocation2 + $0x618] sm:$0xff] }
 0x1ba   :  { %v6124_v44 = vcombine.high %v518_v62, %v522_v42  ;;  %v6126_v45 = vcombine.high %v519_v43, %v523_v11  ;;  %v6123_v51 = vcombine.low %v518_v62, %v522_v42  ;;  %v6125_v53 = vcombine.low %v519_v43, %v523_v11 }
 0x1bb   :  { %2961 = vmatmul.mubr.bf16.vlgmr.msra.gmra.mrb[4].mxu0 %v7868_v10  ;;  %3090 = vmatmul.mubr.bf16.vlgmr.msra.gmra.mrb[4].mxu1 %v7868_v10  ;;  %v6077_v10 = vcombine.low %v471_v54, %v475_v55 }
 0x1bc   :  { %2972 = vmatpush1.bf16.msra.mxu0 %v6059_v46  ;;  %3101 = vmatpush1.bf16.msra.mxu1 %v6061_v47  ;;  %v526_v46 = vld [vmem:[#allocation2 + $0x650] sm:$0xff] }
 0x1bd   :  { %2973 = vmatprep.subr.bf16.mxu0 %v6068_v48  ;;  %3102 = vmatprep.subr.bf16.mxu1 %v6070_v50  ;;  %v530_v47 = vld [vmem:[#allocation2 + $0x670] sm:$0xff]  ;;  %v527_v48 = vld [vmem:[#allocation2 + $0x658] sm:$0xff] }
 0x1be   :  { %3003 = vmatprep.mubr.bf16.mxu0 %v7870_v49  ;;  %3132 = vmatprep.mubr.bf16.mxu1 %v7870_v49  ;;  %v6094_v49 = vcombine.high %v487_v9, %v491_v63  ;;  %v531_v50 = vld [vmem:[#allocation2 + $0x678] sm:$0xff]  ;;  %v6132_v54 = vcombine.high %v526_v46, %v530_v47  ;;  %v6131_v1 = vcombine.low %v526_v46, %v530_v47 }
 0x1bf   :  { %v6134_v55 = vcombine.high %v527_v48, %v531_v50  ;;  %v6133_v2 = vcombine.low %v527_v48, %v531_v50 }
 0x1c0   :  { %2974 = vmatpush1.bf16.msra.mxu0 %v6067_v56  ;;  %3103 = vmatpush1.bf16.msra.mxu1 %v6069_v57  ;;  %v534_v56 = vld [vmem:[#allocation2 + $0x690] sm:$0xff] }
 0x1c1   :  { %2975 = vmatprep.subr.bf16.mxu0 %v6076_v58  ;;  %3104 = vmatprep.subr.bf16.mxu1 %v6078_v0  ;;  %v538_v57 = vld [vmem:[#allocation2 + $0x6b0] sm:$0xff]  ;;  %v535_v58 = vld [vmem:[#allocation2 + $0x698] sm:$0xff] }
 0x1c2   :  { %v539_v0 = vld [vmem:[#allocation2 + $0x6b8] sm:$0xff]  ;;  %v6140_v3 = vcombine.high %v534_v56, %v538_v57  ;;  %v6139_v7 = vcombine.low %v534_v56, %v538_v57 }
 0x1c3   :  { %v6142_v4 = vcombine.high %v535_v58, %v539_v0  ;;  %v6141_v8 = vcombine.low %v535_v58, %v539_v0 }
 0x1c4   :  { %2976 = vmatpush1.bf16.msra.mxu0 %v6075_v26  ;;  %3105 = vmatpush1.bf16.msra.mxu1 %v6077_v10  ;;  %v542_v26 = vld [vmem:[#allocation2 + $0x6d0] sm:$0xff] }
 0x1c5   :  { %2977 = vmatprep.subr.bf16.mxu0 %v6084_v5  ;;  %3106 = vmatprep.subr.bf16.mxu1 %v6086_v6  ;;  %v546_v10 = vld [vmem:[#allocation2 + $0x6f0] sm:$0xff]  ;;  %v543_v5 = vld [vmem:[#allocation2 + $0x6d8] sm:$0xff] }
 0x1c6   :  { %v547_v6 = vld [vmem:[#allocation2 + $0x6f8] sm:$0xff]  ;;  %v6148_v9 = vcombine.high %v542_v26, %v546_v10  ;;  %v6147_v13 = vcombine.low %v542_v26, %v546_v10 }
 0x1c7   :  { %v6150_v63 = vcombine.high %v543_v5, %v547_v6  ;;  %v6149_v14 = vcombine.low %v543_v5, %v547_v6 }
 0x1c8   :  { %2978 = vmatpush1.bf16.msra.mxu0 %v6083_v28  ;;  %3107 = vmatpush1.bf16.msra.mxu1 %v6085_v30  ;;  %v550_v28 = vld [vmem:[#allocation2 + $0x710] sm:$0xff] }
 0x1c9   :  { %2979 = vmatprep.subr.bf16.mxu0 %v6092_v31  ;;  %3108 = vmatprep.subr.bf16.mxu1 %v6094_v49  ;;  %v554_v30 = vld [vmem:[#allocation2 + $0x730] sm:$0xff]  ;;  %v551_v31 = vld [vmem:[#allocation2 + $0x718] sm:$0xff] }
 0x1ca   :  { %v555_v49 = vld [vmem:[#allocation2 + $0x738] sm:$0xff]  ;;  %v6156_v16 = vcombine.high %v550_v28, %v554_v30  ;;  %v6155_v23 = vcombine.low %v550_v28, %v554_v30 }
 0x1cb   :  { %v6158_v17 = vcombine.high %v551_v31, %v555_v49  ;;  %v6157_v24 = vcombine.low %v551_v31, %v555_v49  ;;  %v614_v49 = vld [vmem:[#allocation2 + $0x910] sm:$0xff] }
 0x1cc   :  { %2980 = vmatpush1.bf16.msra.mxu0 %v6091_v18  ;;  %3109 = vmatpush1.bf16.msra.mxu1 %v6093_v19  ;;  %v558_v18 = vld [vmem:[#allocation2 + $0x750] sm:$0xff] }
 0x1cd   :  { %2981 = vmatprep.subr.bf16.mxu0 %v6100_v21  ;;  %3110 = vmatprep.subr.bf16.mxu1 %v6102_v22  ;;  %v562_v19 = vld [vmem:[#allocation2 + $0x770] sm:$0xff]  ;;  %v559_v21 = vld [vmem:[#allocation2 + $0x758] sm:$0xff] }
 0x1ce   :  { %v563_v22 = vld [vmem:[#allocation2 + $0x778] sm:$0xff]  ;;  %v6164_v25 = vcombine.high %v558_v18, %v562_v19  ;;  %v6163_v36 = vcombine.low %v558_v18, %v562_v19 }
 0x1cf   :  { %v6166_v27 = vcombine.high %v559_v21, %v563_v22  ;;  %v6165_v37 = vcombine.low %v559_v21, %v563_v22  ;;  %v622_v21 = vld [vmem:[#allocation2 + $0x950] sm:$0xff] }
 0x1d0   :  { %2982 = vmatpush1.bf16.msra.mxu0 %v6099_v32  ;;  %3111 = vmatpush1.bf16.msra.mxu1 %v6101_v33  ;;  %v566_v32 = vld [vmem:[#allocation2 + $0x790] sm:$0xff] }
 0x1d1   :  { %2983 = vmatprep.subr.bf16.mxu0 %v6108_v34  ;;  %3112 = vmatprep.subr.bf16.mxu1 %v6110_v35  ;;  %v570_v33 = vld [vmem:[#allocation2 + $0x7b0] sm:$0xff]  ;;  %v567_v34 = vld [vmem:[#allocation2 + $0x798] sm:$0xff] }
 0x1d2   :  { %v571_v35 = vld [vmem:[#allocation2 + $0x7b8] sm:$0xff]  ;;  %v6172_v38 = vcombine.high %v566_v32, %v570_v33  ;;  %v6171_v62 = vcombine.low %v566_v32, %v570_v33  ;;  %v626_v22 = vld [vmem:[#allocation2 + $0x970] sm:$0xff] }
 0x1d3   :  { %v6174_v39 = vcombine.high %v567_v34, %v571_v35  ;;  %v6173_v42 = vcombine.low %v567_v34, %v571_v35  ;;  %v6228_v32 = vcombine.high %v622_v21, %v626_v22  ;;  %v630_v34 = vld [vmem:[#allocation2 + $0x990] sm:$0xff] }
 0x1d4   :  { %2984 = vmatpush1.bf16.msra.mxu0 %v6107_v41  ;;  %3113 = vmatpush1.bf16.msra.mxu1 %v6109_v59  ;;  %v574_v41 = vld [vmem:[#allocation2 + $0x7d0] sm:$0xff] }
 0x1d5   :  { %2985 = vmatprep.subr.bf16.mxu0 %v6116_v60  ;;  %3114 = vmatprep.subr.bf16.mxu1 %v6118_v61  ;;  %v578_v59 = vld [vmem:[#allocation2 + $0x7f0] sm:$0xff]  ;;  %v575_v60 = vld [vmem:[#allocation2 + $0x7d8] sm:$0xff] }
 0x1d6   :  { %v579_v61 = vld [vmem:[#allocation2 + $0x7f8] sm:$0xff]  ;;  %v6180_v43 = vcombine.high %v574_v41, %v578_v59  ;;  %v6179_v46 = vcombine.low %v574_v41, %v578_v59  ;;  %v634_v35 = vld [vmem:[#allocation2 + $0x9b0] sm:$0xff] }
 0x1d7   :  { %v6182_v11 = vcombine.high %v575_v60, %v579_v61  ;;  %v6181_v47 = vcombine.low %v575_v60, %v579_v61  ;;  %v6236_v41 = vcombine.high %v630_v34, %v634_v35  ;;  %v638_v60 = vld [vmem:[#allocation2 + $0x9d0] sm:$0xff] }
 0x1d8   :  { %2986 = vmatpush1.bf16.msra.mxu0 %v6115_v12  ;;  %3115 = vmatpush1.bf16.msra.mxu1 %v6117_v15  ;;  %v582_v12 = vld [vmem:[#allocation2 + $0x810] sm:$0xff] }
 0x1d9   :  { %2987 = vmatprep.subr.bf16.mxu0 %v6124_v44  ;;  %3116 = vmatprep.subr.bf16.mxu1 %v6126_v45  ;;  %v586_v15 = vld [vmem:[#allocation2 + $0x830] sm:$0xff]  ;;  %v583_v44 = vld [vmem:[#allocation2 + $0x818] sm:$0xff] }
 0x1da   :  { %v587_v45 = vld [vmem:[#allocation2 + $0x838] sm:$0xff]  ;;  %v6188_v48 = vcombine.high %v582_v12, %v586_v15  ;;  %v6187_v56 = vcombine.low %v582_v12, %v586_v15  ;;  %v642_v61 = vld [vmem:[#allocation2 + $0x9f0] sm:$0xff] }
 0x1db   :  { %v6190_v50 = vcombine.high %v583_v44, %v587_v45  ;;  %v6189_v57 = vcombine.low %v583_v44, %v587_v45  ;;  %v6244_v12 = vcombine.high %v638_v60, %v642_v61  ;;  %v646_v44 = vld [vmem:[#allocation2 + $0xa10] sm:$0xff] }
 0x1dc   :  { %2988 = vmatpush1.bf16.msra.mxu0 %v6123_v51  ;;  %3117 = vmatpush1.bf16.msra.mxu1 %v6125_v53  ;;  %v590_v51 = vld [vmem:[#allocation2 + $0x850] sm:$0xff] }
 0x1dd   :  { %2989 = vmatprep.subr.bf16.mxu0 %v6132_v54  ;;  %3118 = vmatprep.subr.bf16.mxu1 %v6134_v55  ;;  %v594_v53 = vld [vmem:[#allocation2 + $0x870] sm:$0xff]  ;;  %v591_v54 = vld [vmem:[#allocation2 + $0x858] sm:$0xff] }
 0x1de   :  { %v595_v55 = vld [vmem:[#allocation2 + $0x878] sm:$0xff]  ;;  %v6196_v58 = vcombine.high %v590_v51, %v594_v53  ;;  %v6195_v26 = vcombine.low %v590_v51, %v594_v53  ;;  %v650_v45 = vld [vmem:[#allocation2 + $0xa30] sm:$0xff] }
 0x1df   :  { %v6198_v0 = vcombine.high %v591_v54, %v595_v55  ;;  %v6197_v10 = vcombine.low %v591_v54, %v595_v55  ;;  %v6252_v51 = vcombine.high %v646_v44, %v650_v45  ;;  %v654_v54 = vld [vmem:[#allocation2 + $0xa50] sm:$0xff] }
 0x1e0   :  { %2990 = vmatpush1.bf16.msra.mxu0 %v6131_v1  ;;  %3119 = vmatpush1.bf16.msra.mxu1 %v6133_v2  ;;  %v598_v1 = vld [vmem:[#allocation2 + $0x890] sm:$0xff] }
 0x1e1   :  { %2991 = vmatprep.subr.bf16.mxu0 %v6140_v3  ;;  %3120 = vmatprep.subr.bf16.mxu1 %v6142_v4  ;;  %v602_v2 = vld [vmem:[#allocation2 + $0x8b0] sm:$0xff]  ;;  %v599_v3 = vld [vmem:[#allocation2 + $0x898] sm:$0xff] }
 0x1e2   :  { %v603_v4 = vld [vmem:[#allocation2 + $0x8b8] sm:$0xff]  ;;  %v6204_v5 = vcombine.high %v598_v1, %v602_v2  ;;  %v6203_v28 = vcombine.low %v598_v1, %v602_v2  ;;  %v658_v55 = vld [vmem:[#allocation2 + $0xa70] sm:$0xff] }
 0x1e3   :  { %v6206_v6 = vcombine.high %v599_v3, %v603_v4  ;;  %v6260_v1 = vcombine.high %v654_v54, %v658_v55 }
 0x1e4   :  { %2992 = vmatpush1.bf16.msra.mxu0 %v6139_v7  ;;  %3121 = vmatpush1.bf16.msra.mxu1 %v6141_v8  ;;  %v606_v7 = vld [vmem:[#allocation2 + $0x8d0] sm:$0xff] }
 0x1e5   :  { %2993 = vmatprep.subr.bf16.mxu0 %v6148_v9  ;;  %3122 = vmatprep.subr.bf16.mxu1 %v6150_v63  ;;  %v610_v8 = vld [vmem:[#allocation2 + $0x8f0] sm:$0xff]  ;;  %v607_v9 = vld [vmem:[#allocation2 + $0x8d8] sm:$0xff] }
 0x1e6   :  { %v611_v63 = vld [vmem:[#allocation2 + $0x8f8] sm:$0xff]  ;;  %v6212_v30 = vcombine.high %v606_v7, %v610_v8 }
 0x1e7   :  { %v6214_v31 = vcombine.high %v607_v9, %v611_v63  ;;  %v6213_v18 = vcombine.low %v607_v9, %v611_v63  ;;  %v670_v9 = vld [vmem:[#allocation2 + $0xad0] sm:$0xff] }
 0x1e8   :  { %2994 = vmatpush1.bf16.msra.mxu0 %v6147_v13  ;;  %3123 = vmatpush1.bf16.msra.mxu1 %v6149_v14  ;;  %v618_v13 = vld [vmem:[#allocation2 + $0x930] sm:$0xff]  ;;  %v615_v14 = vld [vmem:[#allocation2 + $0x918] sm:$0xff] }
 0x1e9   :  { %2995 = vmatprep.subr.bf16.mxu0 %v6156_v16  ;;  %3124 = vmatprep.subr.bf16.mxu1 %v6158_v17  ;;  %v619_v16 = vld [vmem:[#allocation2 + $0x938] sm:$0xff]  ;;  %v6211_v17 = vcombine.low %v606_v7, %v610_v8  ;;  %v6220_v19 = vcombine.high %v614_v49, %v618_v13  ;;  %v674_v63 = vld [vmem:[#allocation2 + $0xaf0] sm:$0xff] }
 0x1ec   :  { %2996 = vmatpush1.bf16.msra.mxu0 %v6155_v23  ;;  %3125 = vmatpush1.bf16.msra.mxu1 %v6157_v24  ;;  %v623_v23 = vld [vmem:[#allocation2 + $0x958] sm:$0xff] }
 0x1ed   :  { %2997 = vmatprep.subr.bf16.mxu0 %v6164_v25  ;;  %3126 = vmatprep.subr.bf16.mxu1 %v6166_v27  ;;  %v627_v24 = vld [vmem:[#allocation2 + $0x978] sm:$0xff]  ;;  %v6219_v25 = vcombine.low %v614_v49, %v618_v13  ;;  %v6221_v27 = vcombine.low %v615_v14, %v619_v16  ;;  %v6276_v49 = vcombine.high %v670_v9, %v674_v63 }
 0x1ee   :  { %v6230_v33 = vcombine.high %v623_v23, %v627_v24 }
 0x1f0   :  { %2998 = vmatpush1.bf16.msra.mxu0 %v6163_v36  ;;  %3127 = vmatpush1.bf16.msra.mxu1 %v6165_v37  ;;  %v631_v36 = vld [vmem:[#allocation2 + $0x998] sm:$0xff] }
 0x1f1   :  { %2999 = vmatprep.subr.bf16.mxu0 %v6172_v38  ;;  %3128 = vmatprep.subr.bf16.mxu1 %v6174_v39  ;;  %v635_v37 = vld [vmem:[#allocation2 + $0x9b8] sm:$0xff]  ;;  %v6227_v38 = vcombine.low %v622_v21, %v626_v22  ;;  %v6229_v39 = vcombine.low %v623_v23, %v627_v24  ;;  %v686_v23 = vld [vmem:[#allocation2 + $0xb50] sm:$0xff] }
 0x1f2   :  { %v6238_v59 = vcombine.high %v631_v36, %v635_v37  ;;  %v690_v24 = vld [vmem:[#allocation2 + $0xb70] sm:$0xff] }
 0x1f4   :  { %3000 = vmatpush1.bf16.msra.mxu0 %v6171_v62  ;;  %3129 = vmatpush1.bf16.msra.mxu1 %v6173_v42  ;;  %v639_v62 = vld [vmem:[#allocation2 + $0x9d8] sm:$0xff] }
 0x1f5   :  { %3001 = vmatprep.subr.bf16.mxu0 %v6180_v43  ;;  %3130 = vmatprep.subr.bf16.mxu1 %v6182_v11  ;;  %v643_v42 = vld [vmem:[#allocation2 + $0x9f8] sm:$0xff]  ;;  %v6235_v43 = vcombine.low %v630_v34, %v634_v35  ;;  %v6237_v11 = vcombine.low %v631_v36, %v635_v37  ;;  %v6292_v34 = vcombine.high %v686_v23, %v690_v24  ;;  %v694_v36 = vld [vmem:[#allocation2 + $0xb90] sm:$0xff] }
 0x1f6   :  { %v6246_v15 = vcombine.high %v639_v62, %v643_v42  ;;  %v698_v37 = vld [vmem:[#allocation2 + $0xbb0] sm:$0xff] }
 0x1f8   :  { %3002 = vmatpush1.bf16.msra.mxu0 %v6179_v46  ;;  %3131 = vmatpush1.bf16.msra.mxu1 %v6181_v47  ;;  %v647_v46 = vld [vmem:[#allocation2 + $0xa18] sm:$0xff] }
 0x1f9   :  { %3014 = vmatprep.subr.bf16.mxu0 %v6188_v48  ;;  %3143 = vmatprep.subr.bf16.mxu1 %v6190_v50  ;;  %v651_v47 = vld [vmem:[#allocation2 + $0xa38] sm:$0xff]  ;;  %v6243_v48 = vcombine.low %v638_v60, %v642_v61  ;;  %v6245_v50 = vcombine.low %v639_v62, %v643_v42  ;;  %v6300_v60 = vcombine.high %v694_v36, %v698_v37  ;;  %v702_v62 = vld [vmem:[#allocation2 + $0xbd0] sm:$0xff] }
 0x1fa   :  { %v6254_v53 = vcombine.high %v647_v46, %v651_v47  ;;  %v706_v42 = vld [vmem:[#allocation2 + $0xbf0] sm:$0xff] }
 0x1fb   :  { %3004 = vmatmul.mubr.bf16.vlgmr.msra.gmra.mrb[4].mxu0 %v7908_v29  ;;  %3133 = vmatmul.mubr.bf16.vlgmr.msra.gmra.mrb[4].mxu1 %v7908_v29  ;;  %v6205_v29 = vcombine.low %v599_v3, %v603_v4  ;;  %v662_v3 = vld [vmem:[#allocation2 + $0xa90] sm:$0xff] }
 0x1fc   :  { %3015 = vmatpush1.bf16.msra.mxu0 %v6187_v56  ;;  %3144 = vmatpush1.bf16.msra.mxu1 %v6189_v57  ;;  %v655_v56 = vld [vmem:[#allocation2 + $0xa58] sm:$0xff]  ;;  %v666_v4 = vld [vmem:[#allocation2 + $0xab0] sm:$0xff] }
 0x1fd   :  { %3016 = vmatprep.subr.bf16.mxu0 %v6196_v58  ;;  %3145 = vmatprep.subr.bf16.mxu1 %v6198_v0  ;;  %v659_v57 = vld [vmem:[#allocation2 + $0xa78] sm:$0xff]  ;;  %v6251_v58 = vcombine.low %v646_v44, %v650_v45  ;;  %v6253_v0 = vcombine.low %v647_v46, %v651_v47  ;;  %v6268_v7 = vcombine.high %v662_v3, %v666_v4 }
 0x1fe   :  { %3046 = vmatprep.mubr.bf16.mxu0 %v7910_v20  ;;  %3175 = vmatprep.mubr.bf16.mxu1 %v7910_v20  ;;  %v6222_v20 = vcombine.high %v615_v14, %v619_v16  ;;  %v6262_v2 = vcombine.high %v655_v56, %v659_v57  ;;  %v678_v14 = vld [vmem:[#allocation2 + $0xb10] sm:$0xff]  ;;  %v6308_v44 = vcombine.high %v702_v62, %v706_v42 }
 0x1ff   :  { %v682_v16 = vld [vmem:[#allocation2 + $0xb30] sm:$0xff]  ;;  %v6307_v46 = vcombine.low %v702_v62, %v706_v42 }
 0x200   :  { %3017 = vmatpush1.bf16.msra.mxu0 %v6195_v26  ;;  %3146 = vmatpush1.bf16.msra.mxu1 %v6197_v10  ;;  %v663_v26 = vld [vmem:[#allocation2 + $0xa98] sm:$0xff]  ;;  %v6284_v21 = vcombine.high %v678_v14, %v682_v16  ;;  %v6882_v62 = vld [vmem:[#allocation7 + $0xec] ss:$16 sps:$4 sm:$0xff]  }
 0x201   :  { %3018 = vmatprep.subr.bf16.mxu0 %v6204_v5  ;;  %3147 = vmatprep.subr.bf16.mxu1 %v6206_v6  ;;  %v667_v10 = vld [vmem:[#allocation2 + $0xab8] sm:$0xff]  ;;  %v6259_v5 = vcombine.low %v654_v54, %v658_v55  ;;  %v6261_v6 = vcombine.low %v655_v56, %v659_v57  ;;  %v6846_v55 = vld [vmem:[#allocation7 + $0x2c] ss:$16 sps:$4 sm:$0xff]   ;;  %v6844_v57 = vld [vmem:[#allocation7 + $0x28] ss:$16 sps:$4 sm:$0xff]  }
 0x202   :  { %v6270_v8 = vcombine.high %v663_v26, %v667_v10  ;;  %v6843_v54 = vld [vmem:[#allocation7 + $0x24] ss:$16 sps:$4 sm:$0xff]   ;;  %v6841_v56 = vld [vmem:[#allocation7 + $0x20] ss:$16 sps:$4 sm:$0xff]  }
 0x204   :  { %3019 = vmatpush1.bf16.msra.mxu0 %v6203_v28  ;;  %3148 = vmatpush1.bf16.msra.mxu1 %v6205_v29  ;;  %v671_v28 = vld [vmem:[#allocation2 + $0xad8] sm:$0xff] }
 0x205   :  { %3020 = vmatprep.subr.bf16.mxu0 %v6212_v30  ;;  %3149 = vmatprep.subr.bf16.mxu1 %v6214_v31  ;;  %v675_v29 = vld [vmem:[#allocation2 + $0xaf8] sm:$0xff]  ;;  %v6267_v30 = vcombine.low %v662_v3, %v666_v4  ;;  %v6269_v31 = vcombine.low %v663_v26, %v667_v10  ;;  %v6858_v4 = vld [vmem:[#allocation7 + $0x6c] ss:$16 sps:$4 sm:$0xff]  }
 0x206   :  { %v6278_v13 = vcombine.high %v671_v28, %v675_v29  ;;  %v6855_v3 = vld [vmem:[#allocation7 + $0x64] ss:$16 sps:$4 sm:$0xff]   ;;  %v6853_v26 = vld [vmem:[#allocation7 + $0x60] ss:$16 sps:$4 sm:$0xff]  }
 0x207   :  { %v6861_v10 = vld [vmem:[#allocation7 + $0x84] ss:$16 sps:$4 sm:$0xff]  }
 0x208   :  { %3021 = vmatpush1.bf16.msra.mxu0 %v6211_v17  ;;  %3150 = vmatpush1.bf16.msra.mxu1 %v6213_v18  ;;  %v679_v17 = vld [vmem:[#allocation2 + $0xb18] sm:$0xff] }
 0x209   :  { %3022 = vmatprep.subr.bf16.mxu0 %v6220_v19  ;;  %3151 = vmatprep.subr.bf16.mxu1 %v6222_v20  ;;  %v683_v18 = vld [vmem:[#allocation2 + $0xb38] sm:$0xff]  ;;  %v6275_v19 = vcombine.low %v670_v9, %v674_v63  ;;  %v6277_v20 = vcombine.low %v671_v28, %v675_v29  ;;  %v720_v9 = vsub.s32 2, %v7799_v52  ;;  %v7943_v63 = vsub.s32 1, %v7799_v52  ;;  %v6862_v28 = vld [vmem:[#allocation7 + $0x88] ss:$16 sps:$4 sm:$0xff]  }
 0x20a   :  { %v6286_v22 = vcombine.high %v679_v17, %v683_v18  ;;  %v724_v29 = vsub.s32 3, %v7799_v52 }
 0x20c   :  { %3023 = vmatpush1.bf16.msra.mxu0 %v6219_v25  ;;  %3152 = vmatpush1.bf16.msra.mxu1 %v6221_v27  ;;  %v687_v25 = vld [vmem:[#allocation2 + $0xb58] sm:$0xff] }
 0x20d   :  { %3024 = vmatprep.subr.bf16.mxu0 %v6228_v32  ;;  %3153 = vmatprep.subr.bf16.mxu1 %v6230_v33  ;;  %v691_v27 = vld [vmem:[#allocation2 + $0xb78] sm:$0xff]  ;;  %v6283_v32 = vcombine.low %v678_v14, %v682_v16  ;;  %v6285_v33 = vcombine.low %v679_v17, %v683_v18  ;;  %v6868_v18 = vld [vmem:[#allocation7 + $0xa8] ss:$16 sps:$4 sm:$0xff]  }
 0x20e   :  { %v6294_v35 = vcombine.high %v687_v25, %v691_v27  ;;  %v6865_v16 = vld [vmem:[#allocation7 + $0xa0] ss:$16 sps:$4 sm:$0xff]  }
 0x210   :  { %3025 = vmatpush1.bf16.msra.mxu0 %v6227_v38  ;;  %3154 = vmatpush1.bf16.msra.mxu1 %v6229_v39  ;;  %v695_v38 = vld [vmem:[#allocation2 + $0xb98] sm:$0xff] }
 0x211   :  { %3026 = vmatprep.subr.bf16.mxu0 %v6236_v41  ;;  %3155 = vmatprep.subr.bf16.mxu1 %v6238_v59  ;;  %v699_v39 = vld [vmem:[#allocation2 + $0xbb8] sm:$0xff]  ;;  %v6291_v41 = vcombine.low %v686_v23, %v690_v24  ;;  %v6293_v59 = vcombine.low %v687_v25, %v691_v27 }
 0x212   :  { %v6302_v61 = vcombine.high %v695_v38, %v699_v39 }
 0x214   :  { %3027 = vmatpush1.bf16.msra.mxu0 %v6235_v43  ;;  %3156 = vmatpush1.bf16.msra.mxu1 %v6237_v11  ;;  %v703_v43 = vld [vmem:[#allocation2 + $0xbd8] sm:$0xff] }
 0x215   :  { %3028 = vmatprep.subr.bf16.mxu0 %v6244_v12  ;;  %3157 = vmatprep.subr.bf16.mxu1 %v6246_v15  ;;  %v707_v11 = vld [vmem:[#allocation2 + $0xbf8] sm:$0xff]  ;;  %v6299_v12 = vcombine.low %v694_v36, %v698_v37  ;;  %v6301_v15 = vcombine.low %v695_v38, %v699_v39  ;;  %v6874_v39 = vld [vmem:[#allocation7 + $0xc8] ss:$16 sps:$4 sm:$0xff]  }
 0x216   :  { %v6310_v45 = vcombine.high %v703_v43, %v707_v11  ;;  %v6309_v47 = vcombine.low %v703_v43, %v707_v11 }
 0x218   :  { %3029 = vmatpush1.bf16.msra.mxu0 %v6243_v48  ;;  %3158 = vmatpush1.bf16.msra.mxu1 %v6245_v50  ;;  %v6837_v48 = vld [vmem:[#allocation7 + $0x4] ss:$16 sps:$4 sm:$0xff]   ;;  %v6840_v50 = vld [vmem:[#allocation7 + $0xc] ss:$16 sps:$4 sm:$0xff]  }
 0x219   :  { %3030 = vmatprep.subr.bf16.mxu0 %v6252_v51  ;;  %3159 = vmatprep.subr.bf16.mxu1 %v6254_v53  ;;  %v6835_v51 = vld [vmem:[#allocation7] ss:$16 sps:$4 sm:$0xff]   ;;  %v6838_v53 = vld [vmem:[#allocation7 + $0x8] ss:$16 sps:$4 sm:$0xff]  }
 0x21c   :  { %3031 = vmatpush1.bf16.msra.mxu0 %v6251_v58  ;;  %3160 = vmatpush1.bf16.msra.mxu1 %v6253_v0  ;;  %v6849_v58 = vld [vmem:[#allocation7 + $0x44] ss:$16 sps:$4 sm:$0xff]   ;;  %v6852_v0 = vld [vmem:[#allocation7 + $0x4c] ss:$16 sps:$4 sm:$0xff]  }
 0x21d   :  { %3032 = vmatprep.subr.bf16.mxu0 %v6260_v1  ;;  %3161 = vmatprep.subr.bf16.mxu1 %v6262_v2  ;;  %v6847_v1 = vld [vmem:[#allocation7 + $0x40] ss:$16 sps:$4 sm:$0xff]   ;;  %v6850_v2 = vld [vmem:[#allocation7 + $0x48] ss:$16 sps:$4 sm:$0xff]  }
 0x220   :  { %3033 = vmatpush1.bf16.msra.mxu0 %v6259_v5  ;;  %3162 = vmatpush1.bf16.msra.mxu1 %v6261_v6  ;;  %v6864_v5 = vld [vmem:[#allocation7 + $0x8c] ss:$16 sps:$4 sm:$0xff]   ;;  %v7937_v6 = vsub.s32 0, %v7799_v52 }
 0x221   :  { %3034 = vmatprep.subr.bf16.mxu0 %v6268_v7  ;;  %3163 = vmatprep.subr.bf16.mxu1 %v6270_v8  ;;  %v6859_v7 = vld [vmem:[#allocation7 + $0x80] ss:$16 sps:$4 sm:$0xff]   ;;  %v7939_v8 = vld [vmem:[#allocation5] sm:$0xff] }
 0x222   :  { %v717_v14 = vrot.slane %v7939_v8, %v7943_v63  ;;  %v725_v17 = vrot.slane %v7939_v8, %v724_v29 }
 0x224   :  { %3035 = vmatpush1.bf16.msra.mxu0 %v6267_v30  ;;  %3164 = vmatpush1.bf16.msra.mxu1 %v6269_v31  ;;  %v6867_v30 = vld [vmem:[#allocation7 + $0xa4] ss:$16 sps:$4 sm:$0xff]   ;;  %v6870_v31 = vld [vmem:[#allocation7 + $0xac] ss:$16 sps:$4 sm:$0xff]  }
 0x225   :  { %3036 = vmatprep.subr.bf16.mxu0 %v6276_v49  ;;  %3165 = vmatprep.subr.bf16.mxu1 %v6278_v13  ;;  %v713_v49 = vrot.slane %v7939_v8, %v7937_v6  ;;  %v721_v13 = vrot.slane %v7939_v8, %v720_v9 }
 0x228   :  { %3037 = vmatpush1.bf16.msra.mxu0 %v6275_v19  ;;  %3166 = vmatpush1.bf16.msra.mxu1 %v6277_v20  ;;  %v6873_v19 = vld [vmem:[#allocation7 + $0xc4] ss:$16 sps:$4 sm:$0xff]  }
 0x229   :  { %3038 = vmatprep.subr.bf16.mxu0 %v6284_v21  ;;  %3167 = vmatprep.subr.bf16.mxu1 %v6286_v22  ;;  %v6876_v21 = vld [vmem:[#allocation7 + $0xcc] ss:$16 sps:$4 sm:$0xff]  }
 0x22c   :  { %3039 = vmatpush1.bf16.msra.mxu0 %v6283_v32  ;;  %3168 = vmatpush1.bf16.msra.mxu1 %v6285_v33 }
 0x22d   :  { %3040 = vmatprep.subr.bf16.mxu0 %v6292_v34  ;;  %3169 = vmatprep.subr.bf16.mxu1 %v6294_v35  ;;  %v6871_v34 = vld [vmem:[#allocation7 + $0xc0] ss:$16 sps:$4 sm:$0xff]  }
 0x230   :  { %3041 = vmatpush1.bf16.msra.mxu0 %v6291_v41  ;;  %3170 = vmatpush1.bf16.msra.mxu1 %v6293_v59  ;;  %v6879_v41 = vld [vmem:[#allocation7 + $0xe4] ss:$16 sps:$4 sm:$0xff]  }
 0x231   :  { %3042 = vmatprep.subr.bf16.mxu0 %v6300_v60  ;;  %3171 = vmatprep.subr.bf16.mxu1 %v6302_v61 }
 0x234   :  { %3043 = vmatpush1.bf16.msra.mxu0 %v6299_v12  ;;  %3172 = vmatpush1.bf16.msra.mxu1 %v6301_v15 }
 0x235   :  { %3044 = vmatprep.subr.bf16.mxu0 %v6308_v44  ;;  %3173 = vmatprep.subr.bf16.mxu1 %v6310_v45 }
 0x238   :  { %3045 = vmatpush1.bf16.msra.mxu0 %v6307_v46  ;;  %3174 = vmatpush1.bf16.msra.mxu1 %v6309_v47  ;;  %v6877_v46 = vld [vmem:[#allocation7 + $0xe0] ss:$16 sps:$4 sm:$0xff]  }
 0x239   :  { %4768 = vmatprep.subr.bf16.mxu0 %v6837_v48  ;;  %4940 = vmatprep.subr.bf16.mxu1 %v6840_v50 }
 0x23b   :  { %3047 = vmatmul.mubr.bf16.vlgmr.msra.gmra.mrb[4].mxu0 %v7920_v40  ;;  %3176 = vmatmul.mubr.bf16.vlgmr.msra.gmra.mrb[4].mxu1 %v7920_v40  ;;  %v6856_v40 = vld [vmem:[#allocation7 + $0x68] ss:$16 sps:$4 sm:$0xff]  }
 0x23c   :  { %4769 = vmatpush1.bf16.msra.mxu0 %v6835_v51  ;;  %4941 = vmatpush1.bf16.msra.mxu1 %v6838_v53  ;;  %v6880_v51 = vld [vmem:[#allocation7 + $0xe8] ss:$16 sps:$4 sm:$0xff]  }
 0x23d   :  { %4770 = vmatprep.subr.bf16.mxu0 %v6843_v54  ;;  %4942 = vmatprep.subr.bf16.mxu1 %v6846_v55  ;;  %v6885_v55 = vld [vmem:[#allocation7 + $0x104] ss:$16 sps:$4 sm:$0xff]  }
 0x240   :  { %4771 = vmatpush1.bf16.msra.mxu0 %v6841_v56  ;;  %4943 = vmatpush1.bf16.msra.mxu1 %v6844_v57  ;;  %v6888_v56 = vld [vmem:[#allocation7 + $0x10c] ss:$16 sps:$4 sm:$0xff]  }
 0x241   :  { %4772 = vmatprep.subr.bf16.mxu0 %v6849_v58  ;;  %4944 = vmatprep.subr.bf16.mxu1 %v6852_v0  ;;  %v6883_v58 = vld [vmem:[#allocation7 + $0x100] ss:$16 sps:$4 sm:$0xff]   ;;  %v6886_v0 = vld [vmem:[#allocation7 + $0x108] ss:$16 sps:$4 sm:$0xff]  }
 0x244   :  { %4773 = vmatpush1.bf16.msra.mxu0 %v6847_v1  ;;  %4945 = vmatpush1.bf16.msra.mxu1 %v6850_v2  ;;  %v6891_v1 = vld [vmem:[#allocation7 + $0x124] ss:$16 sps:$4 sm:$0xff]   ;;  %v6894_v2 = vld [vmem:[#allocation7 + $0x12c] ss:$16 sps:$4 sm:$0xff]  }
 0x245   :  { %4774 = vmatprep.subr.bf16.mxu0 %v6855_v3  ;;  %4946 = vmatprep.subr.bf16.mxu1 %v6858_v4  ;;  %v6889_v3 = vld [vmem:[#allocation7 + $0x120] ss:$16 sps:$4 sm:$0xff]   ;;  %v6892_v4 = vld [vmem:[#allocation7 + $0x128] ss:$16 sps:$4 sm:$0xff]  }
 0x248   :  { %4775 = vmatpush1.bf16.msra.mxu0 %v6853_v26  ;;  %4947 = vmatpush1.bf16.msra.mxu1 %v6856_v40  ;;  %v6897_v26 = vld [vmem:[#allocation7 + $0x144] ss:$16 sps:$4 sm:$0xff]   ;;  %v6900_v40 = vld [vmem:[#allocation7 + $0x14c] ss:$16 sps:$4 sm:$0xff]  }
 0x249   :  { %4776 = vmatprep.subr.bf16.mxu0 %v6861_v10  ;;  %4948 = vmatprep.subr.bf16.mxu1 %v6864_v5  ;;  %v6895_v10 = vld [vmem:[#allocation7 + $0x140] ss:$16 sps:$4 sm:$0xff]   ;;  %v6898_v5 = vld [vmem:[#allocation7 + $0x148] ss:$16 sps:$4 sm:$0xff]  }
 0x24c   :  { %4777 = vmatpush1.bf16.msra.mxu0 %v6859_v7  ;;  %4949 = vmatpush1.bf16.msra.mxu1 %v6862_v28  ;;  %v6903_v7 = vld [vmem:[#allocation7 + $0x164] ss:$16 sps:$4 sm:$0xff]   ;;  %v6906_v28 = vld [vmem:[#allocation7 + $0x16c] ss:$16 sps:$4 sm:$0xff]  }
 0x24d   :  { %4778 = vmatprep.subr.bf16.mxu0 %v6867_v30  ;;  %4950 = vmatprep.subr.bf16.mxu1 %v6870_v31  ;;  %v6901_v30 = vld [vmem:[#allocation7 + $0x160] ss:$16 sps:$4 sm:$0xff]   ;;  %v6904_v31 = vld [vmem:[#allocation7 + $0x168] ss:$16 sps:$4 sm:$0xff]  }
 0x24e   :  { %v2790_v20 = vpop.f32.mrb[0].mxu0  ;;  %v2919_v23 = vpop.f32.mrb[0].mxu1 }
 0x24f   :  { %v6708_v22 = vadd.f32 %v2790_v20, %v713_v49  ;;  %v2792_v24 = vpop.f32.mrb[1].mxu0  ;;  %v6712_v25 = vadd.f32 %v2919_v23, %v721_v13  ;;  %v2921_v32 = vpop.f32.mrb[1].mxu1  ;;  %v6916_v20 = vld [vmem:[#allocation7 + $0x1a8] ss:$16 sps:$4 sm:$0xff]   ;;  %v6919_v23 = vld [vmem:[#allocation7 + $0x1c0] ss:$16 sps:$4 sm:$0xff]  }
 0x250   :  { %v6709_v27 = vadd.f32 %v2792_v24, %v717_v14  ;;  %v2794_v33 = vpop.f32.mrb[2].mxu0  ;;  %4779 = vmatpush1.bf16.msra.mxu0 %v6865_v16  ;;  %v6713_v35 = vadd.f32 %v2921_v32, %v725_v17  ;;  %v2923_v37 = vpop.f32.mrb[2].mxu1  ;;  %4951 = vmatpush1.bf16.msra.mxu1 %v6868_v18  ;;  %v6910_v16 = vld [vmem:[#allocation7 + $0x188] ss:$16 sps:$4 sm:$0xff]   ;;  %v6918_v18 = vld [vmem:[#allocation7 + $0x1ac] ss:$16 sps:$4 sm:$0xff]  }
 0x251   :  { %v6710_v36 = vadd.f32 %v2794_v33, %v713_v49  ;;  %v2796_v38 = vpop.f32.mrb[3].mxu0  ;;  %4780 = vmatprep.subr.bf16.mxu0 %v6873_v19  ;;  %v6714_v59 = vadd.f32 %v2923_v37, %v721_v13  ;;  %v2925_v61 = vpop.f32.mrb[3].mxu1  ;;  %4952 = vmatprep.subr.bf16.mxu1 %v6876_v21  ;;  %v3186_v42 = vmax.f32 %v6708_v22, 0.0  ;;  %v3188_v12 = vmax.f32 %v6712_v25, 0.0  ;;  %v6909_v49 = vld [vmem:[#allocation7 + $0x184] ss:$16 sps:$4 sm:$0xff]  }
 0x252   :  { %v6711_v60 = vadd.f32 %v2796_v38, %v717_v14  ;;  %v6715_v11 = vadd.f32 %v2925_v61, %v725_v17  ;;  %v3187_v15 = vmax.f32 %v6709_v27, 0.0  ;;  %v3189_v47 = vmax.f32 %v6713_v35, 0.0  ;;  %v6912_v13 = vld [vmem:[#allocation7 + $0x18c] ss:$16 sps:$4 sm:$0xff]   ;;  %v6907_v14 = vld [vmem:[#allocation7 + $0x180] ss:$16 sps:$4 sm:$0xff]  }
 0x253   :  { %v3194_v43 = vmax.f32 %v6710_v36, 0.0  ;;  %v3196_v44 = vmax.f32 %v6714_v59, 0.0  ;;  %v6915_v17 = vld [vmem:[#allocation7 + $0x1a4] ss:$16 sps:$4 sm:$0xff]   ;;  %v6913_v19 = vld [vmem:[#allocation7 + $0x1a0] ss:$16 sps:$4 sm:$0xff]  }
 0x254   :  { %v3195_v45 = vmax.f32 %v6711_v60, 0.0  ;;  %4781 = vmatpush1.bf16.msra.mxu0 %v6871_v34  ;;  %v3197_v50 = vmax.f32 %v6715_v11, 0.0  ;;  %4953 = vmatpush1.bf16.msra.mxu1 %v6874_v39  ;;  %v6921_v21 = vld [vmem:[#allocation7 + $0x1c4] ss:$16 sps:$4 sm:$0xff]   ;;  %v6924_v22 = vld [vmem:[#allocation7 + $0x1cc] ss:$16 sps:$4 sm:$0xff]  }
 0x255   :  { %v7956_v48 = vpack.c.bf16 %v3194_v43, %v3186_v42  ;;  %4782 = vmatprep.subr.bf16.mxu0 %v6879_v41  ;;  %v7958_v53 = vpack.c.bf16 %v3196_v44, %v3188_v12  ;;  %4954 = vmatprep.subr.bf16.mxu1 %v6882_v62  ;;  %v6922_v24 = vld [vmem:[#allocation7 + $0x1c8] ss:$16 sps:$4 sm:$0xff]   ;;  %v6927_v25 = vld [vmem:[#allocation7 + $0x1e4] ss:$16 sps:$4 sm:$0xff]   ;;  %v6930_v27 = vld [vmem:[#allocation7 + $0x1ec] ss:$16 sps:$4 sm:$0xff]  }
 0x256   :  { %v3203_v54 = vpack.c.bf16 %v3195_v45, %v3187_v15  ;;  %v7960_v57 = vpack.c.bf16 %v3197_v50, %v3189_v47  ;;  %v6925_v32 = vld [vmem:[#allocation7 + $0x1e0] ss:$16 sps:$4 sm:$0xff]   ;;  %v6928_v33 = vld [vmem:[#allocation7 + $0x1e8] ss:$16 sps:$4 sm:$0xff]   ;;  %v6933_v34 = vld [vmem:[#allocation7 + $0x204] ss:$16 sps:$4 sm:$0xff]  }
 0x257   :  { %v6936_v35 = vld [vmem:[#allocation7 + $0x20c] ss:$16 sps:$4 sm:$0xff]   ;;  %v6931_v36 = vld [vmem:[#allocation7 + $0x200] ss:$16 sps:$4 sm:$0xff]   ;;  %v6934_v37 = vld [vmem:[#allocation7 + $0x208] ss:$16 sps:$4 sm:$0xff]  }
 0x258   :  { %4783 = vmatpush1.bf16.msra.mxu0 %v6877_v46  ;;  %4800 = vmatprep.mubr.bf16.mxu0 %v3203_v54  ;;  %v6939_v38 = vld [vmem:[#allocation7 + $0x224] ss:$16 sps:$4 sm:$0xff]   ;;  %v6942_v39 = vld [vmem:[#allocation7 + $0x22c] ss:$16 sps:$4 sm:$0xff]   ;;  %v6937_v41 = vld [vmem:[#allocation7 + $0x220] ss:$16 sps:$4 sm:$0xff]  }
 0x259   :  { %4955 = vmatpush1.bf16.msra.mxu1 %v6880_v51  ;;  %4972 = vmatprep.mubr.bf16.mxu1 %v3203_v54  ;;  %v6940_v59 = vld [vmem:[#allocation7 + $0x228] ss:$16 sps:$4 sm:$0xff]   ;;  %v6945_v60 = vld [vmem:[#allocation7 + $0x244] ss:$16 sps:$4 sm:$0xff]   ;;  %v6948_v61 = vld [vmem:[#allocation7 + $0x24c] ss:$16 sps:$4 sm:$0xff]  }
 0x25a   :  { %4784 = vmatprep.subr.bf16.mxu0 %v6885_v55  ;;  %4956 = vmatprep.subr.bf16.mxu1 %v6888_v56  ;;  %v6943_v62 = vld [vmem:[#allocation7 + $0x240] ss:$16 sps:$4 sm:$0xff]   ;;  %v6946_v42 = vld [vmem:[#allocation7 + $0x248] ss:$16 sps:$4 sm:$0xff]   ;;  %v6951_v43 = vld [vmem:[#allocation7 + $0x264] ss:$16 sps:$4 sm:$0xff]  }
 0x25b   :  { %v6954_v11 = vld [vmem:[#allocation7 + $0x26c] ss:$16 sps:$4 sm:$0xff]   ;;  %v6949_v12 = vld [vmem:[#allocation7 + $0x260] ss:$16 sps:$4 sm:$0xff]   ;;  %v6952_v15 = vld [vmem:[#allocation7 + $0x268] ss:$16 sps:$4 sm:$0xff]  }
 0x25c   :  { %4785 = vmatpush1.bf16.msra.mxu0 %v6883_v58  ;;  %v6957_v44 = vld [vmem:[#allocation7 + $0x284] ss:$16 sps:$4 sm:$0xff]   ;;  %v6960_v45 = vld [vmem:[#allocation7 + $0x28c] ss:$16 sps:$4 sm:$0xff]   ;;  %v6955_v46 = vld [vmem:[#allocation7 + $0x280] ss:$16 sps:$4 sm:$0xff]  }
 0x25d   :  { %4957 = vmatpush1.bf16.msra.mxu1 %v6886_v0  ;;  %4786 = vmatprep.subr.bf16.mxu0 %v6891_v1  ;;  %v6958_v47 = vld [vmem:[#allocation7 + $0x288] ss:$16 sps:$4 sm:$0xff]   ;;  %v6966_v50 = vld [vmem:[#allocation7 + $0x2ac] ss:$16 sps:$4 sm:$0xff]   ;;  %v6961_v51 = vld [vmem:[#allocation7 + $0x2a0] ss:$16 sps:$4 sm:$0xff]  }
 0x25e   :  { %4958 = vmatprep.subr.bf16.mxu1 %v6894_v2  ;;  %v6964_v54 = vld [vmem:[#allocation7 + $0x2a8] ss:$16 sps:$4 sm:$0xff]   ;;  %v6969_v55 = vld [vmem:[#allocation7 + $0x2c4] ss:$16 sps:$4 sm:$0xff]   ;;  %v6972_v56 = vld [vmem:[#allocation7 + $0x2cc] ss:$16 sps:$4 sm:$0xff]  }
 0x25f   :  { %v6970_v58 = vld [vmem:[#allocation7 + $0x2c8] ss:$16 sps:$4 sm:$0xff]   ;;  %v6975_v0 = vld [vmem:[#allocation7 + $0x2e4] ss:$16 sps:$4 sm:$0xff]   ;;  %v6978_v1 = vld [vmem:[#allocation7 + $0x2ec] ss:$16 sps:$4 sm:$0xff]  }
 0x260   :  { %4787 = vmatpush1.bf16.msra.mxu0 %v6889_v3  ;;  %v6973_v2 = vld [vmem:[#allocation7 + $0x2e0] ss:$16 sps:$4 sm:$0xff]   ;;  %v6976_v3 = vld [vmem:[#allocation7 + $0x2e8] ss:$16 sps:$4 sm:$0xff]  }
 0x261   :  { %4959 = vmatpush1.bf16.msra.mxu1 %v6892_v4  ;;  %4788 = vmatprep.subr.bf16.mxu0 %v6897_v26  ;;  %v6981_v4 = vld [vmem:[#allocation7 + $0x304] ss:$16 sps:$4 sm:$0xff]   ;;  %v6984_v26 = vld [vmem:[#allocation7 + $0x30c] ss:$16 sps:$4 sm:$0xff]  }
 0x262   :  { %4960 = vmatprep.subr.bf16.mxu1 %v6900_v40  ;;  %v6979_v40 = vld [vmem:[#allocation7 + $0x300] ss:$16 sps:$4 sm:$0xff]  }
 0x264   :  { %4789 = vmatpush1.bf16.msra.mxu0 %v6895_v10  ;;  %v6982_v10 = vld [vmem:[#allocation7 + $0x308] ss:$16 sps:$4 sm:$0xff]  }
 0x265   :  { %4961 = vmatpush1.bf16.msra.mxu1 %v6898_v5  ;;  %4790 = vmatprep.subr.bf16.mxu0 %v6903_v7  ;;  %v6987_v5 = vld [vmem:[#allocation7 + $0x324] ss:$16 sps:$4 sm:$0xff]   ;;  %v6990_v7 = vld [vmem:[#allocation7 + $0x32c] ss:$16 sps:$4 sm:$0xff]  }
 0x266   :  { %4962 = vmatprep.subr.bf16.mxu1 %v6906_v28  ;;  %v6985_v28 = vld [vmem:[#allocation7 + $0x320] ss:$16 sps:$4 sm:$0xff]  }
 0x268   :  { %4791 = vmatpush1.bf16.msra.mxu0 %v6901_v30  ;;  %v6988_v30 = vld [vmem:[#allocation7 + $0x328] ss:$16 sps:$4 sm:$0xff]  }
 0x269   :  { %4963 = vmatpush1.bf16.msra.mxu1 %v6904_v31  ;;  %4792 = vmatprep.subr.bf16.mxu0 %v6909_v49  ;;  %v6993_v31 = vld [vmem:[#allocation7 + $0x344] ss:$16 sps:$4 sm:$0xff]   ;;  %v6996_v49 = vld [vmem:[#allocation7 + $0x34c] ss:$16 sps:$4 sm:$0xff]  }
 0x26a   :  { %4964 = vmatprep.subr.bf16.mxu1 %v6912_v13  ;;  %v6991_v13 = vld [vmem:[#allocation7 + $0x340] ss:$16 sps:$4 sm:$0xff]  }
 0x26c   :  { %4793 = vmatpush1.bf16.msra.mxu0 %v6907_v14  ;;  %v6994_v14 = vld [vmem:[#allocation7 + $0x348] ss:$16 sps:$4 sm:$0xff]  }
 0x26d   :  { %4965 = vmatpush1.bf16.msra.mxu1 %v6910_v16  ;;  %4794 = vmatprep.subr.bf16.mxu0 %v6915_v17  ;;  %v6999_v16 = vld [vmem:[#allocation7 + $0x364] ss:$16 sps:$4 sm:$0xff]   ;;  %v7002_v17 = vld [vmem:[#allocation7 + $0x36c] ss:$16 sps:$4 sm:$0xff]  }
 0x26e   :  { %4966 = vmatprep.subr.bf16.mxu1 %v6918_v18  ;;  %v6997_v18 = vld [vmem:[#allocation7 + $0x360] ss:$16 sps:$4 sm:$0xff]  }
 0x270   :  { %4795 = vmatpush1.bf16.msra.mxu0 %v6913_v19  ;;  %v7000_v19 = vld [vmem:[#allocation7 + $0x368] ss:$16 sps:$4 sm:$0xff]  }
 0x271   :  { %4967 = vmatpush1.bf16.msra.mxu1 %v6916_v20  ;;  %4796 = vmatprep.subr.bf16.mxu0 %v6921_v21  ;;  %v7005_v20 = vld [vmem:[#allocation7 + $0x384] ss:$16 sps:$4 sm:$0xff]   ;;  %v7008_v21 = vld [vmem:[#allocation7 + $0x38c] ss:$16 sps:$4 sm:$0xff]  }
 0x272   :  { %4968 = vmatprep.subr.bf16.mxu1 %v6924_v22  ;;  %v7003_v22 = vld [vmem:[#allocation7 + $0x380] ss:$16 sps:$4 sm:$0xff]  }
 0x274   :  { %4797 = vmatpush1.bf16.msra.mxu0 %v6919_v23  ;;  %v7006_v23 = vld [vmem:[#allocation7 + $0x388] ss:$16 sps:$4 sm:$0xff]  }
 0x275   :  { %4969 = vmatpush1.bf16.msra.mxu1 %v6922_v24  ;;  %4798 = vmatprep.subr.bf16.mxu0 %v6927_v25  ;;  %v7011_v24 = vld [vmem:[#allocation7 + $0x3a4] ss:$16 sps:$4 sm:$0xff]   ;;  %v7014_v25 = vld [vmem:[#allocation7 + $0x3ac] ss:$16 sps:$4 sm:$0xff]  }
 0x276   :  { %4970 = vmatprep.subr.bf16.mxu1 %v6930_v27  ;;  %v7009_v27 = vld [vmem:[#allocation7 + $0x3a0] ss:$16 sps:$4 sm:$0xff]  }
 0x278   :  { %4799 = vmatpush1.bf16.msra.mxu0 %v6925_v32  ;;  %v7012_v32 = vld [vmem:[#allocation7 + $0x3a8] ss:$16 sps:$4 sm:$0xff]  }
 0x279   :  { %4971 = vmatpush1.bf16.msra.mxu1 %v6928_v33  ;;  %4811 = vmatprep.subr.bf16.mxu0 %v6933_v34  ;;  %v7017_v33 = vld [vmem:[#allocation7 + $0x3c4] ss:$16 sps:$4 sm:$0xff]   ;;  %v7020_v34 = vld [vmem:[#allocation7 + $0x3cc] ss:$16 sps:$4 sm:$0xff]  }
 0x27a   :  { %4983 = vmatprep.subr.bf16.mxu1 %v6936_v35  ;;  %v7015_v35 = vld [vmem:[#allocation7 + $0x3c0] ss:$16 sps:$4 sm:$0xff]  }
 0x27b   :  { %4801 = vmatmul.mubr.bf16.vlgmr.msra.gmra.mrb[8].mxu0 %v7956_v48 }
 0x27c   :  { %4973 = vmatmul.mubr.bf16.vlgmr.msra.gmra.mrb[8].mxu1 %v7956_v48  ;;  %4812 = vmatpush1.bf16.msra.mxu0 %v6931_v36  ;;  %v6963_v48 = vld [vmem:[#allocation7 + $0x2a4] ss:$16 sps:$4 sm:$0xff]   ;;  %v7018_v36 = vld [vmem:[#allocation7 + $0x3c8] ss:$16 sps:$4 sm:$0xff]  }
 0x27d   :  { %4843 = vmatprep.mubr.bf16.mxu0 %v7960_v57  ;;  %4984 = vmatpush1.bf16.msra.mxu1 %v6934_v37  ;;  %v7023_v37 = vld [vmem:[#allocation7 + $0x3e4] ss:$16 sps:$4 sm:$0xff]  }
 0x27e   :  { %5015 = vmatprep.mubr.bf16.mxu1 %v7960_v57  ;;  %4813 = vmatprep.subr.bf16.mxu0 %v6939_v38  ;;  %v6967_v57 = vld [vmem:[#allocation7 + $0x2c0] ss:$16 sps:$4 sm:$0xff]   ;;  %v7026_v38 = vld [vmem:[#allocation7 + $0x3ec] ss:$16 sps:$4 sm:$0xff]  }
 0x27f   :  { %4985 = vmatprep.subr.bf16.mxu1 %v6942_v39  ;;  %v7021_v39 = vld [vmem:[#allocation7 + $0x3e0] ss:$16 sps:$4 sm:$0xff]  }
 0x280   :  { %4814 = vmatpush1.bf16.msra.mxu0 %v6937_v41  ;;  %v7024_v41 = vld [vmem:[#allocation7 + $0x3e8] ss:$16 sps:$4 sm:$0xff]  }
 0x281   :  { %4986 = vmatpush1.bf16.msra.mxu1 %v6940_v59  ;;  %4815 = vmatprep.subr.bf16.mxu0 %v6945_v60  ;;  %v7029_v59 = vld [vmem:[#allocation7 + $0x404] ss:$16 sps:$4 sm:$0xff]   ;;  %v7032_v60 = vld [vmem:[#allocation7 + $0x40c] ss:$16 sps:$4 sm:$0xff]  }
 0x282   :  { %4987 = vmatprep.subr.bf16.mxu1 %v6948_v61  ;;  %v7027_v61 = vld [vmem:[#allocation7 + $0x400] ss:$16 sps:$4 sm:$0xff]  }
 0x284   :  { %4816 = vmatpush1.bf16.msra.mxu0 %v6943_v62  ;;  %v7030_v62 = vld [vmem:[#allocation7 + $0x408] ss:$16 sps:$4 sm:$0xff]  }
 0x285   :  { %4988 = vmatpush1.bf16.msra.mxu1 %v6946_v42  ;;  %4817 = vmatprep.subr.bf16.mxu0 %v6951_v43  ;;  %v7035_v42 = vld [vmem:[#allocation7 + $0x424] ss:$16 sps:$4 sm:$0xff]   ;;  %v7038_v43 = vld [vmem:[#allocation7 + $0x42c] ss:$16 sps:$4 sm:$0xff]  }
 0x286   :  { %4989 = vmatprep.subr.bf16.mxu1 %v6954_v11  ;;  %v7033_v11 = vld [vmem:[#allocation7 + $0x420] ss:$16 sps:$4 sm:$0xff]  }
 0x288   :  { %4818 = vmatpush1.bf16.msra.mxu0 %v6949_v12  ;;  %v7036_v12 = vld [vmem:[#allocation7 + $0x428] ss:$16 sps:$4 sm:$0xff]  }
 0x289   :  { %4990 = vmatpush1.bf16.msra.mxu1 %v6952_v15  ;;  %4819 = vmatprep.subr.bf16.mxu0 %v6957_v44  ;;  %v7041_v15 = vld [vmem:[#allocation7 + $0x444] ss:$16 sps:$4 sm:$0xff]   ;;  %v7044_v44 = vld [vmem:[#allocation7 + $0x44c] ss:$16 sps:$4 sm:$0xff]  }
 0x28a   :  { %4991 = vmatprep.subr.bf16.mxu1 %v6960_v45  ;;  %v7039_v45 = vld [vmem:[#allocation7 + $0x440] ss:$16 sps:$4 sm:$0xff]  }
 0x28c   :  { %4820 = vmatpush1.bf16.msra.mxu0 %v6955_v46  ;;  %v7042_v46 = vld [vmem:[#allocation7 + $0x448] ss:$16 sps:$4 sm:$0xff]  }
 0x28d   :  { %4992 = vmatpush1.bf16.msra.mxu1 %v6958_v47  ;;  %4821 = vmatprep.subr.bf16.mxu0 %v6963_v48  ;;  %v7047_v47 = vld [vmem:[#allocation7 + $0x464] ss:$16 sps:$4 sm:$0xff]   ;;  %v7050_v48 = vld [vmem:[#allocation7 + $0x46c] ss:$16 sps:$4 sm:$0xff]  }
 0x28e   :  { %4993 = vmatprep.subr.bf16.mxu1 %v6966_v50  ;;  %v7045_v50 = vld [vmem:[#allocation7 + $0x460] ss:$16 sps:$4 sm:$0xff]  }
 0x290   :  { %4822 = vmatpush1.bf16.msra.mxu0 %v6961_v51  ;;  %v7053_v51 = vld [vmem:[#allocation7 + $0x484] ss:$16 sps:$4 sm:$0xff]  }
 0x291   :  { %4994 = vmatpush1.bf16.msra.mxu1 %v6964_v54  ;;  %4823 = vmatprep.subr.bf16.mxu0 %v6969_v55  ;;  %v7056_v54 = vld [vmem:[#allocation7 + $0x48c] ss:$16 sps:$4 sm:$0xff]   ;;  %v7051_v55 = vld [vmem:[#allocation7 + $0x480] ss:$16 sps:$4 sm:$0xff]  }
 0x292   :  { %4995 = vmatprep.subr.bf16.mxu1 %v6972_v56  ;;  %v7054_v56 = vld [vmem:[#allocation7 + $0x488] ss:$16 sps:$4 sm:$0xff]  }
 0x294   :  { %4824 = vmatpush1.bf16.msra.mxu0 %v6967_v57  ;;  %v7059_v57 = vld [vmem:[#allocation7 + $0x4a4] ss:$16 sps:$4 sm:$0xff]  }
 0x295   :  { %4996 = vmatpush1.bf16.msra.mxu1 %v6970_v58  ;;  %4825 = vmatprep.subr.bf16.mxu0 %v6975_v0  ;;  %v7062_v58 = vld [vmem:[#allocation7 + $0x4ac] ss:$16 sps:$4 sm:$0xff]   ;;  %v7057_v0 = vld [vmem:[#allocation7 + $0x4a0] ss:$16 sps:$4 sm:$0xff]  }
 0x296   :  { %4997 = vmatprep.subr.bf16.mxu1 %v6978_v1  ;;  %v7060_v1 = vld [vmem:[#allocation7 + $0x4a8] ss:$16 sps:$4 sm:$0xff]  }
 0x298   :  { %4826 = vmatpush1.bf16.msra.mxu0 %v6973_v2  ;;  %v7065_v2 = vld [vmem:[#allocation7 + $0x4c4] ss:$16 sps:$4 sm:$0xff]  }
 0x299   :  { %4998 = vmatpush1.bf16.msra.mxu1 %v6976_v3  ;;  %4827 = vmatprep.subr.bf16.mxu0 %v6981_v4  ;;  %v7068_v3 = vld [vmem:[#allocation7 + $0x4cc] ss:$16 sps:$4 sm:$0xff]   ;;  %v7063_v4 = vld [vmem:[#allocation7 + $0x4c0] ss:$16 sps:$4 sm:$0xff]  }
 0x29a   :  { %4999 = vmatprep.subr.bf16.mxu1 %v6984_v26  ;;  %v7066_v26 = vld [vmem:[#allocation7 + $0x4c8] ss:$16 sps:$4 sm:$0xff]  }
 0x29c   :  { %4828 = vmatpush1.bf16.msra.mxu0 %v6979_v40  ;;  %v7071_v40 = vld [vmem:[#allocation7 + $0x4e4] ss:$16 sps:$4 sm:$0xff]  }
 0x29d   :  { %5000 = vmatpush1.bf16.msra.mxu1 %v6982_v10  ;;  %4829 = vmatprep.subr.bf16.mxu0 %v6987_v5  ;;  %v7074_v10 = vld [vmem:[#allocation7 + $0x4ec] ss:$16 sps:$4 sm:$0xff]   ;;  %v7069_v5 = vld [vmem:[#allocation7 + $0x4e0] ss:$16 sps:$4 sm:$0xff]  }
 0x29e   :  { %5001 = vmatprep.subr.bf16.mxu1 %v6990_v7  ;;  %v7072_v7 = vld [vmem:[#allocation7 + $0x4e8] ss:$16 sps:$4 sm:$0xff]  }
 0x2a0   :  { %4830 = vmatpush1.bf16.msra.mxu0 %v6985_v28  ;;  %v7077_v28 = vld [vmem:[#allocation7 + $0x504] ss:$16 sps:$4 sm:$0xff]  }
 0x2a1   :  { %5002 = vmatpush1.bf16.msra.mxu1 %v6988_v30  ;;  %4831 = vmatprep.subr.bf16.mxu0 %v6993_v31  ;;  %v7080_v30 = vld [vmem:[#allocation7 + $0x50c] ss:$16 sps:$4 sm:$0xff]   ;;  %v7075_v31 = vld [vmem:[#allocation7 + $0x500] ss:$16 sps:$4 sm:$0xff]  }
 0x2a2   :  { %5003 = vmatprep.subr.bf16.mxu1 %v6996_v49  ;;  %v7078_v49 = vld [vmem:[#allocation7 + $0x508] ss:$16 sps:$4 sm:$0xff]  }
 0x2a4   :  { %4832 = vmatpush1.bf16.msra.mxu0 %v6991_v13  ;;  %v7083_v13 = vld [vmem:[#allocation7 + $0x524] ss:$16 sps:$4 sm:$0xff]  }
 0x2a5   :  { %5004 = vmatpush1.bf16.msra.mxu1 %v6994_v14  ;;  %4833 = vmatprep.subr.bf16.mxu0 %v6999_v16  ;;  %v7086_v14 = vld [vmem:[#allocation7 + $0x52c] ss:$16 sps:$4 sm:$0xff]   ;;  %v7081_v16 = vld [vmem:[#allocation7 + $0x520] ss:$16 sps:$4 sm:$0xff]  }
 0x2a6   :  { %5005 = vmatprep.subr.bf16.mxu1 %v7002_v17  ;;  %v7084_v17 = vld [vmem:[#allocation7 + $0x528] ss:$16 sps:$4 sm:$0xff]  }
 0x2a8   :  { %4834 = vmatpush1.bf16.msra.mxu0 %v6997_v18  ;;  %v7089_v18 = vld [vmem:[#allocation7 + $0x544] ss:$16 sps:$4 sm:$0xff]  }
 0x2a9   :  { %5006 = vmatpush1.bf16.msra.mxu1 %v7000_v19  ;;  %4835 = vmatprep.subr.bf16.mxu0 %v7005_v20  ;;  %v7092_v19 = vld [vmem:[#allocation7 + $0x54c] ss:$16 sps:$4 sm:$0xff]   ;;  %v7087_v20 = vld [vmem:[#allocation7 + $0x540] ss:$16 sps:$4 sm:$0xff]  }
 0x2aa   :  { %5007 = vmatprep.subr.bf16.mxu1 %v7008_v21  ;;  %v7090_v21 = vld [vmem:[#allocation7 + $0x548] ss:$16 sps:$4 sm:$0xff]  }
 0x2ac   :  { %4836 = vmatpush1.bf16.msra.mxu0 %v7003_v22  ;;  %v7095_v22 = vld [vmem:[#allocation7 + $0x564] ss:$16 sps:$4 sm:$0xff]  }
 0x2ad   :  { %5008 = vmatpush1.bf16.msra.mxu1 %v7006_v23  ;;  %4837 = vmatprep.subr.bf16.mxu0 %v7011_v24  ;;  %v7098_v23 = vld [vmem:[#allocation7 + $0x56c] ss:$16 sps:$4 sm:$0xff]   ;;  %v7093_v24 = vld [vmem:[#allocation7 + $0x560] ss:$16 sps:$4 sm:$0xff]  }
 0x2ae   :  { %5009 = vmatprep.subr.bf16.mxu1 %v7014_v25  ;;  %v7096_v25 = vld [vmem:[#allocation7 + $0x568] ss:$16 sps:$4 sm:$0xff]  }
 0x2b0   :  { %4838 = vmatpush1.bf16.msra.mxu0 %v7009_v27  ;;  %v7101_v27 = vld [vmem:[#allocation7 + $0x584] ss:$16 sps:$4 sm:$0xff]  }
 0x2b1   :  { %5010 = vmatpush1.bf16.msra.mxu1 %v7012_v32  ;;  %4839 = vmatprep.subr.bf16.mxu0 %v7017_v33  ;;  %v7104_v32 = vld [vmem:[#allocation7 + $0x58c] ss:$16 sps:$4 sm:$0xff]   ;;  %v7099_v33 = vld [vmem:[#allocation7 + $0x580] ss:$16 sps:$4 sm:$0xff]  }
 0x2b2   :  { %5011 = vmatprep.subr.bf16.mxu1 %v7020_v34  ;;  %v7102_v34 = vld [vmem:[#allocation7 + $0x588] ss:$16 sps:$4 sm:$0xff]  }
 0x2b4   :  { %4840 = vmatpush1.bf16.msra.mxu0 %v7015_v35  ;;  %v7107_v35 = vld [vmem:[#allocation7 + $0x5a4] ss:$16 sps:$4 sm:$0xff]  }
 0x2b5   :  { %5012 = vmatpush1.bf16.msra.mxu1 %v7018_v36  ;;  %4841 = vmatprep.subr.bf16.mxu0 %v7023_v37  ;;  %v7110_v36 = vld [vmem:[#allocation7 + $0x5ac] ss:$16 sps:$4 sm:$0xff]   ;;  %v7105_v37 = vld [vmem:[#allocation7 + $0x5a0] ss:$16 sps:$4 sm:$0xff]  }
 0x2b6   :  { %5013 = vmatprep.subr.bf16.mxu1 %v7026_v38  ;;  %v7108_v38 = vld [vmem:[#allocation7 + $0x5a8] ss:$16 sps:$4 sm:$0xff]  }
 0x2b8   :  { %4842 = vmatpush1.bf16.msra.mxu0 %v7021_v39  ;;  %v7113_v39 = vld [vmem:[#allocation7 + $0x5c4] ss:$16 sps:$4 sm:$0xff]  }
 0x2b9   :  { %5014 = vmatpush1.bf16.msra.mxu1 %v7024_v41  ;;  %4854 = vmatprep.subr.bf16.mxu0 %v7029_v59  ;;  %v7116_v41 = vld [vmem:[#allocation7 + $0x5cc] ss:$16 sps:$4 sm:$0xff]   ;;  %v7111_v59 = vld [vmem:[#allocation7 + $0x5c0] ss:$16 sps:$4 sm:$0xff]  }
 0x2ba   :  { %5026 = vmatprep.subr.bf16.mxu1 %v7032_v60  ;;  %v7114_v60 = vld [vmem:[#allocation7 + $0x5c8] ss:$16 sps:$4 sm:$0xff]  }
 0x2bb   :  { %4844 = vmatmul.mubr.bf16.vlgmr.msra.gmra.mrb[8].mxu0 %v7958_v53 }
 0x2bc   :  { %5016 = vmatmul.mubr.bf16.vlgmr.msra.gmra.mrb[8].mxu1 %v7958_v53  ;;  %4855 = vmatpush1.bf16.msra.mxu0 %v7027_v61  ;;  %v7048_v53 = vld [vmem:[#allocation7 + $0x468] ss:$16 sps:$4 sm:$0xff]   ;;  %v7119_v61 = vld [vmem:[#allocation7 + $0x5e4] ss:$16 sps:$4 sm:$0xff]  }
 0x2bd   :  { %5027 = vmatpush1.bf16.msra.mxu1 %v7030_v62  ;;  %4856 = vmatprep.subr.bf16.mxu0 %v7035_v42  ;;  %v7122_v62 = vld [vmem:[#allocation7 + $0x5ec] ss:$16 sps:$4 sm:$0xff]   ;;  %v7117_v42 = vld [vmem:[#allocation7 + $0x5e0] ss:$16 sps:$4 sm:$0xff]  }
 0x2be   :  { %5028 = vmatprep.subr.bf16.mxu1 %v7038_v43  ;;  %v7120_v43 = vld [vmem:[#allocation7 + $0x5e8] ss:$16 sps:$4 sm:$0xff]  }
 0x2c0   :  { %4857 = vmatpush1.bf16.msra.mxu0 %v7033_v11  ;;  %v7125_v11 = vld [vmem:[#allocation7 + $0x604] ss:$16 sps:$4 sm:$0xff]  }
 0x2c1   :  { %5029 = vmatpush1.bf16.msra.mxu1 %v7036_v12  ;;  %4858 = vmatprep.subr.bf16.mxu0 %v7041_v15  ;;  %v7128_v12 = vld [vmem:[#allocation7 + $0x60c] ss:$16 sps:$4 sm:$0xff]   ;;  %v728_v15 = vsub.s32 4, %v7799_v52 }
 0x2c2   :  { %5030 = vmatprep.subr.bf16.mxu1 %v7044_v44  ;;  %v736_v44 = vsub.s32 6, %v7799_v52 }
 0x2c4   :  { %4859 = vmatpush1.bf16.msra.mxu0 %v7039_v45  ;;  %v732_v45 = vsub.s32 5, %v7799_v52 }
 0x2c5   :  { %5031 = vmatpush1.bf16.msra.mxu1 %v7042_v46  ;;  %4860 = vmatprep.subr.bf16.mxu0 %v7047_v47  ;;  %v740_v46 = vsub.s32 7, %v7799_v52  ;;  %v729_v47 = vrot.slane %v7939_v8, %v728_v15  ;;  %v7164_v15 = vld [vmem:[#allocation7 + $0x6cc] ss:$16 sps:$4 sm:$0xff]  }
 0x2c6   :  { %5032 = vmatprep.subr.bf16.mxu1 %v7050_v48  ;;  %v737_v48 = vrot.slane %v7939_v8, %v736_v44  ;;  %v7159_v44 = vld [vmem:[#allocation7 + $0x6c0] ss:$16 sps:$4 sm:$0xff]  }
 0x2c8   :  { %4861 = vmatpush1.bf16.msra.mxu0 %v7045_v50  ;;  %v733_v50 = vrot.slane %v7939_v8, %v732_v45  ;;  %v7162_v45 = vld [vmem:[#allocation7 + $0x6c8] ss:$16 sps:$4 sm:$0xff]  }
 0x2c9   :  { %5033 = vmatpush1.bf16.msra.mxu1 %v7048_v53  ;;  %4862 = vmatprep.subr.bf16.mxu0 %v7053_v51  ;;  %v741_v53 = vrot.slane %v7939_v8, %v740_v46  ;;  %v7167_v46 = vld [vmem:[#allocation7 + $0x6e4] ss:$16 sps:$4 sm:$0xff]  }
 0x2ca   :  { %5034 = vmatprep.subr.bf16.mxu1 %v7056_v54 }
 0x2cc   :  { %4863 = vmatpush1.bf16.msra.mxu0 %v7051_v55 }
 0x2cd   :  { %5035 = vmatpush1.bf16.msra.mxu1 %v7054_v56  ;;  %4864 = vmatprep.subr.bf16.mxu0 %v7059_v57 }
 0x2ce   :  { %5036 = vmatprep.subr.bf16.mxu1 %v7062_v58 }
 0x2d0   :  { %4865 = vmatpush1.bf16.msra.mxu0 %v7057_v0 }
 0x2d1   :  { %5037 = vmatpush1.bf16.msra.mxu1 %v7060_v1  ;;  %4866 = vmatprep.subr.bf16.mxu0 %v7065_v2 }
 0x2d2   :  { %5038 = vmatprep.subr.bf16.mxu1 %v7068_v3 }
 0x2d4   :  { %4867 = vmatpush1.bf16.msra.mxu0 %v7063_v4 }
 0x2d5   :  { %5039 = vmatpush1.bf16.msra.mxu1 %v7066_v26  ;;  %4868 = vmatprep.subr.bf16.mxu0 %v7071_v40 }
 0x2d6   :  { %5040 = vmatprep.subr.bf16.mxu1 %v7074_v10 }
 0x2d8   :  { %4869 = vmatpush1.bf16.msra.mxu0 %v7069_v5 }
 0x2d9   :  { %5041 = vmatpush1.bf16.msra.mxu1 %v7072_v7  ;;  %4870 = vmatprep.subr.bf16.mxu0 %v7077_v28 }
 0x2da   :  { %5042 = vmatprep.subr.bf16.mxu1 %v7080_v30 }
 0x2dc   :  { %4871 = vmatpush1.bf16.msra.mxu0 %v7075_v31 }
 0x2dd   :  { %5043 = vmatpush1.bf16.msra.mxu1 %v7078_v49  ;;  %4872 = vmatprep.subr.bf16.mxu0 %v7083_v13 }
 0x2de   :  { %5044 = vmatprep.subr.bf16.mxu1 %v7086_v14 }
 0x2e0   :  { %4873 = vmatpush1.bf16.msra.mxu0 %v7081_v16 }
 0x2e1   :  { %5045 = vmatpush1.bf16.msra.mxu1 %v7084_v17  ;;  %4874 = vmatprep.subr.bf16.mxu0 %v7089_v18 }
 0x2e2   :  { %5046 = vmatprep.subr.bf16.mxu1 %v7092_v19 }
 0x2e4   :  { %4875 = vmatpush1.bf16.msra.mxu0 %v7087_v20  ;;  %v7123_v20 = vld [vmem:[#allocation7 + $0x600] ss:$16 sps:$4 sm:$0xff]  }
 0x2e5   :  { %5047 = vmatpush1.bf16.msra.mxu1 %v7090_v21  ;;  %4876 = vmatprep.subr.bf16.mxu0 %v7095_v22  ;;  %v7126_v21 = vld [vmem:[#allocation7 + $0x608] ss:$16 sps:$4 sm:$0xff]  }
 0x2e6   :  { %5048 = vmatprep.subr.bf16.mxu1 %v7098_v23  ;;  %v7131_v23 = vld [vmem:[#allocation7 + $0x624] ss:$16 sps:$4 sm:$0xff]  }
 0x2e8   :  { %4877 = vmatpush1.bf16.msra.mxu0 %v7093_v24  ;;  %v7134_v24 = vld [vmem:[#allocation7 + $0x62c] ss:$16 sps:$4 sm:$0xff]  }
 0x2e9   :  { %5049 = vmatpush1.bf16.msra.mxu1 %v7096_v25  ;;  %4878 = vmatprep.subr.bf16.mxu0 %v7101_v27  ;;  %v7129_v25 = vld [vmem:[#allocation7 + $0x620] ss:$16 sps:$4 sm:$0xff]   ;;  %v7132_v27 = vld [vmem:[#allocation7 + $0x628] ss:$16 sps:$4 sm:$0xff]  }
 0x2ea   :  { %5050 = vmatprep.subr.bf16.mxu1 %v7104_v32  ;;  %v7137_v32 = vld [vmem:[#allocation7 + $0x644] ss:$16 sps:$4 sm:$0xff]  }
 0x2ec   :  { %4879 = vmatpush1.bf16.msra.mxu0 %v7099_v33  ;;  %v7140_v33 = vld [vmem:[#allocation7 + $0x64c] ss:$16 sps:$4 sm:$0xff]  }
 0x2ed   :  { %5051 = vmatpush1.bf16.msra.mxu1 %v7102_v34  ;;  %4880 = vmatprep.subr.bf16.mxu0 %v7107_v35  ;;  %v7135_v34 = vld [vmem:[#allocation7 + $0x640] ss:$16 sps:$4 sm:$0xff]   ;;  %v7138_v35 = vld [vmem:[#allocation7 + $0x648] ss:$16 sps:$4 sm:$0xff]  }
 0x2ee   :  { %5052 = vmatprep.subr.bf16.mxu1 %v7110_v36  ;;  %v7143_v36 = vld [vmem:[#allocation7 + $0x664] ss:$16 sps:$4 sm:$0xff]  }
 0x2f0   :  { %4881 = vmatpush1.bf16.msra.mxu0 %v7105_v37  ;;  %v7146_v37 = vld [vmem:[#allocation7 + $0x66c] ss:$16 sps:$4 sm:$0xff]  }
 0x2f1   :  { %5053 = vmatpush1.bf16.msra.mxu1 %v7108_v38  ;;  %4882 = vmatprep.subr.bf16.mxu0 %v7113_v39  ;;  %v7141_v38 = vld [vmem:[#allocation7 + $0x660] ss:$16 sps:$4 sm:$0xff]   ;;  %v7144_v39 = vld [vmem:[#allocation7 + $0x668] ss:$16 sps:$4 sm:$0xff]  }
 0x2f2   :  { %5054 = vmatprep.subr.bf16.mxu1 %v7116_v41  ;;  %v7149_v41 = vld [vmem:[#allocation7 + $0x684] ss:$16 sps:$4 sm:$0xff]  }
 0x2f4   :  { %4883 = vmatpush1.bf16.msra.mxu0 %v7111_v59  ;;  %v7152_v59 = vld [vmem:[#allocation7 + $0x68c] ss:$16 sps:$4 sm:$0xff]  }
 0x2f5   :  { %5055 = vmatpush1.bf16.msra.mxu1 %v7114_v60  ;;  %4884 = vmatprep.subr.bf16.mxu0 %v7119_v61  ;;  %v7147_v60 = vld [vmem:[#allocation7 + $0x680] ss:$16 sps:$4 sm:$0xff]   ;;  %v7150_v61 = vld [vmem:[#allocation7 + $0x688] ss:$16 sps:$4 sm:$0xff]  }
 0x2f6   :  { %5056 = vmatprep.subr.bf16.mxu1 %v7122_v62  ;;  %v7155_v62 = vld [vmem:[#allocation7 + $0x6a4] ss:$16 sps:$4 sm:$0xff]  }
 0x2f8   :  { %4885 = vmatpush1.bf16.msra.mxu0 %v7117_v42  ;;  %v7158_v42 = vld [vmem:[#allocation7 + $0x6ac] ss:$16 sps:$4 sm:$0xff]  }
 0x2f9   :  { %5057 = vmatpush1.bf16.msra.mxu1 %v7120_v43  ;;  %4897 = vmatprep.subr.bf16.mxu0 %v7125_v11  ;;  %v7153_v43 = vld [vmem:[#allocation7 + $0x6a0] ss:$16 sps:$4 sm:$0xff]   ;;  %v7156_v11 = vld [vmem:[#allocation7 + $0x6a8] ss:$16 sps:$4 sm:$0xff]  }
 0x2fa   :  { %5069 = vmatprep.subr.bf16.mxu1 %v7128_v12  ;;  %v7161_v12 = vld [vmem:[#allocation7 + $0x6c4] ss:$16 sps:$4 sm:$0xff]  }
 0x30e   :  { %v3048_v51 = vpop.f32.mrb[4].mxu0  ;;  %v3177_v55 = vpop.f32.mrb[4].mxu1 }
 0x30f   :  { %v6716_v54 = vadd.f32 %v3048_v51, %v729_v47  ;;  %v3050_v56 = vpop.f32.mrb[5].mxu0  ;;  %v6720_v57 = vadd.f32 %v3177_v55, %v737_v48  ;;  %v3179_v0 = vpop.f32.mrb[5].mxu1  ;;  %v7176_v51 = vld [vmem:[#allocation7 + $0x70c] ss:$16 sps:$4 sm:$0xff]   ;;  %v7174_v55 = vld [vmem:[#allocation7 + $0x708] ss:$16 sps:$4 sm:$0xff]  }
 0x310   :  { %v6717_v58 = vadd.f32 %v3050_v56, %v733_v50  ;;  %v3052_v1 = vpop.f32.mrb[6].mxu0  ;;  %v6721_v2 = vadd.f32 %v3179_v0, %v741_v53  ;;  %v3181_v4 = vpop.f32.mrb[6].mxu1  ;;  %v7179_v56 = vld [vmem:[#allocation7 + $0x724] ss:$16 sps:$4 sm:$0xff]   ;;  %v7180_v0 = vld [vmem:[#allocation7 + $0x728] ss:$16 sps:$4 sm:$0xff]  }
 0x311   :  { %v6718_v3 = vadd.f32 %v3052_v1, %v729_v47  ;;  %v3054_v26 = vpop.f32.mrb[7].mxu0  ;;  %v6722_v40 = vadd.f32 %v3181_v4, %v737_v48  ;;  %v3183_v5 = vpop.f32.mrb[7].mxu1  ;;  %v3190_v7 = vmax.f32 %v6716_v54, 0.0  ;;  %v3192_v31 = vmax.f32 %v6720_v57, 0.0  ;;  %v7170_v47 = vld [vmem:[#allocation7 + $0x6ec] ss:$16 sps:$4 sm:$0xff]  }
 0x312   :  { %v6719_v10 = vadd.f32 %v3054_v26, %v733_v50  ;;  %v6723_v30 = vadd.f32 %v3183_v5, %v741_v53  ;;  %v3191_v8 = vmax.f32 %v6717_v58, 0.0  ;;  %v3193_v14 = vmax.f32 %v6721_v2, 0.0  ;;  %v7165_v48 = vld [vmem:[#allocation7 + $0x6e0] ss:$16 sps:$4 sm:$0xff]   ;;  %v7168_v50 = vld [vmem:[#allocation7 + $0x6e8] ss:$16 sps:$4 sm:$0xff]  }
 0x313   :  { %v3198_v28 = vmax.f32 %v6718_v3, 0.0  ;;  %v3200_v49 = vmax.f32 %v6722_v40, 0.0  ;;  %v7173_v53 = vld [vmem:[#allocation7 + $0x704] ss:$16 sps:$4 sm:$0xff]   ;;  %v7171_v54 = vld [vmem:[#allocation7 + $0x700] ss:$16 sps:$4 sm:$0xff]  }
 0x314   :  { %v3199_v13 = vmax.f32 %v6719_v10, 0.0  ;;  %v3201_v17 = vmax.f32 %v6723_v30, 0.0  ;;  %v7182_v57 = vld [vmem:[#allocation7 + $0x72c] ss:$16 sps:$4 sm:$0xff]   ;;  %v7177_v58 = vld [vmem:[#allocation7 + $0x720] ss:$16 sps:$4 sm:$0xff]  }
 0x315   :  { %v3206_v16 = vpack.c.bf16 %v3198_v28, %v3190_v7  ;;  %v7976_v18 = vpack.c.bf16 %v3200_v49, %v3192_v31  ;;  %v7185_v1 = vld [vmem:[#allocation7 + $0x744] ss:$16 sps:$4 sm:$0xff]   ;;  %v7188_v2 = vld [vmem:[#allocation7 + $0x74c] ss:$16 sps:$4 sm:$0xff]   ;;  %v7183_v3 = vld [vmem:[#allocation7 + $0x740] ss:$16 sps:$4 sm:$0xff]  }
 0x316   :  { %v3207_v19 = vpack.c.bf16 %v3199_v13, %v3191_v8  ;;  %v3209_v22 = vpack.c.bf16 %v3201_v17, %v3193_v14  ;;  %v7186_v4 = vld [vmem:[#allocation7 + $0x748] ss:$16 sps:$4 sm:$0xff]   ;;  %v7191_v26 = vld [vmem:[#allocation7 + $0x764] ss:$16 sps:$4 sm:$0xff]   ;;  %v7194_v40 = vld [vmem:[#allocation7 + $0x76c] ss:$16 sps:$4 sm:$0xff]  }
 0x317   :  { %v7189_v10 = vld [vmem:[#allocation7 + $0x760] ss:$16 sps:$4 sm:$0xff]   ;;  %v7192_v5 = vld [vmem:[#allocation7 + $0x768] ss:$16 sps:$4 sm:$0xff]   ;;  %v7197_v7 = vld [vmem:[#allocation7 + $0x784] ss:$16 sps:$4 sm:$0xff]  }
 0x318   :  { %4886 = vmatprep.mubr.bf16.mxu0 %v3207_v19  ;;  %5058 = vmatprep.mubr.bf16.mxu1 %v3207_v19  ;;  %v7200_v28 = vld [vmem:[#allocation7 + $0x78c] ss:$16 sps:$4 sm:$0xff]   ;;  %v7195_v30 = vld [vmem:[#allocation7 + $0x780] ss:$16 sps:$4 sm:$0xff]   ;;  %v7198_v31 = vld [vmem:[#allocation7 + $0x788] ss:$16 sps:$4 sm:$0xff]  }
 0x319   :  { %4887 = vmatmul.mubr.bf16.vlgmr.msra.gmra.mrb[8].mxu0 %v3206_v16  ;;  %5059 = vmatmul.mubr.bf16.vlgmr.msra.gmra.mrb[8].mxu1 %v3206_v16  ;;  %v7203_v8 = vld [vmem:[#allocation7 + $0x7a4] ss:$16 sps:$4 sm:$0xff]   ;;  %v7206_v49 = vld [vmem:[#allocation7 + $0x7ac] ss:$16 sps:$4 sm:$0xff]   ;;  %v7201_v13 = vld [vmem:[#allocation7 + $0x7a0] ss:$16 sps:$4 sm:$0xff]  }
 0x31a   :  { %4898 = vmatpush1.bf16.msra.mxu0 %v7123_v20  ;;  %5070 = vmatpush1.bf16.msra.mxu1 %v7126_v21  ;;  %v7204_v14 = vld [vmem:[#allocation7 + $0x7a8] ss:$16 sps:$4 sm:$0xff]   ;;  %v7209_v16 = vld [vmem:[#allocation7 + $0x7c4] ss:$16 sps:$4 sm:$0xff]   ;;  %v7212_v17 = vld [vmem:[#allocation7 + $0x7cc] ss:$16 sps:$4 sm:$0xff]  }
 0x31b   :  { %4929 = vmatprep.mubr.bf16.mxu0 %v3209_v22  ;;  %5101 = vmatprep.mubr.bf16.mxu1 %v3209_v22  ;;  %v7207_v19 = vld [vmem:[#allocation7 + $0x7c0] ss:$16 sps:$4 sm:$0xff]   ;;  %v7210_v20 = vld [vmem:[#allocation7 + $0x7c8] ss:$16 sps:$4 sm:$0xff]   ;;  %v7215_v21 = vld [vmem:[#allocation7 + $0x7e4] ss:$16 sps:$4 sm:$0xff]  }
 0x31c   :  { %4899 = vmatprep.subr.bf16.mxu0 %v7131_v23  ;;  %5071 = vmatprep.subr.bf16.mxu1 %v7134_v24  ;;  %v7218_v22 = vld [vmem:[#allocation7 + $0x7ec] ss:$16 sps:$4 sm:$0xff]   ;;  %v7213_v23 = vld [vmem:[#allocation7 + $0x7e0] ss:$16 sps:$4 sm:$0xff]   ;;  %v7216_v24 = vld [vmem:[#allocation7 + $0x7e8] ss:$16 sps:$4 sm:$0xff]  }
 0x31e   :  { %4900 = vmatpush1.bf16.msra.mxu0 %v7129_v25  ;;  %5072 = vmatpush1.bf16.msra.mxu1 %v7132_v27  ;;  %v7221_v25 = vld [vmem:[#allocation10 + $0x4] ss:$8 sps:$4 sm:$0xff]   ;;  %v7219_v27 = vld [vmem:[#allocation10] ss:$8 sps:$4 sm:$0xff]  }
 0x31f   :  { %4901 = vmatprep.subr.bf16.mxu0 %v7137_v32  ;;  %5073 = vmatprep.subr.bf16.mxu1 %v7140_v33  ;;  %v7224_v32 = vld [vmem:[#allocation10 + $0x14] ss:$8 sps:$4 sm:$0xff]   ;;  %v7222_v33 = vld [vmem:[#allocation10 + $0x10] ss:$8 sps:$4 sm:$0xff]  }
 0x322   :  { %4902 = vmatpush1.bf16.msra.mxu0 %v7135_v34  ;;  %5074 = vmatpush1.bf16.msra.mxu1 %v7138_v35  ;;  %v7227_v34 = vld [vmem:[#allocation10 + $0x24] ss:$8 sps:$4 sm:$0xff]   ;;  %v7225_v35 = vld [vmem:[#allocation10 + $0x20] ss:$8 sps:$4 sm:$0xff]  }
 0x323   :  { %4903 = vmatprep.subr.bf16.mxu0 %v7143_v36  ;;  %5075 = vmatprep.subr.bf16.mxu1 %v7146_v37  ;;  %v7230_v36 = vld [vmem:[#allocation10 + $0x34] ss:$8 sps:$4 sm:$0xff]   ;;  %v7228_v37 = vld [vmem:[#allocation10 + $0x30] ss:$8 sps:$4 sm:$0xff]  }
 0x326   :  { %4904 = vmatpush1.bf16.msra.mxu0 %v7141_v38  ;;  %5076 = vmatpush1.bf16.msra.mxu1 %v7144_v39  ;;  %v7233_v38 = vld [vmem:[#allocation10 + $0x44] ss:$8 sps:$4 sm:$0xff]   ;;  %v7231_v39 = vld [vmem:[#allocation10 + $0x40] ss:$8 sps:$4 sm:$0xff]  }
 0x327   :  { %4905 = vmatprep.subr.bf16.mxu0 %v7149_v41  ;;  %5077 = vmatprep.subr.bf16.mxu1 %v7152_v59  ;;  %v7236_v41 = vld [vmem:[#allocation10 + $0x54] ss:$8 sps:$4 sm:$0xff]   ;;  %v7234_v59 = vld [vmem:[#allocation10 + $0x50] ss:$8 sps:$4 sm:$0xff]  }
 0x32a   :  { %4906 = vmatpush1.bf16.msra.mxu0 %v7147_v60  ;;  %5078 = vmatpush1.bf16.msra.mxu1 %v7150_v61  ;;  %v7237_v60 = vld [vmem:[#allocation10 + $0x60] ss:$8 sps:$4 sm:$0xff]   ;;  %v7242_v61 = vld [vmem:[#allocation10 + $0x74] ss:$8 sps:$4 sm:$0xff]  }
 0x32b   :  { %4907 = vmatprep.subr.bf16.mxu0 %v7155_v62  ;;  %5079 = vmatprep.subr.bf16.mxu1 %v7158_v42  ;;  %v7240_v62 = vld [vmem:[#allocation10 + $0x70] ss:$8 sps:$4 sm:$0xff]   ;;  %v7245_v42 = vld [vmem:[#allocation10 + $0x84] ss:$8 sps:$4 sm:$0xff]  }
 0x32e   :  { %4908 = vmatpush1.bf16.msra.mxu0 %v7153_v43  ;;  %5080 = vmatpush1.bf16.msra.mxu1 %v7156_v11  ;;  %v7243_v43 = vld [vmem:[#allocation10 + $0x80] ss:$8 sps:$4 sm:$0xff]   ;;  %v7248_v11 = vld [vmem:[#allocation10 + $0x94] ss:$8 sps:$4 sm:$0xff]  }
 0x32f   :  { %4909 = vmatprep.subr.bf16.mxu0 %v7161_v12  ;;  %5081 = vmatprep.subr.bf16.mxu1 %v7164_v15  ;;  %v7246_v12 = vld [vmem:[#allocation10 + $0x90] ss:$8 sps:$4 sm:$0xff]   ;;  %v7251_v15 = vld [vmem:[#allocation10 + $0xa4] ss:$8 sps:$4 sm:$0xff]  }
 0x332   :  { %4910 = vmatpush1.bf16.msra.mxu0 %v7159_v44  ;;  %5082 = vmatpush1.bf16.msra.mxu1 %v7162_v45  ;;  %v7249_v44 = vld [vmem:[#allocation10 + $0xa0] ss:$8 sps:$4 sm:$0xff]   ;;  %v7254_v45 = vld [vmem:[#allocation10 + $0xb4] ss:$8 sps:$4 sm:$0xff]  }
 0x333   :  { %4911 = vmatprep.subr.bf16.mxu0 %v7167_v46  ;;  %5083 = vmatprep.subr.bf16.mxu1 %v7170_v47  ;;  %v7252_v46 = vld [vmem:[#allocation10 + $0xb0] ss:$8 sps:$4 sm:$0xff]   ;;  %v7257_v47 = vld [vmem:[#allocation10 + $0xc4] ss:$8 sps:$4 sm:$0xff]  }
 0x336   :  { %4912 = vmatpush1.bf16.msra.mxu0 %v7165_v48  ;;  %5084 = vmatpush1.bf16.msra.mxu1 %v7168_v50  ;;  %v7255_v48 = vld [vmem:[#allocation10 + $0xc0] ss:$8 sps:$4 sm:$0xff]   ;;  %v7260_v50 = vld [vmem:[#allocation10 + $0xd4] ss:$8 sps:$4 sm:$0xff]  }
 0x337   :  { %4913 = vmatprep.subr.bf16.mxu0 %v7173_v53  ;;  %5085 = vmatprep.subr.bf16.mxu1 %v7176_v51  ;;  %v7258_v53 = vld [vmem:[#allocation10 + $0xd0] ss:$8 sps:$4 sm:$0xff]   ;;  %v7263_v51 = vld [vmem:[#allocation10 + $0xe4] ss:$8 sps:$4 sm:$0xff]  }
 0x33a   :  { %4914 = vmatpush1.bf16.msra.mxu0 %v7171_v54  ;;  %5086 = vmatpush1.bf16.msra.mxu1 %v7174_v55  ;;  %v7261_v54 = vld [vmem:[#allocation10 + $0xe0] ss:$8 sps:$4 sm:$0xff]   ;;  %v7266_v55 = vld [vmem:[#allocation10 + $0xf4] ss:$8 sps:$4 sm:$0xff]  }
 0x33b   :  { %4915 = vmatprep.subr.bf16.mxu0 %v7179_v56  ;;  %5087 = vmatprep.subr.bf16.mxu1 %v7182_v57  ;;  %v7264_v56 = vld [vmem:[#allocation10 + $0xf0] ss:$8 sps:$4 sm:$0xff]   ;;  %v7269_v57 = vld [vmem:[#allocation10 + $0x104] ss:$8 sps:$4 sm:$0xff]  }
 0x33e   :  { %4916 = vmatpush1.bf16.msra.mxu0 %v7177_v58  ;;  %5088 = vmatpush1.bf16.msra.mxu1 %v7180_v0  ;;  %v7315_v58 = vld [vmem:[#allocation13 + $0x40] sm:$0xff]  }
 0x33f   :  { %4917 = vmatprep.subr.bf16.mxu0 %v7185_v1  ;;  %5089 = vmatprep.subr.bf16.mxu1 %v7188_v2  ;;  %v7316_v0 = vld [vmem:[#allocation13] sm:$0xff]   ;;  %v7317_v1 = vld [vmem:[#allocation13 + $0x48] sm:$0xff]  }
 0x340   :  { %v7318_v2 = vld [vmem:[#allocation13 + $0x8] sm:$0xff]  }
 0x342   :  { %4918 = vmatpush1.bf16.msra.mxu0 %v7183_v3  ;;  %5090 = vmatpush1.bf16.msra.mxu1 %v7186_v4  ;;  %v7319_v3 = vld [vmem:[#allocation13 + $0x50] sm:$0xff]  }
 0x343   :  { %4919 = vmatprep.subr.bf16.mxu0 %v7191_v26  ;;  %5091 = vmatprep.subr.bf16.mxu1 %v7194_v40  ;;  %v7320_v4 = vld [vmem:[#allocation13 + $0x10] sm:$0xff]   ;;  %v7321_v26 = vld [vmem:[#allocation13 + $0x58] sm:$0xff]  }
 0x344   :  { %v7322_v40 = vld [vmem:[#allocation13 + $0x18] sm:$0xff]  }
 0x346   :  { %4920 = vmatpush1.bf16.msra.mxu0 %v7189_v10  ;;  %5092 = vmatpush1.bf16.msra.mxu1 %v7192_v5  ;;  %v7323_v10 = vld [vmem:[#allocation13 + $0x60] sm:$0xff]  }
 0x347   :  { %4921 = vmatprep.subr.bf16.mxu0 %v7197_v7  ;;  %5093 = vmatprep.subr.bf16.mxu1 %v7200_v28  ;;  %v7324_v5 = vld [vmem:[#allocation13 + $0x20] sm:$0xff]   ;;  %v7325_v7 = vld [vmem:[#allocation13 + $0x68] sm:$0xff]   ;;  %v3466_v28 = vld [vmem:[#allocation8] sm:$0xf] }
 0x34a   :  { %4922 = vmatpush1.bf16.msra.mxu0 %v7195_v30  ;;  %5094 = vmatpush1.bf16.msra.mxu1 %v7198_v31  ;;  %v3471_v30 = vrot.slane %v3466_v28, %v7937_v6  ;;  %v3479_v31 = vrot.slane %v3466_v28, %v720_v9 }
 0x34b   :  { %4923 = vmatprep.subr.bf16.mxu0 %v7203_v8  ;;  %5095 = vmatprep.subr.bf16.mxu1 %v7206_v49  ;;  %v3475_v8 = vrot.slane %v3466_v28, %v7943_v63  ;;  %v3483_v49 = vrot.slane %v3466_v28, %v724_v29  ;;  %v7314_v28 = vld [vmem:[#allocation10 + $0x1f4] ss:$8 sps:$4 sm:$0xff]  }
 0x34e   :  { %4924 = vmatpush1.bf16.msra.mxu0 %v7201_v13  ;;  %5096 = vmatpush1.bf16.msra.mxu1 %v7204_v14 }
 0x34f   :  { %4925 = vmatprep.subr.bf16.mxu0 %v7209_v16  ;;  %5097 = vmatprep.subr.bf16.mxu1 %v7212_v17 }
 0x352   :  { %4926 = vmatpush1.bf16.msra.mxu0 %v7207_v19  ;;  %5098 = vmatpush1.bf16.msra.mxu1 %v7210_v20 }
 0x353   :  { %4927 = vmatprep.subr.bf16.mxu0 %v7215_v21  ;;  %5099 = vmatprep.subr.bf16.mxu1 %v7218_v22 }
 0x356   :  { %4928 = vmatpush1.bf16.msra.mxu0 %v7213_v23  ;;  %5100 = vmatpush1.bf16.msra.mxu1 %v7216_v24 }
 0x357   :  { %5520 = vmatprep.subr.bf16.mxu0 %v7221_v25  ;;  %6657 = vmatprep.subr.bf16.mxu1 %v7315_v58  ;;  %v7294_v58 = vld [vmem:[#allocation10 + $0x190] ss:$8 sps:$4 sm:$0xff]  }
 0x359   :  { %4930 = vmatmul.mubr.bf16.vlgmr.msra.gmra.mrb[8].mxu0 %v7976_v18  ;;  %5102 = vmatmul.mubr.bf16.vlgmr.msra.gmra.mrb[8].mxu1 %v7976_v18  ;;  %v7239_v18 = vld [vmem:[#allocation10 + $0x64] ss:$8 sps:$4 sm:$0xff]  }
 0x35a   :  { %5521 = vmatpush1.bf16.msra.mxu0 %v7219_v27  ;;  %6658 = vmatpush3.bf16.msra.mxu1 %v7316_v0  ;;  %v7299_v0 = vld [vmem:[#allocation10 + $0x1a4] ss:$8 sps:$4 sm:$0xff]  }
 0x35b   :  { %5522 = vmatprep.subr.bf16.mxu0 %v7224_v32  ;;  %6659 = vmatprep.subr.bf16.mxu1 %v7317_v1  ;;  %v7297_v1 = vld [vmem:[#allocation10 + $0x1a0] ss:$8 sps:$4 sm:$0xff]  }
 0x35e   :  { %5523 = vmatpush1.bf16.msra.mxu0 %v7222_v33  ;;  %6660 = vmatpush3.bf16.msra.mxu1 %v7318_v2  ;;  %v7302_v2 = vld [vmem:[#allocation10 + $0x1b4] ss:$8 sps:$4 sm:$0xff]  }
 0x35f   :  { %5524 = vmatprep.subr.bf16.mxu0 %v7227_v34  ;;  %6661 = vmatprep.subr.bf16.mxu1 %v7319_v3  ;;  %v7300_v3 = vld [vmem:[#allocation10 + $0x1b0] ss:$8 sps:$4 sm:$0xff]  }
 0x362   :  { %5525 = vmatpush1.bf16.msra.mxu0 %v7225_v35  ;;  %6662 = vmatpush3.bf16.msra.mxu1 %v7320_v4  ;;  %v7305_v4 = vld [vmem:[#allocation10 + $0x1c4] ss:$8 sps:$4 sm:$0xff]  }
 0x363   :  { %5526 = vmatprep.subr.bf16.mxu0 %v7230_v36  ;;  %6663 = vmatprep.subr.bf16.mxu1 %v7321_v26  ;;  %v7303_v26 = vld [vmem:[#allocation10 + $0x1c0] ss:$8 sps:$4 sm:$0xff]  }
 0x366   :  { %5527 = vmatpush1.bf16.msra.mxu0 %v7228_v37  ;;  %6664 = vmatpush3.bf16.msra.mxu1 %v7322_v40  ;;  %v7308_v40 = vld [vmem:[#allocation10 + $0x1d4] ss:$8 sps:$4 sm:$0xff]  }
 0x367   :  { %5528 = vmatprep.subr.bf16.mxu0 %v7233_v38  ;;  %6665 = vmatprep.subr.bf16.mxu1 %v7323_v10  ;;  %v7306_v10 = vld [vmem:[#allocation10 + $0x1d0] ss:$8 sps:$4 sm:$0xff]  }
 0x36a   :  { %5529 = vmatpush1.bf16.msra.mxu0 %v7231_v39  ;;  %6666 = vmatpush3.bf16.msra.mxu1 %v7324_v5  ;;  %v7311_v5 = vld [vmem:[#allocation10 + $0x1e4] ss:$8 sps:$4 sm:$0xff]  }
 0x36b   :  { %5530 = vmatprep.subr.bf16.mxu0 %v7236_v41  ;;  %6667 = vmatprep.subr.bf16.mxu1 %v7325_v7  ;;  %v7309_v7 = vld [vmem:[#allocation10 + $0x1e0] ss:$8 sps:$4 sm:$0xff]  }
 0x36e   :  { %5531 = vmatpush1.bf16.msra.mxu0 %v7234_v59 }
 0x36f   :  { %5532 = vmatprep.subr.bf16.mxu0 %v7239_v18 }
 0x372   :  { %5533 = vmatpush1.bf16.msra.mxu0 %v7237_v60 }
 0x373   :  { %5534 = vmatprep.subr.bf16.mxu0 %v7242_v61 }
 0x376   :  { %5535 = vmatpush1.bf16.msra.mxu0 %v7240_v62  ;;  %v7267_v62 = vld [vmem:[#allocation10 + $0x100] ss:$8 sps:$4 sm:$0xff]  }
 0x377   :  { %5536 = vmatprep.subr.bf16.mxu0 %v7245_v42  ;;  %v7272_v42 = vld [vmem:[#allocation10 + $0x114] ss:$8 sps:$4 sm:$0xff]  }
 0x37a   :  { %5537 = vmatpush1.bf16.msra.mxu0 %v7243_v43  ;;  %v7270_v43 = vld [vmem:[#allocation10 + $0x110] ss:$8 sps:$4 sm:$0xff]  }
 0x37b   :  { %5538 = vmatprep.subr.bf16.mxu0 %v7248_v11  ;;  %v7275_v11 = vld [vmem:[#allocation10 + $0x124] ss:$8 sps:$4 sm:$0xff]  }
 0x37e   :  { %5539 = vmatpush1.bf16.msra.mxu0 %v7246_v12  ;;  %v7273_v12 = vld [vmem:[#allocation10 + $0x120] ss:$8 sps:$4 sm:$0xff]  }
 0x37f   :  { %5540 = vmatprep.subr.bf16.mxu0 %v7251_v15  ;;  %v7278_v15 = vld [vmem:[#allocation10 + $0x134] ss:$8 sps:$4 sm:$0xff]  }
 0x382   :  { %5541 = vmatpush1.bf16.msra.mxu0 %v7249_v44  ;;  %v7276_v44 = vld [vmem:[#allocation10 + $0x130] ss:$8 sps:$4 sm:$0xff]  }
 0x383   :  { %5542 = vmatprep.subr.bf16.mxu0 %v7254_v45  ;;  %v7281_v45 = vld [vmem:[#allocation10 + $0x144] ss:$8 sps:$4 sm:$0xff]  }
 0x386   :  { %5543 = vmatpush1.bf16.msra.mxu0 %v7252_v46  ;;  %v7279_v46 = vld [vmem:[#allocation10 + $0x140] ss:$8 sps:$4 sm:$0xff]  }
 0x387   :  { %5544 = vmatprep.subr.bf16.mxu0 %v7257_v47  ;;  %v7284_v47 = vld [vmem:[#allocation10 + $0x154] ss:$8 sps:$4 sm:$0xff]  }
 0x38a   :  { %5545 = vmatpush1.bf16.msra.mxu0 %v7255_v48  ;;  %v7282_v48 = vld [vmem:[#allocation10 + $0x150] ss:$8 sps:$4 sm:$0xff]  }
 0x38b   :  { %5546 = vmatprep.subr.bf16.mxu0 %v7260_v50  ;;  %v7287_v50 = vld [vmem:[#allocation10 + $0x164] ss:$8 sps:$4 sm:$0xff]  }
 0x38e   :  { %5547 = vmatpush1.bf16.msra.mxu0 %v7258_v53  ;;  %v7285_v53 = vld [vmem:[#allocation10 + $0x160] ss:$8 sps:$4 sm:$0xff]  }
 0x38f   :  { %5548 = vmatprep.subr.bf16.mxu0 %v7263_v51  ;;  %v7290_v51 = vld [vmem:[#allocation10 + $0x174] ss:$8 sps:$4 sm:$0xff]  }
 0x392   :  { %5549 = vmatpush1.bf16.msra.mxu0 %v7261_v54  ;;  %v7288_v54 = vld [vmem:[#allocation10 + $0x170] ss:$8 sps:$4 sm:$0xff]  }
 0x393   :  { %5550 = vmatprep.subr.bf16.mxu0 %v7266_v55  ;;  %v7293_v55 = vld [vmem:[#allocation10 + $0x184] ss:$8 sps:$4 sm:$0xff]  }
 0x396   :  { %5551 = vmatpush1.bf16.msra.mxu0 %v7264_v56  ;;  %v7291_v56 = vld [vmem:[#allocation10 + $0x180] ss:$8 sps:$4 sm:$0xff]  }
 0x397   :  { %5563 = vmatprep.subr.bf16.mxu0 %v7269_v57  ;;  %v7296_v57 = vld [vmem:[#allocation10 + $0x194] ss:$8 sps:$4 sm:$0xff]  }
 0x42c   :  { %v4931_v13 = vpop.f32.mrb[8].mxu0  ;;  %v5103_v14 = vpop.f32.mrb[8].mxu1 }
 0x42d   :  { %v6724_v16 = vadd.f32 %v4931_v13, %v3471_v30  ;;  %v6728_v17 = vadd.f32 %v5103_v14, %v3479_v31  ;;  %v4933_v19 = vpop.f32.mrb[9].mxu0  ;;  %v5105_v20 = vpop.f32.mrb[9].mxu1  ;;  %v7329_v13 = vld [vmem:[#allocation13 + $0x78] sm:$0xff]  }
 0x42e   :  { %v6725_v21 = vadd.f32 %v4933_v19, %v3475_v8  ;;  %v6729_v22 = vadd.f32 %v5105_v20, %v3483_v49  ;;  %v4935_v23 = vpop.f32.mrb[10].mxu0  ;;  %v5107_v24 = vpop.f32.mrb[10].mxu1  ;;  %v7330_v14 = vld [vmem:[#allocation13 + $0x38] sm:$0xff]  }
 0x42f   :  { %v6726_v25 = vadd.f32 %v4935_v23, %v3471_v30  ;;  %v6730_v27 = vadd.f32 %v5107_v24, %v3479_v31  ;;  %v4937_v32 = vpop.f32.mrb[11].mxu0  ;;  %v5109_v33 = vpop.f32.mrb[11].mxu1  ;;  %v5112_v35 = vmax.f32 %v6724_v16, 0.0  ;;  %v5114_v36 = vmax.f32 %v6728_v17, 0.0  ;;  %v7312_v30 = vld [vmem:[#allocation10 + $0x1f0] ss:$8 sps:$4 sm:$0xff]  }
 0x430   :  { %v6727_v9 = vadd.f32 %v4937_v32, %v3475_v8  ;;  %v6731_v34 = vadd.f32 %v5109_v33, %v3483_v49  ;;  %v5113_v37 = vmax.f32 %v6725_v21, 0.0  ;;  %v5115_v38 = vmax.f32 %v6729_v22, 0.0  ;;  %v7326_v31 = vld [vmem:[#allocation13 + $0x28] sm:$0xff]   ;;  %v7327_v8 = vld [vmem:[#allocation13 + $0x70] sm:$0xff]   ;;  %v5188_v17 = vld [vmem:[#allocation11] sm:$0x3] }
 0x431   :  { %v5116_v52 = vmax.f32 %v6726_v25, 0.0  ;;  %v5118_v29 = vmax.f32 %v6730_v27, 0.0  ;;  %6668 = vmatpush3.bf16.msra.mxu1 %v7326_v31  ;;  %v7328_v49 = vld [vmem:[#allocation13 + $0x30] sm:$0xff]   ;;  %v7614_v16 = vmov 0.0   ;;  %v5193_v19 = vrot.slane %v5188_v17, %v7937_v6 }
 0x432   :  { %v5117_v39 = vmax.f32 %v6727_v9, 0.0  ;;  %v5119_v41 = vmax.f32 %v6731_v34, 0.0  ;;  %6669 = vmatprep.subr.bf16.mxu1 %v7327_v8  ;;  %v5197_v20 = vrot.slane %v5188_v17, %v7943_v63  ;;  %v7332_v6 = vld [vmem:[#allocation16 + $0x8] sm:$0xff]   ;;  %v7333_v63 = vld [vmem:[#allocation16 + $0x10] sm:$0xff]  }
 0x433   :  { %v5120_v59 = vpack.c.bf16 %v5116_v52, %v5112_v35  ;;  %v7986_v18 = vpack.c.bf16 %v5118_v29, %v5114_v36 }
 0x434   :  { %v5121_v60 = vpack.c.bf16 %v5117_v39, %v5113_v37  ;;  %v5123_v61 = vpack.c.bf16 %v5119_v41, %v5115_v38  ;;  %v7331_v37 = vld [vmem:[#allocation16] sm:$0xff]   ;;  %v7334_v38 = vld [vmem:[#allocation16 + $0x18] sm:$0xff]   ;;  %v7336_v41 = vld [vmem:[#allocation16 + $0x28] sm:$0xff]  }
 0x435   :  { %6670 = vmatpush3.bf16.msra.mxu1 %v7328_v49  ;;  %v7335_v39 = vld [vmem:[#allocation16 + $0x20] sm:$0xff]  }
 0x436   :  { %5552 = vmatprep.mubr.bf16.mxu0 %v5121_v60  ;;  %6671 = vmatprep.subr.bf16.mxu1 %v7329_v13 }
 0x437   :  { %5553 = vmatmul.mubr.bf16.vlgmr.msra.gmra.mrb[12].mxu0 %v5120_v59  ;;  %v7337_v59 = vld [vmem:[#allocation16 + $0x30] sm:$0xff]  }
 0x438   :  { %5564 = vmatpush1.bf16.msra.mxu0 %v7267_v62  ;;  %5595 = vmatprep.mubr.bf16.mxu0 %v5123_v61  ;;  %v6631_v61 = vld [vmem:[#allocation14] ss:$0 sm:$0xff] }
 0x439   :  { %5565 = vmatprep.subr.bf16.mxu0 %v7272_v42  ;;  %6672 = vmatpush3.bf16.msra.mxu1 %v7330_v14 }
 0x43a   :  { %6688 = vmatprep.subr.bf16.mxu1 %v7614_v16 }
 0x43c   :  { %5566 = vmatpush1.bf16.msra.mxu0 %v7270_v43 }
 0x43d   :  { %5567 = vmatprep.subr.bf16.mxu0 %v7275_v11 }
 0x440   :  { %5568 = vmatpush1.bf16.msra.mxu0 %v7273_v12 }
 0x441   :  { %5569 = vmatprep.subr.bf16.mxu0 %v7278_v15 }
 0x444   :  { %5570 = vmatpush1.bf16.msra.mxu0 %v7276_v44 }
 0x445   :  { %5571 = vmatprep.subr.bf16.mxu0 %v7281_v45 }
 0x448   :  { %5572 = vmatpush1.bf16.msra.mxu0 %v7279_v46 }
 0x449   :  { %5573 = vmatprep.subr.bf16.mxu0 %v7284_v47 }
 0x44c   :  { %5574 = vmatpush1.bf16.msra.mxu0 %v7282_v48  ;;  %v6648_v48 = vld [vmem:[#allocation17] ss:$0 sm:$0xff] }
 0x44d   :  { %5575 = vmatprep.subr.bf16.mxu0 %v7287_v50 }
 0x450   :  { %5576 = vmatpush1.bf16.msra.mxu0 %v7285_v53 }
 0x451   :  { %5577 = vmatprep.subr.bf16.mxu0 %v7290_v51 }
 0x454   :  { %5578 = vmatpush1.bf16.msra.mxu0 %v7288_v54 }
 0x455   :  { %5579 = vmatprep.subr.bf16.mxu0 %v7293_v55 }
 0x458   :  { %5580 = vmatpush1.bf16.msra.mxu0 %v7291_v56 }
 0x459   :  { %5581 = vmatprep.subr.bf16.mxu0 %v7296_v57 }
 0x45c   :  { %5582 = vmatpush1.bf16.msra.mxu0 %v7294_v58 }
 0x45d   :  { %5583 = vmatprep.subr.bf16.mxu0 %v7299_v0 }
 0x460   :  { %5584 = vmatpush1.bf16.msra.mxu0 %v7297_v1 }
 0x461   :  { %5585 = vmatprep.subr.bf16.mxu0 %v7302_v2 }
 0x464   :  { %5586 = vmatpush1.bf16.msra.mxu0 %v7300_v3 }
 0x465   :  { %5587 = vmatprep.subr.bf16.mxu0 %v7305_v4 }
 0x468   :  { %5588 = vmatpush1.bf16.msra.mxu0 %v7303_v26 }
 0x469   :  { %5589 = vmatprep.subr.bf16.mxu0 %v7308_v40 }
 0x46c   :  { %5590 = vmatpush1.bf16.msra.mxu0 %v7306_v10 }
 0x46d   :  { %5591 = vmatprep.subr.bf16.mxu0 %v7311_v5 }
 0x470   :  { %5592 = vmatpush1.bf16.msra.mxu0 %v7309_v7 }
 0x471   :  { %5593 = vmatprep.subr.bf16.mxu0 %v7314_v28 }
 0x474   :  { %5594 = vmatpush1.bf16.msra.mxu0 %v7312_v30 }
 0x477   :  { %5596 = vmatmul.mubr.bf16.vlgmr.msra.gmra.mrb[12].mxu0 %v7986_v18  ;;  %v7338_v18 = vld [vmem:[#allocation16 + $0x38] sm:$0xff]  }
 0x54a   :  { %v5597_v21 = vpop.f32.mrb[12].mxu0 }
 0x54b   :  { %v6732_v22 = vadd.f32 %v5597_v21, %v5193_v19  ;;  %v5599_v23 = vpop.f32.mrb[13].mxu0 }
 0x54c   :  { %v6733_v24 = vadd.f32 %v5599_v23, %v5197_v20  ;;  %v5601_v25 = vpop.f32.mrb[14].mxu0 }
 0x54d   :  { %v6734_v27 = vadd.f32 %v5601_v25, %v5193_v19  ;;  %v5603_v32 = vpop.f32.mrb[15].mxu0  ;;  %v5606_v9 = vmax.f32 %v6732_v22, 0.0 }
 0x54e   :  { %v6735_v33 = vadd.f32 %v5603_v32, %v5197_v20  ;;  %v5607_v35 = vmax.f32 %v6733_v24, 0.0 }
 0x54f   :  { %v5608_v34 = vmax.f32 %v6734_v27, 0.0 }
 0x550   :  { %v5609_v36 = vmax.f32 %v6735_v33, 0.0 }
 0x551   :  { %v5610_v52 = vpack.c.bf16 %v5608_v34, %v5606_v9 }
 0x552   :  { %v5611_v29 = vpack.c.bf16 %v5609_v36, %v5607_v35 }
 0x554   :  { %5779 = vmatprep.mubr.bf16.mxu1 %v5611_v29 }
 0x555   :  { %5780 = vmatmul.mubr.bf16.vlgmr.msra.gmra.mrb[12].mxu1 %v5610_v52 }
 0x556   :  { %6689 = vmatpush3.bf16.msra.mxu1 %v7331_v37  ;;  %6704 = vmatprep.mubr.msk.bf16.mxu1 %vm7615_vm0, %v7614_v16 }
 0x557   :  { %6690 = vmatprep.subr.bf16.mxu1 %v7614_v16 }
 0x55a   :  { %6691 = vmatpush3.bf16.msra.mxu1 %v7332_v6 }
 0x55b   :  { %6692 = vmatprep.subr.bf16.mxu1 %v7614_v16 }
 0x55e   :  { %6693 = vmatpush3.bf16.msra.mxu1 %v7333_v63 }
 0x55f   :  { %6694 = vmatprep.subr.bf16.mxu1 %v7614_v16 }
 0x562   :  { %6695 = vmatpush3.bf16.msra.mxu1 %v7334_v38 }
 0x563   :  { %6696 = vmatprep.subr.bf16.mxu1 %v7614_v16 }
 0x566   :  { %6697 = vmatpush3.bf16.msra.mxu1 %v7335_v39 }
 0x567   :  { %6698 = vmatprep.subr.bf16.mxu1 %v7614_v16 }
 0x56a   :  { %6699 = vmatpush3.bf16.msra.mxu1 %v7336_v41 }
 0x56b   :  { %6700 = vmatprep.subr.bf16.mxu1 %v7614_v16 }
 0x56e   :  { %6701 = vmatpush3.bf16.msra.mxu1 %v7337_v59 }
 0x56f   :  { %6702 = vmatprep.subr.bf16.mxu1 %v7614_v16 }
 0x572   :  { %6703 = vmatpush3.bf16.msra.mxu1 %v7338_v18 }
 0x628   :  { %v6673_v60 = vpop.f32.mrb[12].mxu1 }
 0x629   :  { %v6674_v62 = vpop.f32.mrb[13].mxu1 }
 0x62a   :  { %v6675_v42 = vadd.f32 %v6674_v62, %v6673_v60  ;;  %v6676_v43 = vpop.f32.mrb[14].mxu1 }
 0x62b   :  { %v6677_v11 = vpop.f32.mrb[15].mxu1 }
 0x62c   :  { %v5782_v12 = vadd.f32 %v6675_v42, %v6631_v61  ;;  %v6678_v15 = vadd.f32 %v6677_v11, %v6676_v43 }
 0x62e   :  { %v5785_v44 = vadd.f32 %v6678_v15, %v6631_v61  ;;  %v5788_v45 = vmax.f32 %v5782_v12, 0.0 }
 0x630   :  { %v5789_v46 = vmax.f32 %v5785_v44, 0.0 }
 0x632   :  { %v5790_v47 = vpack.c.bf16 %v5789_v46, %v5788_v45 }
 0x634   :  { %6705 = vmatmul.mubr.bf16.vlgmr.msra.gmra.mrb[16].mxu1 %v5790_v47 }
 0x707   :  { %v5896_v50 = vpop.f32.mrb[16].mxu1 }
 0x708   :  { %v5897_v53 = vadd.f32 %v6648_v48, %v5896_v50  ;;  %v6706_v51 = vpop.f32.mrb[17].mxu1 }
 0x709   :  { %v5899_v54 = vpop.f32.mrb[18].mxu1 }
 0x70a   :  { %5903 = vst [vmem:[#allocation19] sm:$0xff] %v5897_v53  ;;  %v5900_v55 = vadd.f32 %v6648_v48, %v5899_v54  ;;  %v6707_v56 = vpop.f32.mrb[19].mxu1 }
 0x70c   :  { %5904 = vst [vmem:[#allocation19 + $0x8] sm:$0xff] %v5900_v55 }
 0x70d   :  { %5909 = vsyncadd [#allocation4], 224  ;;  %s7616_s0 = smov [#allocation19]  }
 0x70e   :  { %s5910_s29 = sshll.u32 %s7616_s0, 4  ;;  %s5911_s29 = int_to_ptr.vmem [resolvable:$true] %s5910_s29 }
 0x70f   :  { %s7559_s12 = scalar_lea.vmem %s5911_s29, 32  ;;  %s7563_s9 = scalar_lea.vmem %s5911_s29, 256 }
 0x710   :  { %p7560_p10 = scmp.ne.s32.totalorder %s5911_s29, %s7559_s12  ;;  %p7564_p11 = scmp.lt.s32.totalorder %s5911_s29, %s5911_s29 }
 0x711   :  { %p7565_p12 = scmp.lt.s32.totalorder %s7563_s9, %s7559_s12 }
 0x713   :  { %p7566_p13 = por %p7565_p12, %p7564_p11 }
 0x715   :  { %p7567_p0 = pnand %p7566_p13, %p7560_p10 }
 0x717   :  { %7570 = shalt.err (!%p7567_p0)
}
 0x718   :  { %s7571_s30 = scalar_lea.hbm %s8016_s11, 32 }
 0x719   :  { %p7572_p1 = scmp.ne.s32.totalorder %s8016_s11, %s7571_s30  ;;  %p7575_p2 = scmp.lt.u32.totalorder %s7571_s30, %s8016_s11 }
 0x71b   :  { %p7577_p3 = pnand %p7575_p2, %p7572_p1 }
 0x71d   :  { %7580 = shalt.err (!%p7577_p3)
}
 0x71e   :  { %s7617_s8 = smov 2  }
 0x71f   :  { %5916 = dma.vmem_to_hbm [thread:$0]  %s5911_s29, 32, %s8016_s11, [#allocation4], %s7601_s25, %s7601_s25, %s7617_s8  }
 0x720   :  { %7593 = dma.done.wait [#allocation4], 256  }
 0x721   :  { %7594 = vsyncadd [#allocation4], 4294967040 }
 0x722   :  { %5920 = vsyncpa [#allocation3], 1 }
 0x723   :  { %5921 = vsyncpa [#allocation6], 1 }
 0x724   :  { %5922 = vsyncpa [#allocation9], 1 }
 0x725   :  { %5923 = vsyncpa [#allocation12], 1 }
 0x726   :  { %5924 = vsyncpa [#allocation15], 1 }
 0x727   :  { %5925 = vsyncpa [#allocation18], 1 }
 0x728   :  { %5926 = vsyncpa [#allocation4], 1 }

</bundles_post_ra>
